<compile_context>
chip_gen: v7x
topology: tpu7x:2x2x1
jax: 0.10.0
libtpu: 0.0.40
codegen_flags: <defaults>
</compile_context>

<pallas_src>
import functools

import jax
import jax.numpy as jnp
from jax.experimental import pallas as pl
from jax.experimental.pallas import tpu as pltpu


# ---------------------------------------------------------------------------
# Fused single-call kernel: full out_features in one block.
# ---------------------------------------------------------------------------
def _zinb_fused_kernel(x_ref, wf_ref, wd_ref, wp_ref, sfac_ref,
                       norm_ref, disper_ref, droprate_ref, scale_ref):
    x = x_ref[...]                                            # (tb, K) f32

    # normalized = softmax(x @ feature, axis=1)
    lf = jnp.dot(x, wf_ref[...], preferred_element_type=jnp.float32)
    ef = jnp.exp(lf - jnp.max(lf, axis=1, keepdims=True))
    norm = ef * (1.0 / jnp.sum(ef, axis=1, keepdims=True))    # exact reciprocal
    norm_ref[...] = norm.astype(norm_ref.dtype)

    # scale_x = exp(scale_factor) * normalized
    sfac = sfac_ref[...].astype(jnp.float32)                  # (tb, 1)
    scale_ref[...] = (jnp.exp(sfac) * norm).astype(scale_ref.dtype)

    # disperation = exp(softmax(x @ disper, axis=1))
    ld = jnp.dot(x, wd_ref[...], preferred_element_type=jnp.float32)
    ed = jnp.exp(ld - jnp.max(ld, axis=1, keepdims=True))
    soft_d = ed * (1.0 / jnp.sum(ed, axis=1, keepdims=True))
    disper_ref[...] = jnp.exp(soft_d).astype(disper_ref.dtype)

    # dropoutrate = x @ dropout
    droprate_ref[...] = jnp.dot(
        x, wp_ref[...], preferred_element_type=jnp.float32).astype(droprate_ref.dtype)


# ---------------------------------------------------------------------------
# Column-tiled two-pass path (for out_features that do not fit VMEM).
# Pass 1: online softmax statistics (row max, row sum of exp) over column tiles.
# ---------------------------------------------------------------------------
def _zinb_stats_kernel(x_ref, wf_ref, wd_ref,
                       rowmax_f_ref, rowsum_f_ref, rowmax_d_ref, rowsum_d_ref,
                       mf_acc, sf_acc, md_acc, sd_acc,
                       *, block_n, out_features, mask_cols):
    j = pl.program_id(1)

    @pl.when(j == 0)
    def _():
        mf_acc[...] = jnp.full_like(mf_acc, -jnp.inf)
        sf_acc[...] = jnp.zeros_like(sf_acc)
        md_acc[...] = jnp.full_like(md_acc, -jnp.inf)
        sd_acc[...] = jnp.zeros_like(sd_acc)

    x = x_ref[...]
    lf = jnp.dot(x, wf_ref[...], preferred_element_type=jnp.float32)
    ld = jnp.dot(x, wd_ref[...], preferred_element_type=jnp.float32)
    if mask_cols:  # zero-padded weight columns must not enter the softmax stats
        col = j * block_n + jax.lax.broadcasted_iota(jnp.int32, lf.shape, 1)
        valid = col < out_features
        lf = jnp.where(valid, lf, -jnp.inf)
        ld = jnp.where(valid, ld, -jnp.inf)

    m_new = jnp.maximum(mf_acc[...], jnp.max(lf, axis=1, keepdims=True))
    sf_acc[...] = sf_acc[...] * jnp.exp(mf_acc[...] - m_new) + jnp.sum(
        jnp.exp(lf - m_new), axis=1, keepdims=True)
    mf_acc[...] = m_new

    m_new = jnp.maximum(md_acc[...], jnp.max(ld, axis=1, keepdims=True))
    sd_acc[...] = sd_acc[...] * jnp.exp(md_acc[...] - m_new) + jnp.sum(
        jnp.exp(ld - m_new), axis=1, keepdims=True)
    md_acc[...] = m_new

    @pl.when(j == pl.num_programs(1) - 1)
    def _():
        rowmax_f_ref[...] = mf_acc[...]
        rowsum_f_ref[...] = sf_acc[...]
        rowmax_d_ref[...] = md_acc[...]
        rowsum_d_ref[...] = sd_acc[...]


# Pass 2: recompute logits per column tile and write all four outputs.
def _zinb_output_kernel(x_ref, wf_ref, wd_ref, wp_ref,
                        rowmax_f_ref, rowsum_f_ref, rowmax_d_ref, rowsum_d_ref,
                        sfac_ref,
                        norm_ref, disper_ref, droprate_ref, scale_ref):
    x = x_ref[...]
    inv_f = 1.0 / rowsum_f_ref[...]
    inv_d = 1.0 / rowsum_d_ref[...]

    lf = jnp.dot(x, wf_ref[...], preferred_element_type=jnp.float32)
    norm = jnp.exp(lf - rowmax_f_ref[...]) * inv_f
    norm_ref[...] = norm.astype(norm_ref.dtype)
    scale_ref[...] = (jnp.exp(sfac_ref[...].astype(jnp.float32)) * norm
                      ).astype(scale_ref.dtype)

    ld = jnp.dot(x, wd_ref[...], preferred_element_type=jnp.float32)
    disper_ref[...] = jnp.exp(jnp.exp(ld - rowmax_d_ref[...]) * inv_d
                              ).astype(disper_ref.dtype)

    droprate_ref[...] = jnp.dot(
        x, wp_ref[...], preferred_element_type=jnp.float32).astype(droprate_ref.dtype)


# ---------------------------------------------------------------------------
# Helpers.
# ---------------------------------------------------------------------------
def _pick_block_b(batch, requested):
    """Largest divisor of `batch` <= requested, preferring %16 (then %8) tiles and
    >= 2 grid steps (both v7x TensorCores busy).  Falls back to the full batch."""
    cap = min(requested, batch)
    if batch >= 32:
        cap = min(cap, batch // 2)
    for mult in (16, 8):
        for cand in range(cap, 0, -1):
            if batch % cand == 0 and cand % mult == 0:
                return cand
    return batch


def _vmem_capacity_bytes():
    try:
        return int(pltpu.get_tpu_info().vmem_capacity_bytes)
    except Exception:
        return 64 * 1024 * 1024   # conservative fallback = v7x per-TC VMEM


def _vmem_limit(needed_bytes, capacity):
    budget = capacity - 16 * 1024 * 1024       # headroom for Mosaic internal scratch
    return int(max(min(int(needed_bytes * 1.4), budget),
                   min(32 * 1024 * 1024, budget)))


def _resident_weight_spec(shape, single_buffer):
    """BlockSpec for a weight slab whose block index never changes.

    Requests a single pipeline buffer (halves resident weight VMEM) when the
    running jax supports pipeline_mode=pl.Buffered; otherwise default buffering."""
    index_map = lambda i: (0, 0)
    if single_buffer and hasattr(pl, "Buffered"):
        try:
            return pl.BlockSpec(shape, index_map, pipeline_mode=pl.Buffered(1))
        except TypeError:
            pass
    return pl.BlockSpec(shape, index_map)


# ---------------------------------------------------------------------------
# Jitted implementations.
# ---------------------------------------------------------------------------
@functools.partial(jax.jit, static_argnames=("block_b", "out_dtype",
                                              "single_buffer", "vmem_limit"))
def _zinb_fused(x, wf, wd, wp, sfac, *, block_b, out_dtype, single_buffer,
                vmem_limit):
    B, K = x.shape
    O = wf.shape[1]
    tb = block_b
    out_bytes = jnp.dtype(out_dtype).itemsize
    out_sds = jax.ShapeDtypeStruct((B, O), out_dtype)

    x_spec = pl.BlockSpec((tb, K), lambda i: (i, 0))
    w_spec = _resident_weight_spec((K, O), single_buffer)
    sfac_spec = pl.BlockSpec((tb, 1), lambda i: (i, 0))
    o_spec = pl.BlockSpec((tb, O), lambda i: (i, 0))

    cost = pl.CostEstimate(
        flops=2 * B * K * 3 * O,
        transcendentals=3 * B * O + B,
        bytes_accessed=B * K * 4 + 3 * K * O * 4 + B * 4 + 4 * B * O * out_bytes)

    return pl.pallas_call(
        _zinb_fused_kernel,
        out_shape=(out_sds, out_sds, out_sds, out_sds),
        grid_spec=pltpu.PrefetchScalarGridSpec(
            num_scalar_prefetch=0,
            grid=(B // tb,),
            in_specs=[x_spec, w_spec, w_spec, w_spec, sfac_spec],
            out_specs=[o_spec, o_spec, o_spec, o_spec]),
        compiler_params=pltpu.CompilerParams(
            dimension_semantics=("parallel",),
            vmem_limit_bytes=vmem_limit),
        cost_estimate=cost,
    )(x, wf, wd, wp, sfac)


@functools.partial(jax.jit, static_argnames=("block_b", "block_n", "out_features",
                                              "out_dtype", "vmem_limit"))
def _zinb_tiled(x, wf, wd, wp, sfac, *, block_b, block_n, out_features,
                out_dtype, vmem_limit):
    # Weights arrive zero-padded to a multiple of block_n columns.
    B, K = x.shape
    O_pad = wf.shape[1]
    tb, tn = block_b, block_n
    nb, nj = B // tb, O_pad // tn
    mask_cols = O_pad != out_features
    out_bytes = jnp.dtype(out_dtype).itemsize

    x_spec = pl.BlockSpec((tb, K), lambda i, j: (i, 0))
    w_spec = pl.BlockSpec((K, tn), lambda i, j: (0, j))
    col_spec = pl.BlockSpec((tb, 1), lambda i, j: (i, 0))
    stat_sds = jax.ShapeDtypeStruct((B, 1), jnp.float32)

    # Pass 1: softmax stats (reduction axis j last, marked "arbitrary").
    stats_kernel = functools.partial(
        _zinb_stats_kernel, block_n=tn, out_features=out_features,
        mask_cols=mask_cols)
    mf, sf_sum, md, sd_sum = pl.pallas_call(
        stats_kernel,
        out_shape=(stat_sds, stat_sds, stat_sds, stat_sds),
        grid_spec=pltpu.PrefetchScalarGridSpec(
            num_scalar_prefetch=0,
            grid=(nb, nj),
            in_specs=[x_spec, w_spec, w_spec],
            out_specs=[col_spec, col_spec, col_spec, col_spec],
            scratch_shapes=[pltpu.VMEM((tb, 1), jnp.float32)] * 4),
        compiler_params=pltpu.CompilerParams(
            dimension_semantics=("parallel", "arbitrary"),
            vmem_limit_bytes=vmem_limit),
        cost_estimate=pl.CostEstimate(
            flops=2 * B * K * 2 * O_pad,
            transcendentals=2 * B * O_pad,
            bytes_accessed=B * K * 4 + 2 * K * O_pad * 4 + 4 * B * 4),
    )(x, wf, wd)

    # Pass 2: outputs, fully parallel over (batch tile, column tile).
    out_sds = jax.ShapeDtypeStruct((B, O_pad), out_dtype)
    o_spec = pl.BlockSpec((tb, tn), lambda i, j: (i, j))
    norm, disp, drop, scale = pl.pallas_call(
        _zinb_output_kernel,
        out_shape=(out_sds, out_sds, out_sds, out_sds),
        grid_spec=pltpu.PrefetchScalarGridSpec(
            num_scalar_prefetch=0,
            grid=(nb, nj),
            in_specs=[x_spec, w_spec, w_spec, w_spec,
                      col_spec, col_spec, col_spec, col_spec, col_spec],
            out_specs=[o_spec, o_spec, o_spec, o_spec]),
        compiler_params=pltpu.CompilerParams(
            dimension_semantics=("parallel", "parallel"),
            vmem_limit_bytes=vmem_limit),
        cost_estimate=pl.CostEstimate(
            flops=2 * B * K * 3 * O_pad,
            transcendentals=3 * B * O_pad + B,
            bytes_accessed=(B * K * 4 + 3 * K * O_pad * 4 + 5 * B * 4
                            + 4 * B * O_pad * out_bytes)),
    )(x, wf, wd, wp, mf, sf_sum, md, sd_sum, sfac)

    if mask_cols:
        norm = norm[:, :out_features]
        disp = disp[:, :out_features]
        drop = drop[:, :out_features]
        scale = scale[:, :out_features]
    return norm, disp, drop, scale


# ---------------------------------------------------------------------------
# Public wrapper.
# ---------------------------------------------------------------------------
_SINGLE_BUFFER_OK = None   # per-jax-version test of pipeline_mode=pl.Buffered(1)


def zinb_data_decoder(x, feature, disper, dropout, scale_factor=None, *,
                      block_b=128, block_n=512, out_dtype=jnp.bfloat16,
                      force_column_tiling=False):
    """Pallas implementation of ZINBDataDecoder.forward.

    x:                       (B, in_features) float32
    feature/disper/dropout:  (in_features, out_features) float32
    scale_factor:            scalar, (B,), or (B, 1); defaults to 1.0 (PyTorch default)
    Returns dict(normalized, disperation, dropoutrate, scale_x), each (B, out_features)
    in `out_dtype` (bfloat16 by default; pass jnp.float32 for full output precision).
    """
    global _SINGLE_BUFFER_OK

    x = jnp.asarray(x, jnp.float32)
    feature = jnp.asarray(feature, jnp.float32)
    disper = jnp.asarray(disper, jnp.float32)
    dropout = jnp.asarray(dropout, jnp.float32)
    B, K = x.shape
    O = feature.shape[1]

    # PyTorch's scale_factor.resize_(batch, 1) + broadcast, reproduced functionally.
    if scale_factor is None:
        sfac = jnp.ones((B, 1), jnp.float32)
    else:
        sfac = jnp.broadcast_to(
            jnp.asarray(scale_factor, jnp.float32).reshape(-1, 1), (B, 1))

    tb = _pick_block_b(B, block_b)
    out_bytes = jnp.dtype(out_dtype).itemsize
    capacity = _vmem_capacity_bytes()
    budget = capacity - 16 * 1024 * 1024

    # Conservative fused-path footprint (double-buffered x / weights / outputs plus
    # the live f32 temporaries of one product).
    fused_bytes = (2 * tb * K * 4 + 2 * 3 * K * O * 4 + 2 * tb * 4
                   + 2 * 4 * tb * O * out_bytes + 3 * tb * O * 4)
    use_tiled = force_column_tiling or fused_bytes > budget

    if not use_tiled:
        vmem_limit = _vmem_limit(fused_bytes, capacity)
        call = functools.partial(_zinb_fused, x, feature, disper, dropout, sfac,
                                 block_b=tb, out_dtype=out_dtype,
                                 vmem_limit=vmem_limit)
        if _SINGLE_BUFFER_OK is None:
            try:
                outs = call(single_buffer=True)
                jax.block_until_ready(outs)
                _SINGLE_BUFFER_OK = True
            except Exception:
                _SINGLE_BUFFER_OK = False
                outs = call(single_buffer=False)
        else:
            outs = call(single_buffer=_SINGLE_BUFFER_OK)
    else:
        tn = max(128, (min(block_n, 1024) // 128) * 128)
        O_pad = ((O + tn - 1) // tn) * tn
        if O_pad != O:
            pad = ((0, 0), (0, O_pad - O))
            wf, wd, wp = jnp.pad(feature, pad), jnp.pad(disper, pad), jnp.pad(dropout, pad)
        else:
            wf, wd, wp = feature, disper, dropout
        tiled_bytes = (2 * tb * K * 4 + 2 * 3 * K * tn * 4 + 2 * 5 * tb * 4
                       + 2 * 4 * tb * tn * out_bytes + 3 * tb * tn * 4)
        vmem_limit = _vmem_limit(tiled_bytes, capacity)
        outs = _zinb_tiled(x, wf, wd, wp, sfac, block_b=tb, block_n=tn,
                           out_features=O, out_dtype=out_dtype,
                           vmem_limit=vmem_limit)

    norm, disp, drop, scale = outs
    return dict(normalized=norm, disperation=disp, dropoutrate=drop, scale_x=scale)


# ---------------------------------------------------------------------------
# Reference & self-test.
# ---------------------------------------------------------------------------
def _reference(x, feature, disper, dropout, scale_factor):
    """Pure f32 JAX reference matching the PyTorch module."""
    normalized = jax.nn.softmax(jnp.dot(x, feature), axis=1)
    scale_x = jnp.exp(scale_factor) * normalized
    disper_x = jnp.exp(jax.nn.softmax(jnp.dot(x, disper), axis=1))
    dropout_rate = jnp.dot(x, dropout)
    return dict(normalized=normalized, disperation=disper_x,
                dropoutrate=dropout_rate, scale_x=scale_x)


def _check(out, ref, atol=1.5e-2, rtol=1.5e-2):
    for k in ("normalized", "disperation", "dropoutrate", "scale_x"):
        got = jnp.asarray(out[k], jnp.float32)
        assert got.shape == ref[k].shape, (k, got.shape, ref[k].shape)
        assert jnp.allclose(got, ref[k], atol=atol, rtol=rtol), k


if __name__ == "__main__":
    B, in_features, out_features = 256, 32, 256

    key = jax.random.PRNGKey(0)
    kx, kf, kd, kp = jax.random.split(key, 4)
    x = jax.random.normal(kx, (B, in_features), dtype=jnp.float32)
    feature = 0.1 * jax.random.normal(kf, (in_features, out_features), jnp.float32)
    disper = 0.1 * jax.random.normal(kd, (in_features, out_features), jnp.float32)
    dropout = 0.1 * jax.random.normal(kp, (in_features, out_features), jnp.float32)
    scale_factor = jnp.full((B, 1), 1.0, dtype=jnp.float32)

    ref = _reference(x, feature, disper, dropout, scale_factor)

    # 1) Fused single-call path (default routing at these shapes).
    out = zinb_data_decoder(x, feature, disper, dropout, scale_factor)
    jax.block_until_ready(out)
    _check(out, ref)

    # 2) Column-tiled two-pass path (forced), 128-wide column tiles -> 2 N tiles.
    out_t = zinb_data_decoder(x, feature, disper, dropout, scale_factor,
                              block_n=128, force_column_tiling=True)
    jax.block_until_ready(out_t)
    _check(out_t, ref)

    # 3) Column-tiled path with out_features not a multiple of 128 (exercises the
    #    zero-padding + -inf masking of padded logit columns).
    O2 = 200
    ref2 = _reference(x, feature[:, :O2], disper[:, :O2], dropout[:, :O2],
                      scale_factor)
    out2 = zinb_data_decoder(x, feature[:, :O2], disper[:, :O2], dropout[:, :O2],
                             scale_factor, block_n=128, force_column_tiling=True)
    jax.block_until_ready(out2)
    _check(out2, ref2)

    print("KERNEL_OK")
</pallas_src>

<mosaic_0001>
module attributes {stable_mosaic.version = 11 : i64} {
  func.func @_zinb_fused_kernel(%arg0: i32, %arg1: memref<128x32xf32, #tpu.memory_space<vmem>>, %arg2: memref<32x256xf32, #tpu.memory_space<vmem>>, %arg3: memref<32x256xf32, #tpu.memory_space<vmem>>, %arg4: memref<32x256xf32, #tpu.memory_space<vmem>>, %arg5: memref<128x1xf32, #tpu.memory_space<vmem>>, %arg6: memref<128x256xbf16, #tpu.memory_space<vmem>>, %arg7: memref<128x256xbf16, #tpu.memory_space<vmem>>, %arg8: memref<128x256xbf16, #tpu.memory_space<vmem>>, %arg9: memref<128x256xbf16, #tpu.memory_space<vmem>>) attributes {dimension_semantics = [#tpu.dimension_semantics<parallel>], iteration_bounds = array<i64: 2>, scalar_prefetch = 0 : i64, scratch_operands = 0 : i64, tpu.core_type = #tpu.core_type<tc>, window_params = [{transform_indices = @transform_0, window_bounds = array<i64: 128, 32>}, {pipeline_mode = #tpu.pipeline_mode<synchronous>, transform_indices = @transform_1, window_bounds = array<i64: 32, 256>}, {pipeline_mode = #tpu.pipeline_mode<synchronous>, transform_indices = @transform_2, window_bounds = array<i64: 32, 256>}, {pipeline_mode = #tpu.pipeline_mode<synchronous>, transform_indices = @transform_3, window_bounds = array<i64: 32, 256>}, {transform_indices = @transform_4, window_bounds = array<i64: 128, 1>}, {transform_indices = @transform_5, window_bounds = array<i64: 128, 256>}, {transform_indices = @transform_6, window_bounds = array<i64: 128, 256>}, {transform_indices = @transform_7, window_bounds = array<i64: 128, 256>}, {transform_indices = @transform_8, window_bounds = array<i64: 128, 256>}]} {
    %c0 = arith.constant 0 : index
    %c0_0 = arith.constant 0 : index
    %0 = vector.load %arg1[%c0, %c0_0] : memref<128x32xf32, #tpu.memory_space<vmem>>, vector<128x32xf32>
    %c0_1 = arith.constant 0 : index
    %c0_2 = arith.constant 0 : index
    %1 = vector.load %arg2[%c0_1, %c0_2] : memref<32x256xf32, #tpu.memory_space<vmem>>, vector<32x256xf32>
    %cst = arith.constant dense<0.000000e+00> : vector<128x256xf32>
    %2 = tpu.matmul %0, %1, %cst {dimension_numbers = #tpu.dot_dimension_numbers<[1], [0], [0], [1], [0, 0, 1, 1], [], []>} : vector<128x32xf32>, vector<32x256xf32>, vector<128x256xf32> -> vector<128x256xf32>
    %cst_3 = arith.constant dense<0xFF800000> : vector<128xf32>
    %3 = vector.multi_reduction <maximumf>, %2, %cst_3 [1] : vector<128x256xf32> to vector<128xf32>
    %4 = vector.shape_cast %3 : vector<128xf32> to vector<128x1xf32>
    %5 = vector.broadcast %4 : vector<128x1xf32> to vector<128x256xf32>
    %6 = arith.subf %2, %5 : vector<128x256xf32>
    %7 = math.exp %6 : vector<128x256xf32>
    %cst_4 = arith.constant dense<0.000000e+00> : vector<128xf32>
    %8 = vector.multi_reduction <add>, %7, %cst_4 [1] : vector<128x256xf32> to vector<128xf32>
    %9 = vector.shape_cast %8 : vector<128xf32> to vector<128x1xf32>
    %cst_5 = arith.constant 1.000000e+00 : f32
    %10 = vector.broadcast %cst_5 : f32 to vector<128x1xf32>
    %11 = arith.divf %10, %9 : vector<128x1xf32>
    %12 = vector.broadcast %11 : vector<128x1xf32> to vector<128x256xf32>
    %13 = arith.mulf %7, %12 : vector<128x256xf32>
    %14 = arith.truncf %13 : vector<128x256xf32> to vector<128x256xbf16>
    %c0_6 = arith.constant 0 : index
    %c0_7 = arith.constant 0 : index
    %15 = vector.load %arg6[%c0_6, %c0_7] : memref<128x256xbf16, #tpu.memory_space<vmem>>, vector<128x256xbf16>
    tpu.vector_store %arg6[%c0_6, %c0_7], %14 {strides = array<i32>} : memref<128x256xbf16, #tpu.memory_space<vmem>>, vector<128x256xbf16>,
    %c0_8 = arith.constant 0 : index
    %c0_9 = arith.constant 0 : index
    %16 = vector.load %arg5[%c0_8, %c0_9] : memref<128x1xf32, #tpu.memory_space<vmem>>, vector<128x1xf32>
    %17 = math.exp %16 : vector<128x1xf32>
    %18 = vector.broadcast %17 : vector<128x1xf32> to vector<128x256xf32>
    %19 = arith.mulf %18, %13 : vector<128x256xf32>
    %20 = arith.truncf %19 : vector<128x256xf32> to vector<128x256xbf16>
    %c0_10 = arith.constant 0 : index
    %c0_11 = arith.constant 0 : index
    %21 = vector.load %arg9[%c0_10, %c0_11] : memref<128x256xbf16, #tpu.memory_space<vmem>>, vector<128x256xbf16>
    tpu.vector_store %arg9[%c0_10, %c0_11], %20 {strides = array<i32>} : memref<128x256xbf16, #tpu.memory_space<vmem>>, vector<128x256xbf16>,
    %c0_12 = arith.constant 0 : index
    %c0_13 = arith.constant 0 : index
    %22 = vector.load %arg3[%c0_12, %c0_13] : memref<32x256xf32, #tpu.memory_space<vmem>>, vector<32x256xf32>
    %cst_14 = arith.constant dense<0.000000e+00> : vector<128x256xf32>
    %23 = tpu.matmul %0, %22, %cst_14 {dimension_numbers = #tpu.dot_dimension_numbers<[1], [0], [0], [1], [0, 0, 1, 1], [], []>} : vector<128x32xf32>, vector<32x256xf32>, vector<128x256xf32> -> vector<128x256xf32>
    %cst_15 = arith.constant dense<0xFF800000> : vector<128xf32>
    %24 = vector.multi_reduction <maximumf>, %23, %cst_15 [1] : vector<128x256xf32> to vector<128xf32>
    %25 = vector.shape_cast %24 : vector<128xf32> to vector<128x1xf32>
    %26 = vector.broadcast %25 : vector<128x1xf32> to vector<128x256xf32>
    %27 = arith.subf %23, %26 : vector<128x256xf32>
    %28 = math.exp %27 : vector<128x256xf32>
    %cst_16 = arith.constant dense<0.000000e+00> : vector<128xf32>
    %29 = vector.multi_reduction <add>, %28, %cst_16 [1] : vector<128x256xf32> to vector<128xf32>
    %30 = vector.shape_cast %29 : vector<128xf32> to vector<128x1xf32>
    %cst_17 = arith.constant 1.000000e+00 : f32
    %31 = vector.broadcast %cst_17 : f32 to vector<128x1xf32>
    %32 = arith.divf %31, %30 : vector<128x1xf32>
    %33 = vector.broadcast %32 : vector<128x1xf32> to vector<128x256xf32>
    %34 = arith.mulf %28, %33 : vector<128x256xf32>
    %35 = math.exp %34 : vector<128x256xf32>
    %36 = arith.truncf %35 : vector<128x256xf32> to vector<128x256xbf16>
    %c0_18 = arith.constant 0 : index
    %c0_19 = arith.constant 0 : index
    %37 = vector.load %arg7[%c0_18, %c0_19] : memref<128x256xbf16, #tpu.memory_space<vmem>>, vector<128x256xbf16>
    tpu.vector_store %arg7[%c0_18, %c0_19], %36 {strides = array<i32>} : memref<128x256xbf16, #tpu.memory_space<vmem>>, vector<128x256xbf16>,
    %c0_20 = arith.constant 0 : index
    %c0_21 = arith.constant 0 : index
    %38 = vector.load %arg4[%c0_20, %c0_21] : memref<32x256xf32, #tpu.memory_space<vmem>>, vector<32x256xf32>
    %cst_22 = arith.constant dense<0.000000e+00> : vector<128x256xf32>
    %39 = tpu.matmul %0, %38, %cst_22 {dimension_numbers = #tpu.dot_dimension_numbers<[1], [0], [0], [1], [0, 0, 1, 1], [], []>} : vector<128x32xf32>, vector<32x256xf32>, vector<128x256xf32> -> vector<128x256xf32>
    %40 = arith.truncf %39 : vector<128x256xf32> to vector<128x256xbf16>
    %c0_23 = arith.constant 0 : index
    %c0_24 = arith.constant 0 : index
    %41 = vector.load %arg8[%c0_23, %c0_24] : memref<128x256xbf16, #tpu.memory_space<vmem>>, vector<128x256xbf16>
    tpu.vector_store %arg8[%c0_23, %c0_24], %40 {strides = array<i32>} : memref<128x256xbf16, #tpu.memory_space<vmem>>, vector<128x256xbf16>,
    return
  }
  func.func @transform_0(%arg0: i32) -> (i32, i32) {
    %c0_i32 = arith.constant 0 : i32
    %c0_i32_0 = arith.constant 0 : i32
    return %arg0, %c0_i32 : i32, i32
  }
  func.func @transform_1(%arg0: i32) -> (i32, i32) {
    %c0_i32 = arith.constant 0 : i32
    %c0_i32_0 = arith.constant 0 : i32
    %c0_i32_1 = arith.constant 0 : i32
    return %c0_i32, %c0_i32_0 : i32, i32
  }
  func.func @transform_2(%arg0: i32) -> (i32, i32) {
    %c0_i32 = arith.constant 0 : i32
    %c0_i32_0 = arith.constant 0 : i32
    %c0_i32_1 = arith.constant 0 : i32
    return %c0_i32, %c0_i32_0 : i32, i32
  }
  func.func @transform_3(%arg0: i32) -> (i32, i32) {
    %c0_i32 = arith.constant 0 : i32
    %c0_i32_0 = arith.constant 0 : i32
    %c0_i32_1 = arith.constant 0 : i32
    return %c0_i32, %c0_i32_0 : i32, i32
  }
  func.func @transform_4(%arg0: i32) -> (i32, i32) {
    %c0_i32 = arith.constant 0 : i32
    %c0_i32_0 = arith.constant 0 : i32
    return %arg0, %c0_i32 : i32, i32
  }
  func.func @transform_5(%arg0: i32) -> (i32, i32) {
    %c0_i32 = arith.constant 0 : i32
    %c0_i32_0 = arith.constant 0 : i32
    return %arg0, %c0_i32 : i32, i32
  }
  func.func @transform_6(%arg0: i32) -> (i32, i32) {
    %c0_i32 = arith.constant 0 : i32
    %c0_i32_0 = arith.constant 0 : i32
    return %arg0, %c0_i32 : i32, i32
  }
  func.func @transform_7(%arg0: i32) -> (i32, i32) {
    %c0_i32 = arith.constant 0 : i32
    %c0_i32_0 = arith.constant 0 : i32
    return %arg0, %c0_i32 : i32, i32
  }
  func.func @transform_8(%arg0: i32) -> (i32, i32) {
    %c0_i32 = arith.constant 0 : i32
    %c0_i32_0 = arith.constant 0 : i32
    return %arg0, %c0_i32 : i32, i32
  }
}

module attributes {stable_mosaic.version = 11 : i64} {
  func.func @_zinb_fused_kernel(%arg0: i32, %arg1: memref<128x32xf32, #tpu.memory_space<vmem>>, %arg2: memref<32x256xf32, #tpu.memory_space<vmem>>, %arg3: memref<32x256xf32, #tpu.memory_space<vmem>>, %arg4: memref<32x256xf32, #tpu.memory_space<vmem>>, %arg5: memref<128x1xf32, #tpu.memory_space<vmem>>, %arg6: memref<128x256xbf16, #tpu.memory_space<vmem>>, %arg7: memref<128x256xbf16, #tpu.memory_space<vmem>>, %arg8: memref<128x256xbf16, #tpu.memory_space<vmem>>, %arg9: memref<128x256xbf16, #tpu.memory_space<vmem>>) attributes {dimension_semantics = [#tpu.dimension_semantics<parallel>], iteration_bounds = array<i64: 2>, scalar_prefetch = 0 : i64, scratch_operands = 0 : i64, tpu.core_type = #tpu.core_type<tc>, window_params = [{transform_indices = @transform_0, window_bounds = array<i64: 128, 32>}, {pipeline_mode = #tpu.pipeline_mode<synchronous>, transform_indices = @transform_1, window_bounds = array<i64: 32, 256>}, {pipeline_mode = #tpu.pipeline_mode<synchronous>, transform_indices = @transform_2, window_bounds = array<i64: 32, 256>}, {pipeline_mode = #tpu.pipeline_mode<synchronous>, transform_indices = @transform_3, window_bounds = array<i64: 32, 256>}, {transform_indices = @transform_4, window_bounds = array<i64: 128, 1>}, {transform_indices = @transform_5, window_bounds = array<i64: 128, 256>}, {transform_indices = @transform_6, window_bounds = array<i64: 128, 256>}, {transform_indices = @transform_7, window_bounds = array<i64: 128, 256>}, {transform_indices = @transform_8, window_bounds = array<i64: 128, 256>}]} {
    %c0 = arith.constant 0 : index
    %c0_0 = arith.constant 0 : index
    %0 = vector.load %arg1[%c0, %c0_0] : memref<128x32xf32, #tpu.memory_space<vmem>>, vector<128x32xf32>
    %c0_1 = arith.constant 0 : index
    %c0_2 = arith.constant 0 : index
    %1 = vector.load %arg2[%c0_1, %c0_2] : memref<32x256xf32, #tpu.memory_space<vmem>>, vector<32x256xf32>
    %cst = arith.constant dense<0.000000e+00> : vector<128x256xf32>
    %2 = tpu.matmul %0, %1, %cst {dimension_numbers = #tpu.dot_dimension_numbers<[1], [0], [0], [1], [0, 0, 1, 1], [], []>} : vector<128x32xf32>, vector<32x256xf32>, vector<128x256xf32> -> vector<128x256xf32>
    %cst_3 = arith.constant dense<0xFF800000> : vector<128xf32>
    %3 = vector.multi_reduction <maximumf>, %2, %cst_3 [1] : vector<128x256xf32> to vector<128xf32>
    %4 = vector.shape_cast %3 : vector<128xf32> to vector<128x1xf32>
    %5 = vector.broadcast %4 : vector<128x1xf32> to vector<128x256xf32>
    %6 = arith.subf %2, %5 : vector<128x256xf32>
    %7 = math.exp %6 : vector<128x256xf32>
    %cst_4 = arith.constant dense<0.000000e+00> : vector<128xf32>
    %8 = vector.multi_reduction <add>, %7, %cst_4 [1] : vector<128x256xf32> to vector<128xf32>
    %9 = vector.shape_cast %8 : vector<128xf32> to vector<128x1xf32>
    %cst_5 = arith.constant 1.000000e+00 : f32
    %10 = vector.broadcast %cst_5 : f32 to vector<128x1xf32>
    %11 = arith.divf %10, %9 : vector<128x1xf32>
    %12 = vector.broadcast %11 : vector<128x1xf32> to vector<128x256xf32>
    %13 = arith.mulf %7, %12 : vector<128x256xf32>
    %14 = arith.truncf %13 : vector<128x256xf32> to vector<128x256xbf16>
    %c0_6 = arith.constant 0 : index
    %c0_7 = arith.constant 0 : index
    %15 = vector.load %arg6[%c0_6, %c0_7] : memref<128x256xbf16, #tpu.memory_space<vmem>>, vector<128x256xbf16>
    tpu.vector_store %arg6[%c0_6, %c0_7], %14 {strides = array<i32>} : memref<128x256xbf16, #tpu.memory_space<vmem>>, vector<128x256xbf16>,
    %c0_8 = arith.constant 0 : index
    %c0_9 = arith.constant 0 : index
    %16 = vector.load %arg5[%c0_8, %c0_9] : memref<128x1xf32, #tpu.memory_space<vmem>>, vector<128x1xf32>
    %17 = math.exp %16 : vector<128x1xf32>
    %18 = vector.broadcast %17 : vector<128x1xf32> to vector<128x256xf32>
    %19 = arith.mulf %18, %13 : vector<128x256xf32>
    %20 = arith.truncf %19 : vector<128x256xf32> to vector<128x256xbf16>
    %c0_10 = arith.constant 0 : index
    %c0_11 = arith.constant 0 : index
    %21 = vector.load %arg9[%c0_10, %c0_11] : memref<128x256xbf16, #tpu.memory_space<vmem>>, vector<128x256xbf16>
    tpu.vector_store %arg9[%c0_10, %c0_11], %20 {strides = array<i32>} : memref<128x256xbf16, #tpu.memory_space<vmem>>, vector<128x256xbf16>,
    %c0_12 = arith.constant 0 : index
    %c0_13 = arith.constant 0 : index
    %22 = vector.load %arg3[%c0_12, %c0_13] : memref<32x256xf32, #tpu.memory_space<vmem>>, vector<32x256xf32>
    %cst_14 = arith.constant dense<0.000000e+00> : vector<128x256xf32>
    %23 = tpu.matmul %0, %22, %cst_14 {dimension_numbers = #tpu.dot_dimension_numbers<[1], [0], [0], [1], [0, 0, 1, 1], [], []>} : vector<128x32xf32>, vector<32x256xf32>, vector<128x256xf32> -> vector<128x256xf32>
    %cst_15 = arith.constant dense<0xFF800000> : vector<128xf32>
    %24 = vector.multi_reduction <maximumf>, %23, %cst_15 [1] : vector<128x256xf32> to vector<128xf32>
    %25 = vector.shape_cast %24 : vector<128xf32> to vector<128x1xf32>
    %26 = vector.broadcast %25 : vector<128x1xf32> to vector<128x256xf32>
    %27 = arith.subf %23, %26 : vector<128x256xf32>
    %28 = math.exp %27 : vector<128x256xf32>
    %cst_16 = arith.constant dense<0.000000e+00> : vector<128xf32>
    %29 = vector.multi_reduction <add>, %28, %cst_16 [1] : vector<128x256xf32> to vector<128xf32>
    %30 = vector.shape_cast %29 : vector<128xf32> to vector<128x1xf32>
    %cst_17 = arith.constant 1.000000e+00 : f32
    %31 = vector.broadcast %cst_17 : f32 to vector<128x1xf32>
    %32 = arith.divf %31, %30 : vector<128x1xf32>
    %33 = vector.broadcast %32 : vector<128x1xf32> to vector<128x256xf32>
    %34 = arith.mulf %28, %33 : vector<128x256xf32>
    %35 = math.exp %34 : vector<128x256xf32>
    %36 = arith.truncf %35 : vector<128x256xf32> to vector<128x256xbf16>
    %c0_18 = arith.constant 0 : index
    %c0_19 = arith.constant 0 : index
    %37 = vector.load %arg7[%c0_18, %c0_19] : memref<128x256xbf16, #tpu.memory_space<vmem>>, vector<128x256xbf16>
    tpu.vector_store %arg7[%c0_18, %c0_19], %36 {strides = array<i32>} : memref<128x256xbf16, #tpu.memory_space<vmem>>, vector<128x256xbf16>,
    %c0_20 = arith.constant 0 : index
    %c0_21 = arith.constant 0 : index
    %38 = vector.load %arg4[%c0_20, %c0_21] : memref<32x256xf32, #tpu.memory_space<vmem>>, vector<32x256xf32>
    %cst_22 = arith.constant dense<0.000000e+00> : vector<128x256xf32>
    %39 = tpu.matmul %0, %38, %cst_22 {dimension_numbers = #tpu.dot_dimension_numbers<[1], [0], [0], [1], [0, 0, 1, 1], [], []>} : vector<128x32xf32>, vector<32x256xf32>, vector<128x256xf32> -> vector<128x256xf32>
    %40 = arith.truncf %39 : vector<128x256xf32> to vector<128x256xbf16>
    %c0_23 = arith.constant 0 : index
    %c0_24 = arith.constant 0 : index
    %41 = vector.load %arg8[%c0_23, %c0_24] : memref<128x256xbf16, #tpu.memory_space<vmem>>, vector<128x256xbf16>
    tpu.vector_store %arg8[%c0_23, %c0_24], %40 {strides = array<i32>} : memref<128x256xbf16, #tpu.memory_space<vmem>>, vector<128x256xbf16>,
    return
  }
  func.func @transform_0(%arg0: i32) -> (i32, i32) {
    %c0_i32 = arith.constant 0 : i32
    %c0_i32_0 = arith.constant 0 : i32
    return %arg0, %c0_i32 : i32, i32
  }
  func.func @transform_1(%arg0: i32) -> (i32, i32) {
    %c0_i32 = arith.constant 0 : i32
    %c0_i32_0 = arith.constant 0 : i32
    %c0_i32_1 = arith.constant 0 : i32
    return %c0_i32, %c0_i32_0 : i32, i32
  }
  func.func @transform_2(%arg0: i32) -> (i32, i32) {
    %c0_i32 = arith.constant 0 : i32
    %c0_i32_0 = arith.constant 0 : i32
    %c0_i32_1 = arith.constant 0 : i32
    return %c0_i32, %c0_i32_0 : i32, i32
  }
  func.func @transform_3(%arg0: i32) -> (i32, i32) {
    %c0_i32 = arith.constant 0 : i32
    %c0_i32_0 = arith.constant 0 : i32
    %c0_i32_1 = arith.constant 0 : i32
    return %c0_i32, %c0_i32_0 : i32, i32
  }
  func.func @transform_4(%arg0: i32) -> (i32, i32) {
    %c0_i32 = arith.constant 0 : i32
    %c0_i32_0 = arith.constant 0 : i32
    return %arg0, %c0_i32 : i32, i32
  }
  func.func @transform_5(%arg0: i32) -> (i32, i32) {
    %c0_i32 = arith.constant 0 : i32
    %c0_i32_0 = arith.constant 0 : i32
    return %arg0, %c0_i32 : i32, i32
  }
  func.func @transform_6(%arg0: i32) -> (i32, i32) {
    %c0_i32 = arith.constant 0 : i32
    %c0_i32_0 = arith.constant 0 : i32
    return %arg0, %c0_i32 : i32, i32
  }
  func.func @transform_7(%arg0: i32) -> (i32, i32) {
    %c0_i32 = arith.constant 0 : i32
    %c0_i32_0 = arith.constant 0 : i32
    return %arg0, %c0_i32 : i32, i32
  }
  func.func @transform_8(%arg0: i32) -> (i32, i32) {
    %c0_i32 = arith.constant 0 : i32
    %c0_i32_0 = arith.constant 0 : i32
    return %arg0, %c0_i32 : i32, i32
  }
}

</mosaic_0001>

<bundles_post_ra>
// kernel: _zinb_fused.1
= control target key start
LH: loop header
LB: loop body
LE: loop exit
PB: predicated region body
PF: predicated region fallthrough
CT: control target
= control target key end

     0   :  { %s4339_s0 = inlined_call_operand.vmem [shape: f32[256,32], index: 0, kind: input, shape index: {}]   ;;  %s4340_s1 = inlined_call_operand.vmem [shape: f32[32,256], index: 1, kind: input, shape index: {}]   ;;  %s4341_s2 = inlined_call_operand.vmem [shape: f32[32,256], index: 2, kind: input, shape index: {}]   ;;  %s4342_s3 = inlined_call_operand.vmem [shape: f32[32,256], index: 3, kind: input, shape index: {}]   ;;  %s4343_s4 = inlined_call_operand.vmem [shape: f32[256,1], index: 4, kind: input, shape index: {}]   ;;  %s4344_s5 = inlined_call_operand.hbm [shape: bf16[256,256], index: 5, kind: output, shape index: {0}]   ;;  %s4345_s6 = inlined_call_operand.hbm [shape: bf16[256,256], index: 6, kind: output, shape index: {1}]   ;;  %s4346_s7 = inlined_call_operand.hbm [shape: bf16[256,256], index: 7, kind: output, shape index: {2}]   ;;  %s4347_s8 = inlined_call_operand.hbm [shape: bf16[256,256], index: 8, kind: output, shape index: {3}]  }
   0x1   :  { %4393 = sst [smem:[#allocation39_spill]] %s4339_s0 }
   0x2   :  { %4394 = sst [smem:[#allocation40_spill]] %s4340_s1 }
   0x3   :  { %14 = vsyncpa [#allocation3], 0 }
   0x4   :  { %16 = vsyncpa [#allocation3 + $0x1], 0 }
   0x5   :  { %17 = vsyncpa [#allocation5], 0 }
   0x6   :  { %19 = vsyncpa [#allocation5 + $0x1], 0 }
   0x7   :  { %20 = vsyncpa [#allocation8], 0 }
   0x8   :  { %22 = vsyncpa [#allocation8 + $0x1], 0  ;;  %s3163_s27 = smov 0   ;;  %s3165_s28 = smov 0  }
   0x9   :  { %s3167_s29 = smov 0   ;;  %s3169_s30 = smov 0  }
   0xa LB: > { %s3184_s9 = sadd.s32 4294967295, %s3108_s30   ;;  %s4390_s10 = sadd.s32 4294967294, %s3108_s30   ;;  %s3108_s30 = sphi %s3169_s30, %s4490_s30   ;;  %s3104_s29 = sphi %s3167_s29, %s4489_s29   ;;  %s3100_s28 = sphi %s3165_s28, %s4488_s28   ;;  %s3096_s27 = sphi %s3163_s27, %s4487_s27  }
   0xb   : > { %s3188_s11 = sadd.s32 1, %s3108_s30   ;;  %s150_s12 = sadd.s32 1, %s3104_s29 }
   0xc   : > { %s147_s13 = ssub.s32 %s3108_s30, %s3188_s11  ;;  %p160_p0 = scmp.ne.s32.totalorder %s3104_s29, %s3100_s28 }
   0xd   : > { %p148_p1 = scmp.eq.s32.totalorder %s147_s13, 0  ;;  %p161_p2 = scmp.eq.s32.totalorder %s3184_s9, 1 }
   0xe   : > { %p166_p3 = scmp.ne.s32.totalorder %s3100_s28, %s3096_s27  ;;  %p167_p4 = scmp.eq.s32.totalorder %s4390_s10, 1 }
   0xf   : > { %s3201_s14 = scalar_select %p148_p1, %s3104_s29, %s150_s12  }
  0x10   : > { %p3203_p5 = por %p161_p2, %p160_p0  ;;  %p3207_p6 = por %p167_p4, %p166_p3 }
  0x11   : > { %p2367_p7 = scmp.ge.s32.totalorder %s3108_s30, 1  ;;  %p290_p8 = scmp.lt.s32.totalorder %s3108_s30, 3 }
  0x13   : > { %p291_p9 = pnand %p2367_p7, %p290_p8 }
  0x15   : > { %294 = sbr.rel (%p291_p9) target bundleno = 742 (0x2e6), region = 40 }
  0x1c   : > { %s4397_s1 = sld [smem:[#allocation40_spill]]  ;;  %s2372_s23 = sshll.u32 %s3184_s9, 4  ;;  %v3110_v7 = vmov 0.0   ;;  %v1235_v12 = vld [vmem:[%s4341_s2 + $0x8] sm:$0xff]  ;;  %v3111_v13 = vmov 0   ;;  %v1237_v14 = vld [vmem:[%s4341_s2 + $0x18] sm:$0xff] }
  0x1d   : > { %497 = vmatprep.mubr.f32.mxu0 %v3110_v7  ;;  %545 = vmatprep.mubr.f32.mxu1 %v3110_v7  ;;  %p345_p10 = scmp.lt.s32.totalorder %s2372_s23, 31  ;;  %v2586_v16 = vpack.c.bf16 %v1237_v14, %v1235_v12  ;;  %v1234_v17 = vld [vmem:[%s4341_s2] sm:$0xff]  ;;  %v1236_v18 = vld [vmem:[%s4341_s2 + $0x10] sm:$0xff]  ;;  %s4398_s0 = sld [smem:[#allocation39_spill]]  ;;  %v1239_v19 = vld [vmem:[%s4341_s2 + $0x28] sm:$0xff]  ;;  %vm384_vm0 = vcmask 261120  }
  0x1e   : > { %2665 = vset.pattern.permute.xlu1 %v3111_v13  ;;  %2664 = vset.pattern.permute.xlu0 %v3111_v13  ;;  %v1241_v20 = vld [vmem:[%s4341_s2 + $0x38] sm:$0xff]  ;;  %v2588_v23 = vpack.c.bf16 %v1236_v18, %v1234_v17  ;;  %v1238_v25 = vld [vmem:[%s4341_s2 + $0x20] sm:$0xff]  ;;  %v1240_v26 = vld [vmem:[%s4341_s2 + $0x30] sm:$0xff]  ;;  %s3942_s13 = sand.u32 1, %s3100_s28   ;;  %s4107_s21 = sshll.u32 %s3184_s9, 11 }
  0x1f   : > { %s4492_s23 = smov (!%p345_p10, %s2372_s23), 31  ;;  %v2590_v24 = vpack.c.bf16 %v1241_v20, %v1239_v19  ;;  %v2592_v31 = vpack.c.bf16 %v1240_v26, %v1238_v25  ;;  %v1836_v12 = vld [vmem:[%s4342_s3 + $0x8] sm:$0xff]  ;;  %v1838_v13 = vld [vmem:[%s4342_s3 + $0x18] sm:$0xff]  ;;  %v1835_v14 = vld [vmem:[%s4342_s3] sm:$0xff]  ;;  %s3951_s17 = sshll.u32 %s3942_s13, 7 }
  0x20   : > { %s2373_s12 = sshll.u32 %s4492_s23, 3  ;;  %v1840_v17 = vld [vmem:[%s4342_s3 + $0x28] sm:$0xff]  ;;  %v1842_v18 = vld [vmem:[%s4342_s3 + $0x38] sm:$0xff]  ;;  %s3960_s19 = scalar_lea.vmem [#allocation6], %s3951_s17 }
  0x21   : > { %s3272_s18 = scalar_lea.vmem %s4343_s4, %s2373_s12  ;;  %v2598_v20 = vpack.c.bf16 %v1842_v18, %v1840_v17  ;;  %s4012_s20 = scalar_lea.vmem [#allocation7], %s3951_s17 }
  0x22   : > { %v377_v0 = vld [vmem:[%s4397_s1 + $0x8] sm:$0xff]  ;;  %v379_v1 = vld [vmem:[%s4397_s1 + $0x18] sm:$0xff]  ;;  %v376_v2 = vld [vmem:[%s4397_s1] sm:$0xff]  ;;  %s4125_s25 = scalar_lea.hbm %s4344_s5, %s4107_s21 }
  0x23   : > { %v2578_v3 = vpack.c.bf16 %v379_v1, %v377_v0  ;;  %v378_v4 = vld [vmem:[%s4397_s1 + $0x10] sm:$0xff]  ;;  %v381_v5 = vld [vmem:[%s4397_s1 + $0x28] sm:$0xff]  ;;  %v383_v6 = vld [vmem:[%s4397_s1 + $0x38] sm:$0xff]  ;;  %s3255_s22 = scalar_lea.vmem %s4398_s0, %s2373_s12  ;;  %s3112_s12 = smov [#allocation2]  }
  0x24   : > { %v2580_v8 = vpack.c.bf16 %v378_v4, %v376_v2  ;;  %v2582_v9 = vpack.c.bf16 %v383_v6, %v381_v5  ;;  %v380_v10 = vld [vmem:[%s4397_s1 + $0x20] sm:$0xff]  ;;  %v382_v11 = vld [vmem:[%s4397_s1 + $0x30] sm:$0xff]  ;;  %v3285_v27 = vld [vmem:[%s3255_s22 + $0x8] sm:$0xff] }
  0x25   : > { %2579 = vmatprep.subr.bf16.mxu0 %v2578_v3  ;;  %2602 = vmatprep.subr.bf16.mxu1 %v2578_v3  ;;  %v2584_v15 = vpack.c.bf16 %v382_v11, %v380_v10  ;;  %v3264_v21 = vld [vmem:[%s3255_s22] sm:$0xff]  ;;  %v3289_v28 = vld [vmem:[%s3255_s22 + $0x48] sm:$0xff]  ;;  %v965_v30 = vld [vmem:[%s3272_s18 + $0x18] sm:$0xff] }
  0x26   : > { %2581 = vmatpush1.bf16.msra.mxu0 %v2580_v8  ;;  %2604 = vmatpush1.bf16.msra.mxu1 %v2580_v8  ;;  %v3267_v22 = vld [vmem:[%s3255_s22 + $0x40] sm:$0xff]  ;;  %v963_v29 = vld [vmem:[%s3272_s18 + $0x8] sm:$0xff]  ;;  %v984_v33 = vmul.f32 1.442695, %v965_v30  ;;  %v964_v37 = vld [vmem:[%s3272_s18 + $0x10] sm:$0xff] }
  0x27   : > { %2583 = vmatprep.subr.bf16.mxu0 %v2582_v9  ;;  %2603 = vmatprep.subr.bf16.mxu1 %v2582_v9  ;;  %v980_v32 = vmul.f32 1.442695, %v963_v29  ;;  %v962_v34 = vld [vmem:[%s3272_s18] sm:$0xff]  ;;  %v3304_v38 = vld [vmem:[%s3255_s22 + $0x10] sm:$0xff]  ;;  %v982_v40 = vmul.f32 1.442695, %v964_v37 }
  0x28   : > { %v978_v35 = vmul.f32 1.442695, %v962_v34  ;;  %v966_v36 = vld [vmem:[%s3272_s18 + $0x20] sm:$0xff]  ;;  %v3307_v39 = vld [vmem:[%s3255_s22 + $0x50] sm:$0xff]  ;;  %v967_v42 = vld [vmem:[%s3272_s18 + $0x28] sm:$0xff] }
  0x29   : > { %2666 = vpow2.f32 %v980_v32  ;;  %v986_v41 = vmul.f32 1.442695, %v966_v36  ;;  %v968_v43 = vld [vmem:[%s3272_s18 + $0x30] sm:$0xff]  ;;  %v3318_v44 = vld [vmem:[%s3255_s22 + $0x18] sm:$0xff]  ;;  %v988_v46 = vmul.f32 1.442695, %v967_v42 }
  0x2a   : > { %2585 = vmatpush1.bf16.msra.mxu0 %v2584_v15  ;;  %2605 = vmatpush1.bf16.msra.mxu1 %v2584_v15  ;;  %2668 = vpow2.f32 %v984_v33  ;;  %v3321_v45 = vld [vmem:[%s3255_s22 + $0x58] sm:$0xff]  ;;  %v990_v47 = vmul.f32 1.442695, %v968_v43  ;;  %v970_v49 = vld [vmem:[%s3272_s18 + $0x40] sm:$0xff]  ;;  %v971_v55 = vld [vmem:[%s3272_s18 + $0x48] sm:$0xff]  ;;  %v2594_v15 = vpack.c.bf16 %v1838_v13, %v1836_v12 }
  0x2b   : > { %2587 = vmatprep.subr.bf16.mxu1 %v2586_v16  ;;  %2670 = vpow2.f32 %v978_v35  ;;  %v969_v48 = vld [vmem:[%s3272_s18 + $0x38] sm:$0xff]  ;;  %v3332_v50 = vld [vmem:[%s3255_s22 + $0x20] sm:$0xff]  ;;  %v994_v54 = vmul.f32 1.442695, %v970_v49  ;;  %v972_v57 = vld [vmem:[%s3272_s18 + $0x50] sm:$0xff] }
  0x2c   : > { %2672 = vpow2.f32 %v982_v40  ;;  %v3335_v51 = vld [vmem:[%s3255_s22 + $0x60] sm:$0xff]  ;;  %v992_v52 = vmul.f32 1.442695, %v969_v48  ;;  %v3346_v59 = vld [vmem:[%s3255_s22 + $0x28] sm:$0xff]  ;;  %v996_v61 = vmul.f32 1.442695, %v971_v55  ;;  %2595 = vmatprep.subr.bf16.mxu0 %v2594_v15 }
  0x2d   : > { %2376 = vmatmul.mubr.msk.f32.vlgmr.msra.gmra.mrb[0].mxu0 %vm384_vm0, %v3264_v21  ;;  %2384 = vmatmul.mubr.msk.f32.vlgmr.msra.gmra.mrb[0].mxu1 %vm384_vm0, %v3267_v22  ;;  %2674 = vpow2.f32 %v986_v41  ;;  %v3349_v60 = vld [vmem:[%s3255_s22 + $0x68] sm:$0xff]  ;;  %v998_v62 = vmul.f32 1.442695, %v972_v57  ;;  %v3358_v1 = vld [vmem:[%s3255_s22 + $0x30] sm:$0xff]  ;;  %v3370_v5 = vld [vmem:[%s3255_s22 + $0x38] sm:$0xff] }
  0x2e   : > { %2589 = vmatpush1.bf16.msra.mxu1 %v2588_v23  ;;  %503 = vmatprep.mubr.f32.mxu0 %v3110_v7  ;;  %2676 = vpow2.f32 %v988_v46  ;;  %v3361_v2 = vld [vmem:[%s3255_s22 + $0x70] sm:$0xff]  ;;  %v3373_v6 = vld [vmem:[%s3255_s22 + $0x78] sm:$0xff]  ;;  %v1839_v23 = vld [vmem:[%s4342_s3 + $0x20] sm:$0xff]  ;;  %s2958_s22 = sshll.u32 %s3112_s12, 4  ;;  %s2959_s22 = int_to_ptr.vmem [resolvable:$false] %s2958_s22 }
  0x2f   : > { %551 = vmatprep.mubr.f32.mxu1 %v3110_v7  ;;  %2591 = vmatprep.subr.bf16.mxu1 %v2590_v24  ;;  %2678 = vpow2.f32 %v990_v47  ;;  %v1837_v16 = vld [vmem:[%s4342_s3 + $0x10] sm:$0xff]  ;;  %s2960_s10 = scalar_lea.vmem %s2959_s22, 4096 }
  0x30   : > { %2680 = vpow2.f32 %v992_v52  ;;  %v2596_v19 = vpack.c.bf16 %v1837_v16, %v1835_v14  ;;  %v1841_v24 = vld [vmem:[%s4342_s3 + $0x30] sm:$0xff] }
  0x31   : > { %2377 = vmatmul.mubr.msk.f32.gmra.mrb[2].mxu0 %vm384_vm0, %v3285_v27  ;;  %2385 = vmatmul.mubr.msk.f32.gmra.mrb[2].mxu1 %vm384_vm0, %v3289_v28  ;;  %2682 = vpow2.f32 %v994_v54  ;;  %v2600_v25 = vpack.c.bf16 %v1841_v24, %v1839_v23 }
  0x32   : > { %509 = vmatprep.mubr.f32.mxu0 %v3110_v7  ;;  %557 = vmatprep.mubr.f32.mxu1 %v3110_v7  ;;  %2684 = vpow2.f32 %v996_v61 }
  0x33   : > { %2593 = vmatpush1.bf16.msra.mxu1 %v2592_v31  ;;  %v2667_v53 = vpop.eup %2666  ;;  %2686 = vpow2.f32 %v998_v62  ;;  %2597 = vmatpush1.bf16.msra.mxu0 %v2596_v19 }
  0x34   : > { %v2669_v56 = vpop.eup %2668  ;;  %1017 = vperm.xlu1 %2665, %v2667_v53   ;;  %2599 = vmatprep.subr.bf16.mxu0 %v2598_v20 }
  0x35   : > { %2378 = vmatmul.mubr.msk.f32.gmra.mrb[4].mxu0 %vm384_vm0, %v3304_v38  ;;  %2386 = vmatmul.mubr.msk.f32.gmra.mrb[4].mxu1 %vm384_vm0, %v3307_v39  ;;  %v2671_v58 = vpop.eup %2670 }
  0x36   : > { %515 = vmatprep.mubr.f32.mxu0 %v3110_v7  ;;  %563 = vmatprep.mubr.f32.mxu1 %v3110_v7  ;;  %v2673_v63 = vpop.eup %2672 }
  0x37   : > { %1012 = vperm.xlu0 %2664, %v2671_v58   ;;  %v2675_v0 = vpop.eup %2674  ;;  %2601 = vmatpush1.bf16.msra.mxu0 %v2600_v25 }
  0x38   : > { %1027 = vperm.xlu1 %2665, %v2669_v56   ;;  %v2677_v3 = vpop.eup %2676 }
  0x39   : > { %2379 = vmatmul.mubr.msk.f32.gmra.mrb[6].mxu0 %vm384_vm0, %v3318_v44  ;;  %2387 = vmatmul.mubr.msk.f32.gmra.mrb[6].mxu1 %vm384_vm0, %v3321_v45  ;;  %v2679_v4 = vpop.eup %2678 }
  0x3a   : > { %521 = vmatprep.mubr.f32.mxu0 %v3110_v7  ;;  %569 = vmatprep.mubr.f32.mxu1 %v3110_v7  ;;  %v2681_v8 = vpop.eup %2680 }
  0x3b   : > { %1022 = vperm.xlu0 %2664, %v2673_v63   ;;  %v2683_v9 = vpop.eup %2682 }
  0x3c   : > { %1032 = vperm.xlu1 %2665, %v2675_v0   ;;  %v2685_v10 = vpop.eup %2684 }
  0x3d   : > { %2380 = vmatmul.mubr.msk.f32.gmra.mrb[8].mxu0 %vm384_vm0, %v3332_v50  ;;  %2388 = vmatmul.mubr.msk.f32.gmra.mrb[8].mxu1 %vm384_vm0, %v3335_v51  ;;  %v2687_v11 = vpop.eup %2686 }
  0x3e   : > { %527 = vmatprep.mubr.f32.mxu0 %v3110_v7  ;;  %575 = vmatprep.mubr.f32.mxu1 %v3110_v7 }
  0x3f   : > { %1037 = vperm.xlu0 %2664, %v2677_v3  }
  0x40   : > { %1042 = vperm.xlu1 %2665, %v2679_v4  }
  0x41   : > { %2381 = vmatmul.mubr.msk.f32.gmra.mrb[10].mxu0 %vm384_vm0, %v3346_v59  ;;  %2389 = vmatmul.mubr.msk.f32.gmra.mrb[10].mxu1 %vm384_vm0, %v3349_v60 }
  0x42   : > { %533 = vmatprep.mubr.f32.mxu0 %v3110_v7  ;;  %581 = vmatprep.mubr.f32.mxu1 %v3110_v7 }
  0x43   : > { %1047 = vperm.xlu0 %2664, %v2681_v8  }
  0x44   : > { %1052 = vperm.xlu1 %2665, %v2683_v9  }
  0x45   : > { %2382 = vmatmul.mubr.msk.f32.gmra.mrb[12].mxu0 %vm384_vm0, %v3358_v1  ;;  %2390 = vmatmul.mubr.msk.f32.gmra.mrb[12].mxu1 %vm384_vm0, %v3361_v2 }
  0x46   : > { %539 = vmatprep.mubr.f32.mxu0 %v3110_v7  ;;  %587 = vmatprep.mubr.f32.mxu1 %v3110_v7 }
  0x47   : > { %1057 = vperm.xlu0 %2664, %v2685_v10  }
  0x48   : > { %1062 = vperm.xlu1 %2665, %v2687_v11  }
  0x49   : > { %2383 = vmatmul.mubr.msk.f32.gmra.mrb[14].mxu0 %vm384_vm0, %v3370_v5  ;;  %2391 = vmatmul.mubr.msk.f32.gmra.mrb[14].mxu1 %vm384_vm0, %v3373_v6 }
  0x4a   : > { %1306 = vmatprep.mubr.f32.mxu1 %v3110_v7  ;;  %1907 = vmatprep.mubr.f32.mxu0 %v3110_v7 }
  0x4d   : > { %2424 = vmatmul.mubr.msk.f32.vlgmr.msra.gmra.mrb[16].mxu1 %vm384_vm0, %v3264_v21  ;;  %2456 = vmatmul.mubr.msk.f32.vlgmr.msra.gmra.mrb[16].mxu0 %vm384_vm0, %v3264_v21 }
  0x4e   : > { %1312 = vmatprep.mubr.f32.mxu1 %v3110_v7  ;;  %1913 = vmatprep.mubr.f32.mxu0 %v3110_v7 }
  0x51   : > { %2425 = vmatmul.mubr.msk.f32.gmra.mrb[18].mxu1 %vm384_vm0, %v3285_v27  ;;  %2457 = vmatmul.mubr.msk.f32.gmra.mrb[18].mxu0 %vm384_vm0, %v3285_v27 }
  0x52   : > { %1318 = vmatprep.mubr.f32.mxu1 %v3110_v7  ;;  %1919 = vmatprep.mubr.f32.mxu0 %v3110_v7 }
  0x55   : > { %2426 = vmatmul.mubr.msk.f32.gmra.mrb[20].mxu1 %vm384_vm0, %v3304_v38  ;;  %2458 = vmatmul.mubr.msk.f32.gmra.mrb[20].mxu0 %vm384_vm0, %v3304_v38 }
  0x56   : > { %1324 = vmatprep.mubr.f32.mxu1 %v3110_v7  ;;  %1925 = vmatprep.mubr.f32.mxu0 %v3110_v7 }
  0x59   : > { %2427 = vmatmul.mubr.msk.f32.gmra.mrb[22].mxu1 %vm384_vm0, %v3318_v44  ;;  %2459 = vmatmul.mubr.msk.f32.gmra.mrb[22].mxu0 %vm384_vm0, %v3318_v44 }
  0x5a   : > { %1330 = vmatprep.mubr.f32.mxu1 %v3110_v7  ;;  %1931 = vmatprep.mubr.f32.mxu0 %v3110_v7 }
  0x5d   : > { %2428 = vmatmul.mubr.msk.f32.gmra.mrb[24].mxu1 %vm384_vm0, %v3332_v50  ;;  %2460 = vmatmul.mubr.msk.f32.gmra.mrb[24].mxu0 %vm384_vm0, %v3332_v50 }
  0x5e   : > { %1336 = vmatprep.mubr.f32.mxu1 %v3110_v7  ;;  %1937 = vmatprep.mubr.f32.mxu0 %v3110_v7 }
  0x61   : > { %2429 = vmatmul.mubr.msk.f32.gmra.mrb[26].mxu1 %vm384_vm0, %v3346_v59  ;;  %2461 = vmatmul.mubr.msk.f32.gmra.mrb[26].mxu0 %vm384_vm0, %v3346_v59 }
  0x62   : > { %1342 = vmatprep.mubr.f32.mxu1 %v3110_v7  ;;  %1943 = vmatprep.mubr.f32.mxu0 %v3110_v7 }
  0x65   : > { %2430 = vmatmul.mubr.msk.f32.gmra.mrb[28].mxu1 %vm384_vm0, %v3358_v1  ;;  %2462 = vmatmul.mubr.msk.f32.gmra.mrb[28].mxu0 %vm384_vm0, %v3358_v1 }
  0x66   : > { %1348 = vmatprep.mubr.f32.mxu1 %v3110_v7  ;;  %1949 = vmatprep.mubr.f32.mxu0 %v3110_v7 }
  0x69   : > { %2431 = vmatmul.mubr.msk.f32.gmra.mrb[30].mxu1 %vm384_vm0, %v3370_v5  ;;  %2463 = vmatmul.mubr.msk.f32.gmra.mrb[30].mxu0 %vm384_vm0, %v3370_v5 }
  0x6a   : > { %1354 = vmatprep.mubr.f32.mxu1 %v3110_v7  ;;  %1955 = vmatprep.mubr.f32.mxu0 %v3110_v7 }
  0x6d   : > { %2432 = vmatmul.mubr.msk.f32.gmra.mrb[32].mxu1 %vm384_vm0, %v3267_v22  ;;  %2464 = vmatmul.mubr.msk.f32.gmra.mrb[32].mxu0 %vm384_vm0, %v3267_v22 }
  0x6e   : > { %1360 = vmatprep.mubr.f32.mxu1 %v3110_v7  ;;  %1961 = vmatprep.mubr.f32.mxu0 %v3110_v7 }
  0x71   : > { %2433 = vmatmul.mubr.msk.f32.gmra.mrb[34].mxu1 %vm384_vm0, %v3289_v28  ;;  %2465 = vmatmul.mubr.msk.f32.gmra.mrb[34].mxu0 %vm384_vm0, %v3289_v28 }
  0x72   : > { %1366 = vmatprep.mubr.f32.mxu1 %v3110_v7  ;;  %1967 = vmatprep.mubr.f32.mxu0 %v3110_v7 }
  0x75   : > { %2434 = vmatmul.mubr.msk.f32.gmra.mrb[36].mxu1 %vm384_vm0, %v3307_v39  ;;  %2466 = vmatmul.mubr.msk.f32.gmra.mrb[36].mxu0 %vm384_vm0, %v3307_v39 }
  0x76   : > { %1372 = vmatprep.mubr.f32.mxu1 %v3110_v7  ;;  %1973 = vmatprep.mubr.f32.mxu0 %v3110_v7 }
  0x79   : > { %2435 = vmatmul.mubr.msk.f32.gmra.mrb[38].mxu1 %vm384_vm0, %v3321_v45  ;;  %2467 = vmatmul.mubr.msk.f32.gmra.mrb[38].mxu0 %vm384_vm0, %v3321_v45 }
  0x7a   : > { %1378 = vmatprep.mubr.f32.mxu1 %v3110_v7  ;;  %1979 = vmatprep.mubr.f32.mxu0 %v3110_v7 }
  0x7d   : > { %2436 = vmatmul.mubr.msk.f32.gmra.mrb[40].mxu1 %vm384_vm0, %v3335_v51  ;;  %2468 = vmatmul.mubr.msk.f32.gmra.mrb[40].mxu0 %vm384_vm0, %v3335_v51 }
  0x7e   : > { %1384 = vmatprep.mubr.f32.mxu1 %v3110_v7  ;;  %1985 = vmatprep.mubr.f32.mxu0 %v3110_v7 }
  0x81   : > { %2437 = vmatmul.mubr.msk.f32.gmra.mrb[42].mxu1 %vm384_vm0, %v3349_v60  ;;  %2469 = vmatmul.mubr.msk.f32.gmra.mrb[42].mxu0 %vm384_vm0, %v3349_v60 }
  0x82   : > { %1390 = vmatprep.mubr.f32.mxu1 %v3110_v7  ;;  %1991 = vmatprep.mubr.f32.mxu0 %v3110_v7 }
  0x85   : > { %2438 = vmatmul.mubr.msk.f32.gmra.mrb[44].mxu1 %vm384_vm0, %v3361_v2  ;;  %2470 = vmatmul.mubr.msk.f32.gmra.mrb[44].mxu0 %vm384_vm0, %v3361_v2 }
  0x86   : > { %1396 = vmatprep.mubr.f32.mxu1 %v3110_v7  ;;  %1997 = vmatprep.mubr.f32.mxu0 %v3110_v7 }
  0x89   : > { %2439 = vmatmul.mubr.msk.f32.gmra.mrb[46].mxu1 %vm384_vm0, %v3373_v6  ;;  %2471 = vmatmul.mubr.msk.f32.gmra.mrb[46].mxu0 %vm384_vm0, %v3373_v6 }
 0x100   : > { %v3452_v26 = vpop.f32.mrb[0].mxu0  ;;  %v3454_v29 = vpop.f32.mrb[0].mxu1 }
 0x101   : > { %v3456_v30 = vpop.f32.mrb[1].mxu0  ;;  %v3458_v31 = vpop.f32.mrb[1].mxu1 }
 0x102   : > { %v594_v32 = vmax.f32 %v3452_v26, %v3456_v30  ;;  %v618_v33 = vmax.f32 %v3454_v29, %v3458_v31 }
 0x104   : > { %v3467_v34 = vpop.f32.mrb[2].mxu1  ;;  %595 = vmax.xlane.f32.xlu0 %v594_v32  ;;  %v3469_v35 = vpop.f32.mrb[2].mxu0 }
 0x105   : > { %v3471_v36 = vpop.f32.mrb[3].mxu1  ;;  %v3473_v37 = vpop.f32.mrb[3].mxu0 }
 0x106   : > { %v621_v21 = vmax.f32 %v3467_v34, %v3471_v36  ;;  %v597_v40 = vmax.f32 %v3469_v35, %v3473_v37 }
 0x108   : > { %622 = vmax.xlane.f32.xlu1 %v621_v21  ;;  %v3482_v41 = vpop.f32.mrb[4].mxu1  ;;  %619 = vmax.xlane.f32.xlu0 %v618_v33  ;;  %v3484_v42 = vpop.f32.mrb[4].mxu0 }
 0x109   : > { %v3486_v43 = vpop.f32.mrb[5].mxu0  ;;  %v3488_v46 = vpop.f32.mrb[5].mxu1 }
 0x10a   : > { %v600_v27 = vmax.f32 %v3484_v42, %v3486_v43  ;;  %v624_v47 = vmax.f32 %v3482_v41, %v3488_v46 }
 0x10c   : > { %v3497_v48 = vpop.f32.mrb[6].mxu1  ;;  %598 = vmax.xlane.f32.xlu0 %v597_v40  ;;  %601 = vmax.xlane.f32.xlu1 %v600_v27  ;;  %v3499_v49 = vpop.f32.mrb[6].mxu0 }
 0x10d   : > { %v3501_v52 = vpop.f32.mrb[7].mxu0  ;;  %v3503_v53 = vpop.f32.mrb[7].mxu1 }
 0x10e   : > { %v603_v38 = vmax.f32 %v3499_v49, %v3501_v52  ;;  %v627_v54 = vmax.f32 %v3497_v48, %v3503_v53 }
 0x110   : > { %v3512_v55 = vpop.f32.mrb[8].mxu1  ;;  %625 = vmax.xlane.f32.xlu0 %v624_v47  ;;  %604 = vmax.xlane.f32.xlu1 %v603_v38  ;;  %v3514_v56 = vpop.f32.mrb[8].mxu0 }
 0x111   : > { %v3516_v57 = vpop.f32.mrb[9].mxu0  ;;  %v3518_v58 = vpop.f32.mrb[9].mxu1 }
 0x112   : > { %v606_v44 = vmax.f32 %v3514_v56, %v3516_v57  ;;  %v630_v61 = vmax.f32 %v3512_v55, %v3518_v58 }
 0x114   : > { %v3527_v62 = vpop.f32.mrb[10].mxu1  ;;  %628 = vmax.xlane.f32.xlu1 %v627_v54  ;;  %607 = vmax.xlane.f32.xlu0 %v606_v44  ;;  %v3529_v63 = vpop.f32.mrb[10].mxu0 }
 0x115   : > { %v3531_v0 = vpop.f32.mrb[11].mxu0  ;;  %v3533_v3 = vpop.f32.mrb[11].mxu1 }
 0x116   : > { %v609_v50 = vmax.f32 %v3529_v63, %v3531_v0  ;;  %v633_v4 = vmax.f32 %v3527_v62, %v3533_v3 }
 0x118   : > { %v3542_v8 = vpop.f32.mrb[12].mxu1  ;;  %631 = vmax.xlane.f32.xlu0 %v630_v61  ;;  %610 = vmax.xlane.f32.xlu1 %v609_v50  ;;  %v3544_v9 = vpop.f32.mrb[12].mxu0 }
 0x119   : > { %v3546_v10 = vpop.f32.mrb[13].mxu0  ;;  %v3548_v11 = vpop.f32.mrb[13].mxu1 }
 0x11a   : > { %v612_v59 = vmax.f32 %v3544_v9, %v3546_v10  ;;  %v636_v12 = vmax.f32 %v3542_v8, %v3548_v11 }
 0x11c   : > { %v3557_v13 = vpop.f32.mrb[14].mxu1  ;;  %634 = vmax.xlane.f32.xlu1 %v633_v4  ;;  %613 = vmax.xlane.f32.xlu0 %v612_v59  ;;  %v3559_v14 = vpop.f32.mrb[14].mxu0 }
 0x11d   : > { %v3561_v15 = vpop.f32.mrb[15].mxu0  ;;  %v3563_v16 = vpop.f32.mrb[15].mxu1 }
 0x11e   : > { %v615_v1 = vmax.f32 %v3559_v14, %v3561_v15  ;;  %v639_v17 = vmax.f32 %v3557_v13, %v3563_v16 }
 0x120   : > { %v3572_v18 = vpop.f32.mrb[16].mxu1  ;;  %637 = vmax.xlane.f32.xlu0 %v636_v12  ;;  %616 = vmax.xlane.f32.xlu1 %v615_v1 }
 0x121   : > { %v3574_v19 = vpop.f32.mrb[17].mxu1 }
 0x122   : > { %v1403_v5 = vmax.f32 %v3572_v18, %v3574_v19 }
 0x124   : > { %v3581_v20 = vpop.f32.mrb[18].mxu1  ;;  %640 = vmax.xlane.f32.xlu1 %v639_v17 }
 0x125   : > { %v3583_v23 = vpop.f32.mrb[19].mxu1 }
 0x126   : > { %v1406_v24 = vmax.f32 %v3581_v20, %v3583_v23 }
 0x128   : > { %v3590_v25 = vpop.f32.mrb[20].mxu1  ;;  %1407 = vmax.xlane.f32.xlu0 %v1406_v24  ;;  %1404 = vmax.xlane.f32.xlu1 %v1403_v5 }
 0x129   : > { %v3592_v22 = vpop.f32.mrb[21].mxu1 }
 0x12a   : > { %v1409_v32 = vmax.f32 %v3590_v25, %v3592_v22 }
 0x12c   : > { %v3599_v28 = vpop.f32.mrb[22].mxu1  ;;  %1410 = vmax.xlane.f32.xlu1 %v1409_v32 }
 0x12d   : > { %v3601_v33 = vpop.f32.mrb[23].mxu1 }
 0x12e   : > { %v1412_v21 = vmax.f32 %v3599_v28, %v3601_v33 }
 0x130   : > { %v3608_v40 = vpop.f32.mrb[24].mxu1  ;;  %1413 = vmax.xlane.f32.xlu0 %v1412_v21 }
 0x131   : > { %v3610_v39 = vpop.f32.mrb[25].mxu1 }
 0x132   : > { %v1415_v27 = vmax.f32 %v3608_v40, %v3610_v39 }
 0x134   : > { %v3617_v47 = vpop.f32.mrb[26].mxu1  ;;  %1416 = vmax.xlane.f32.xlu1 %v1415_v27 }
 0x135   : > { %v3619_v45 = vpop.f32.mrb[27].mxu1 }
 0x136   : > { %v1418_v38 = vmax.f32 %v3617_v47, %v3619_v45 }
 0x138   : > { %v3626_v54 = vpop.f32.mrb[28].mxu1  ;;  %1419 = vmax.xlane.f32.xlu0 %v1418_v38 }
 0x139   : > { %v3628_v51 = vpop.f32.mrb[29].mxu1 }
 0x13a   : > { %v1421_v44 = vmax.f32 %v3626_v54, %v3628_v51 }
 0x13c   : > { %v3635_v61 = vpop.f32.mrb[30].mxu1  ;;  %1422 = vmax.xlane.f32.xlu1 %v1421_v44 }
 0x13d   : > { %v3637_v60 = vpop.f32.mrb[31].mxu1 }
 0x13e   : > { %v1424_v50 = vmax.f32 %v3635_v61, %v3637_v60 }
 0x140   : > { %v3643_v4 = vpop.f32.mrb[32].mxu1  ;;  %1425 = vmax.xlane.f32.xlu0 %v1424_v50 }
 0x141   : > { %v3645_v2 = vpop.f32.mrb[33].mxu1 }
 0x142   : > { %4399 = vst [vmem:[#allocation12_spill] sm:$0xff] %v3645_v2  ;;  %v1427_v59 = vmax.f32 %v3643_v4, %v3645_v2 }
 0x144   : > { %v3649_v7 = vpop.f32.mrb[34].mxu1  ;;  %1428 = vmax.xlane.f32.xlu1 %v1427_v59 }
 0x145   : > { %4400 = vst [vmem:[#allocation13_spill] sm:$0xff] %v3649_v7  ;;  %v3651_v12 = vpop.f32.mrb[35].mxu1 }
 0x146   : > { %4401 = vst [vmem:[#allocation14_spill] sm:$0xff] %v3651_v12  ;;  %v1430_v1 = vmax.f32 %v3649_v7, %v3651_v12  ;;  %v3693_v12 = vpop.permute.xlu1 %1017 }
 0x147   : > { %4414 = vst [vmem:[#allocation27_spill] sm:$0xff] %v3693_v12 }
 0x148   : > { %v3655_v6 = vpop.f32.mrb[36].mxu1  ;;  %1431 = vmax.xlane.f32.xlu0 %v1430_v1 }
 0x149   : > { %4402 = vst [vmem:[#allocation15_spill] sm:$0xff] %v3655_v6  ;;  %v3657_v17 = vpop.f32.mrb[37].mxu1 }
 0x14a   : > { %4403 = vst [vmem:[#allocation16_spill] sm:$0xff] %v3657_v17  ;;  %v1433_v5 = vmax.f32 %v3655_v6, %v3657_v17 }
 0x14c   : > { %v3661_v24 = vpop.f32.mrb[38].mxu1  ;;  %1434 = vmax.xlane.f32.xlu1 %v1433_v5 }
 0x14d   : > { %4404 = vst [vmem:[#allocation17_spill] sm:$0xff] %v3661_v24  ;;  %v3663_v32 = vpop.f32.mrb[39].mxu1 }
 0x14e   : > { %4405 = vst [vmem:[#allocation18_spill] sm:$0xff] %v3663_v32  ;;  %v1436_v21 = vmax.f32 %v3661_v24, %v3663_v32 }
 0x150   : > { %v3667_v27 = vpop.f32.mrb[40].mxu1  ;;  %1437 = vmax.xlane.f32.xlu0 %v1436_v21  ;;  %v974_v21 = vld [vmem:[%s3272_s18 + $0x60] sm:$0xff] }
 0x151   : > { %4406 = vst [vmem:[#allocation19_spill] sm:$0xff] %v3667_v27  ;;  %v3669_v38 = vpop.f32.mrb[41].mxu1 }
 0x152   : > { %4407 = vst [vmem:[#allocation20_spill] sm:$0xff] %v3669_v38  ;;  %v1439_v44 = vmax.f32 %v3667_v27, %v3669_v38  ;;  %v1002_v38 = vmul.f32 1.442695, %v974_v21 }
 0x154   : > { %v3673_v50 = vpop.f32.mrb[42].mxu1  ;;  %1440 = vmax.xlane.f32.xlu1 %v1439_v44  ;;  %2688 = vpow2.f32 %v1002_v38 }
 0x155   : > { %4408 = vst [vmem:[#allocation21_spill] sm:$0xff] %v3673_v50  ;;  %v3675_v59 = vpop.f32.mrb[43].mxu1 }
 0x156   : > { %4409 = vst [vmem:[#allocation22_spill] sm:$0xff] %v3675_v59  ;;  %v1442_v1 = vmax.f32 %v3673_v50, %v3675_v59  ;;  %v973_v59 = vld [vmem:[%s3272_s18 + $0x58] sm:$0xff] }
 0x157   : > { %v1000_v50 = vmul.f32 1.442695, %v973_v59 }
 0x158   : > { %v3679_v5 = vpop.f32.mrb[44].mxu1  ;;  %1443 = vmax.xlane.f32.xlu0 %v1442_v1 }
 0x159   : > { %4410 = vst [vmem:[#allocation23_spill] sm:$0xff] %v3679_v5  ;;  %v3681_v32 = vpop.f32.mrb[45].mxu1  ;;  %2690 = vpow2.f32 %v1000_v50 }
 0x15a   : > { %4411 = vst [vmem:[#allocation24_spill] sm:$0xff] %v3681_v32  ;;  %v1445_v24 = vmax.f32 %v3679_v5, %v3681_v32  ;;  %v3695_v32 = vpop.permute.xlu0 %1012 }
 0x15b   : > { %4415 = vst [vmem:[#allocation28_spill] sm:$0xff] %v3695_v32 }
 0x15c   : > { %v3686_v17 = vpop.f32.mrb[46].mxu1  ;;  %1446 = vmax.xlane.f32.xlu1 %v1445_v24  ;;  %v3697_v24 = vpop.permute.xlu1 %1027 }
 0x15d   : > { %4412 = vst [vmem:[#allocation25_spill] sm:$0xff] %v3686_v17  ;;  %v3688_v27 = vpop.f32.mrb[47].mxu1  ;;  %4416 = vst [vmem:[#allocation29_spill] sm:$0xff] %v3697_v24 }
 0x15e   : > { %4413 = vst [vmem:[#allocation26_spill] sm:$0xff] %v3688_v27  ;;  %v1448_v44 = vmax.f32 %v3686_v17, %v3688_v27  ;;  %v2689_v1 = vpop.eup %2688  ;;  %v3699_v21 = vpop.permute.xlu0 %1022 }
 0x15f   : > { %4417 = vst [vmem:[#allocation30_spill] sm:$0xff] %v3699_v21 }
 0x160   : > { %1449 = vmax.xlane.f32.xlu0 %v1448_v44  ;;  %v3701_v5 = vpop.permute.xlu1 %1032 }
 0x161   : > { %4418 = vst [vmem:[#allocation31_spill] sm:$0xff] %v3701_v5 }
 0x162   : > { %v3703_v27 = vpop.permute.xlu0 %1037 }
 0x163   : > { %v2691_v6 = vpop.eup %2690  ;;  %4419 = vst [vmem:[#allocation32_spill] sm:$0xff] %v3703_v27 }
 0x164   : > { %v3705_v38 = vpop.permute.xlu1 %1042 }
 0x165   : > { %4420 = vst [vmem:[#allocation33_spill] sm:$0xff] %v3705_v38 }
 0x166   : > { %v3707_v59 = vpop.permute.xlu0 %1047 }
 0x167   : > { %4421 = vst [vmem:[#allocation34_spill] sm:$0xff] %v3707_v59 }
 0x168   : > { %v3709_v50 = vpop.permute.xlu1 %1052 }
 0x169   : > { %4422 = vst [vmem:[#allocation35_spill] sm:$0xff] %v3709_v50 }
 0x16a   : > { %v3711_v44 = vpop.permute.xlu0 %1057 }
 0x16b   : > { %4423 = vst [vmem:[#allocation36_spill] sm:$0xff] %v3711_v44 }
 0x16d   : > { %1072 = vperm.xlu1 %2665, %v2689_v1   ;;  %v3713_v1 = vpop.permute.xlu1 %1062 }
 0x16e   : > { %4424 = vst [vmem:[#allocation37_spill] sm:$0xff] %v3713_v1 }
 0x176   : > { %1067 = vperm.xlu0 %2664, %v2691_v6  }
 0x191   : > { %v596_v12 = vpop.xlane.xlu0 %595 }
 0x192   : > { %v642_v6 = vsub.f32 %v3452_v26, %v596_v12  ;;  %v643_v24 = vsub.f32 %v3456_v30, %v596_v12 }
 0x194   : > { %v674_v21 = vmul.f32 1.442695, %v642_v6  ;;  %v676_v32 = vmul.f32 1.442695, %v643_v24 }
 0x195   : > { %v623_v5 = vpop.xlane.xlu1 %622  ;;  %v620_v17 = vpop.xlane.xlu0 %619 }
 0x196   : > { %2692 = vpow2.f32 %v674_v21  ;;  %v660_v38 = vsub.f32 %v3467_v34, %v623_v5  ;;  %v661_v59 = vsub.f32 %v3471_v36, %v623_v5  ;;  %v658_v27 = vsub.f32 %v3454_v29, %v620_v17 }
 0x197   : > { %2694 = vpow2.f32 %v676_v32  ;;  %v659_v44 = vsub.f32 %v3458_v31, %v620_v17 }
 0x198   : > { %v710_v1 = vmul.f32 1.442695, %v660_v38  ;;  %v712_v50 = vmul.f32 1.442695, %v661_v59  ;;  %v706_v7 = vmul.f32 1.442695, %v658_v27 }
 0x199   : > { %v708_v26 = vmul.f32 1.442695, %v659_v44  ;;  %v599_v2 = vpop.xlane.xlu0 %598  ;;  %v602_v30 = vpop.xlane.xlu1 %601 }
 0x19a   : > { %2696 = vpow2.f32 %v710_v1  ;;  %v644_v12 = vsub.f32 %v3469_v35, %v599_v2  ;;  %v645_v24 = vsub.f32 %v3473_v37, %v599_v2  ;;  %v646_v34 = vsub.f32 %v3484_v42, %v602_v30 }
 0x19b   : > { %2698 = vpow2.f32 %v712_v50  ;;  %v647_v36 = vsub.f32 %v3486_v43, %v602_v30 }
 0x19c   : > { %2700 = vpow2.f32 %v706_v7  ;;  %v678_v29 = vmul.f32 1.442695, %v644_v12  ;;  %v680_v32 = vmul.f32 1.442695, %v645_v24  ;;  %v682_v31 = vmul.f32 1.442695, %v646_v34 }
 0x19d   : > { %2702 = vpow2.f32 %v708_v26  ;;  %v684_v17 = vmul.f32 1.442695, %v647_v36  ;;  %v626_v27 = vpop.xlane.xlu0 %625  ;;  %v605_v5 = vpop.xlane.xlu1 %604 }
 0x19e   : > { %2704 = vpow2.f32 %v678_v29  ;;  %v662_v21 = vsub.f32 %v3482_v41, %v626_v27  ;;  %v663_v35 = vsub.f32 %v3488_v46, %v626_v27  ;;  %v648_v37 = vsub.f32 %v3499_v49, %v605_v5 }
 0x19f   : > { %2706 = vpow2.f32 %v680_v32  ;;  %v649_v42 = vsub.f32 %v3501_v52, %v605_v5 }
 0x1a0   : > { %v3729_v2 = vpop.eup %2692  ;;  %2708 = vpow2.f32 %v682_v31  ;;  %v714_v43 = vmul.f32 1.442695, %v662_v21  ;;  %v716_v7 = vmul.f32 1.442695, %v663_v35  ;;  %v686_v38 = vmul.f32 1.442695, %v648_v37 }
 0x1a1   : > { %v3731_v59 = vpop.eup %2694  ;;  %2710 = vpow2.f32 %v684_v17  ;;  %v688_v50 = vmul.f32 1.442695, %v649_v42  ;;  %v629_v44 = vpop.xlane.xlu1 %628 }
 0x1a2   : > { %v608_v1 = vpop.xlane.xlu0 %607  ;;  %2712 = vpow2.f32 %v714_v43  ;;  %v664_v41 = vsub.f32 %v3497_v48, %v629_v44  ;;  %v665_v46 = vsub.f32 %v3503_v53, %v629_v44  ;;  %v738_v6 = vadd.f32 %v3731_v59, %v3729_v2 }
 0x1a3   : > { %v650_v49 = vsub.f32 %v3514_v56, %v608_v1  ;;  %2714 = vpow2.f32 %v716_v7  ;;  %v651_v52 = vsub.f32 %v3516_v57, %v608_v1 }
 0x1a4   : > { %v3739_v26 = vpop.eup %2696  ;;  %2716 = vpow2.f32 %v686_v38  ;;  %v718_v30 = vmul.f32 1.442695, %v664_v41  ;;  %v720_v12 = vmul.f32 1.442695, %v665_v46  ;;  %739 = vadd.xlane.f32.xlu0 %v738_v6 }
 0x1a5   : > { %v690_v24 = vmul.f32 1.442695, %v650_v49  ;;  %v3741_v34 = vpop.eup %2698  ;;  %2718 = vpow2.f32 %v688_v50  ;;  %v692_v48 = vmul.f32 1.442695, %v651_v52  ;;  %v611_v36 = vpop.xlane.xlu1 %610 }
 0x1a6   : > { %v632_v53 = vpop.xlane.xlu0 %631  ;;  %v3743_v56 = vpop.eup %2700  ;;  %2720 = vpow2.f32 %v718_v30  ;;  %v652_v32 = vsub.f32 %v3529_v63, %v611_v36  ;;  %v653_v17 = vsub.f32 %v3531_v0, %v611_v36 }
 0x1a7   : > { %v666_v57 = vsub.f32 %v3512_v55, %v632_v53  ;;  %v667_v29 = vsub.f32 %v3518_v58, %v632_v53  ;;  %v3748_v31 = vpop.eup %2702  ;;  %2722 = vpow2.f32 %v720_v12 }
 0x1a8   : > { %v3751_v27 = vpop.eup %2704  ;;  %2724 = vpow2.f32 %v690_v24  ;;  %v694_v35 = vmul.f32 1.442695, %v652_v32  ;;  %v696_v42 = vmul.f32 1.442695, %v653_v17  ;;  %v762_v55 = vadd.f32 %v3748_v31, %v3743_v56 }
 0x1a9   : > { %v722_v5 = vmul.f32 1.442695, %v666_v57  ;;  %v724_v21 = vmul.f32 1.442695, %v667_v29  ;;  %v3753_v37 = vpop.eup %2706  ;;  %2726 = vpow2.f32 %v692_v48  ;;  %v635_v58 = vpop.xlane.xlu1 %634  ;;  %v765_v29 = vadd.f32 %v3741_v34, %v3739_v26 }
 0x1aa   : > { %v614_v63 = vpop.xlane.xlu0 %613  ;;  %v3757_v43 = vpop.eup %2708  ;;  %v668_v0 = vsub.f32 %v3527_v62, %v635_v58  ;;  %v669_v7 = vsub.f32 %v3533_v3, %v635_v58  ;;  %763 = vadd.xlane.f32.xlu0 %v762_v55  ;;  %v741_v1 = vadd.f32 %v3753_v37, %v3751_v27 }
 0x1ab   : > { %2728 = vpow2.f32 %v722_v5  ;;  %v654_v38 = vsub.f32 %v3544_v9, %v614_v63  ;;  %v3762_v50 = vpop.eup %2710  ;;  %v655_v44 = vsub.f32 %v3546_v10, %v614_v63 }
 0x1ac   : > { %2730 = vpow2.f32 %v724_v21  ;;  %v3767_v41 = vpop.eup %2712  ;;  %v726_v46 = vmul.f32 1.442695, %v668_v0  ;;  %v728_v49 = vmul.f32 1.442695, %v669_v7  ;;  %v744_v9 = vadd.f32 %v3762_v50, %v3757_v43  ;;  %742 = vadd.xlane.f32.xlu1 %v741_v1 }
 0x1ad   : > { %2732 = vpow2.f32 %v694_v35  ;;  %v698_v52 = vmul.f32 1.442695, %v654_v38  ;;  %v3769_v62 = vpop.eup %2714  ;;  %v700_v3 = vmul.f32 1.442695, %v655_v44  ;;  %v617_v30 = vpop.xlane.xlu1 %616 }
 0x1ae   : > { %2734 = vpow2.f32 %v696_v42  ;;  %v638_v6 = vpop.xlane.xlu0 %637  ;;  %v3773_v10 = vpop.eup %2716  ;;  %v656_v48 = vsub.f32 %v3559_v14, %v617_v30  ;;  %745 = vadd.xlane.f32.xlu0 %v744_v9  ;;  %v657_v36 = vsub.f32 %v3561_v15, %v617_v30  ;;  %v768_v57 = vadd.f32 %v3769_v62, %v3767_v41 }
 0x1af   : > { %2736 = vpow2.f32 %v726_v46  ;;  %v670_v12 = vsub.f32 %v3542_v8, %v638_v6  ;;  %v671_v24 = vsub.f32 %v3548_v11, %v638_v6  ;;  %v3778_v53 = vpop.eup %2718 }
 0x1b0   : > { %2738 = vpow2.f32 %v728_v49  ;;  %v3785_v32 = vpop.eup %2720  ;;  %v702_v14 = vmul.f32 1.442695, %v656_v48  ;;  %766 = vadd.xlane.f32.xlu1 %v765_v29  ;;  %v704_v15 = vmul.f32 1.442695, %v657_v36  ;;  %v747_v58 = vadd.f32 %v3778_v53, %v3773_v10 }
 0x1b1   : > { %2740 = vpow2.f32 %v698_v52  ;;  %v730_v8 = vmul.f32 1.442695, %v670_v12  ;;  %v732_v17 = vmul.f32 1.442695, %v671_v24  ;;  %v3787_v11 = vpop.eup %2722  ;;  %v641_v5 = vpop.xlane.xlu1 %640 }
 0x1b2   : > { %2742 = vpow2.f32 %v700_v3  ;;  %v3789_v21 = vpop.eup %2724  ;;  %v672_v35 = vsub.f32 %v3557_v13, %v641_v5  ;;  %v673_v42 = vsub.f32 %v3563_v16, %v641_v5  ;;  %769 = vadd.xlane.f32.xlu0 %v768_v57  ;;  %v771_v30 = vadd.f32 %v3787_v11, %v3785_v32 }
 0x1b3   : > { %2744 = vpow2.f32 %v730_v8  ;;  %v3793_v55 = vpop.eup %2726 }
 0x1b4   : > { %2746 = vpow2.f32 %v732_v17  ;;  %v734_v0 = vmul.f32 1.442695, %v672_v35  ;;  %v750_v7 = vadd.f32 %v3793_v55, %v3789_v21  ;;  %v736_v44 = vmul.f32 1.442695, %v673_v42  ;;  %748 = vadd.xlane.f32.xlu1 %v747_v58 }
 0x1b5   : > { %v3797_v63 = vpop.eup %2728  ;;  %2748 = vpow2.f32 %v702_v14  ;;  %v1408_v13 = vpop.xlane.xlu0 %1407 }
 0x1b6   : > { %v3801_v38 = vpop.eup %2730  ;;  %v1405_v16 = vpop.xlane.xlu1 %1404  ;;  %2750 = vpow2.f32 %v704_v15  ;;  %v1453_v46 = vsub.f32 %v3581_v20, %v1408_v13  ;;  %v1454_v49 = vsub.f32 %v3583_v23, %v1408_v13  ;;  %751 = vadd.xlane.f32.xlu0 %v750_v7 }
 0x1b7   : > { %v3803_v1 = vpop.eup %2732  ;;  %v1451_v52 = vsub.f32 %v3572_v18, %v1405_v16  ;;  %v1452_v9 = vsub.f32 %v3574_v19, %v1405_v16  ;;  %v774_v6 = vadd.f32 %v3801_v38, %v3797_v63  ;;  %2752 = vpow2.f32 %v734_v0 }
 0x1b8   : > { %v3808_v3 = vpop.eup %2734  ;;  %v1487_v24 = vmul.f32 1.442695, %v1453_v46  ;;  %v1489_v20 = vmul.f32 1.442695, %v1454_v49  ;;  %2754 = vpow2.f32 %v736_v44  ;;  %772 = vadd.xlane.f32.xlu1 %v771_v30 }
 0x1b9   : > { %v3815_v12 = vpop.eup %2736  ;;  %v1483_v18 = vmul.f32 1.442695, %v1451_v52  ;;  %v1485_v19 = vmul.f32 1.442695, %v1452_v9  ;;  %v753_v17 = vadd.f32 %v3808_v3, %v3803_v1 }
 0x1ba   : > { %v3817_v48 = vpop.eup %2738  ;;  %v1411_v23 = vpop.xlane.xlu1 %1410  ;;  %2756 = vpow2.f32 %v1487_v24  ;;  %775 = vadd.xlane.f32.xlu0 %v774_v6 }
 0x1bb   : > { %v3819_v36 = vpop.eup %2740  ;;  %v1455_v57 = vsub.f32 %v3590_v25, %v1411_v23  ;;  %v1456_v29 = vsub.f32 %v3592_v22, %v1411_v23  ;;  %2758 = vpow2.f32 %v1489_v20  ;;  %v777_v44 = vadd.f32 %v3817_v48, %v3815_v12 }
 0x1bc   : > { %v3823_v8 = vpop.eup %2742  ;;  %2760 = vpow2.f32 %v1483_v18  ;;  %754 = vadd.xlane.f32.xlu1 %v753_v17 }
 0x1bd   : > { %v3827_v14 = vpop.eup %2744  ;;  %v756_v5 = vadd.f32 %v3823_v8, %v3819_v36  ;;  %v1491_v35 = vmul.f32 1.442695, %v1455_v57  ;;  %v1414_v25 = vpop.xlane.xlu0 %1413  ;;  %2762 = vpow2.f32 %v1485_v19  ;;  %v1493_v22 = vmul.f32 1.442695, %v1456_v29 }
 0x1be   : > { %v3831_v15 = vpop.eup %2746  ;;  %v1457_v42 = vsub.f32 %v3599_v28, %v1414_v25  ;;  %v1458_v58 = vsub.f32 %v3601_v33, %v1414_v25 }
 0x1bf   : > { %v3835_v0 = vpop.eup %2748  ;;  %757 = vadd.xlane.f32.xlu0 %v756_v5  ;;  %v780_v7 = vadd.f32 %v3831_v15, %v3827_v14  ;;  %2764 = vpow2.f32 %v1491_v35 }
 0x1c0   : > { %v3841_v13 = vpop.eup %2750  ;;  %v1495_v16 = vmul.f32 1.442695, %v1457_v42  ;;  %v1497_v46 = vmul.f32 1.442695, %v1458_v58  ;;  %778 = vadd.xlane.f32.xlu1 %v777_v44  ;;  %2766 = vpow2.f32 %v1493_v22 }
 0x1c1   : > { %v1417_v49 = vpop.xlane.xlu1 %1416  ;;  %v3843_v52 = vpop.eup %2752  ;;  %v759_v6 = vadd.f32 %v3841_v13, %v3835_v0 }
 0x1c2   : > { %v1459_v28 = vsub.f32 %v3608_v40, %v1417_v49  ;;  %v1460_v33 = vsub.f32 %v3610_v39, %v1417_v49  ;;  %v3847_v9 = vpop.eup %2754  ;;  %2768 = vpow2.f32 %v1495_v16 }
 0x1c3   : > { %781 = vadd.xlane.f32.xlu0 %v780_v7  ;;  %2770 = vpow2.f32 %v1497_v46  ;;  %v783_v29 = vadd.f32 %v3847_v9, %v3843_v52 }
 0x1c4   : > { %v3851_v30 = vpop.eup %2756  ;;  %v1499_v20 = vmul.f32 1.442695, %v1459_v28  ;;  %760 = vadd.xlane.f32.xlu1 %v759_v6  ;;  %v1501_v23 = vmul.f32 1.442695, %v1460_v33 }
 0x1c5   : > { %v3853_v24 = vpop.eup %2758  ;;  %v1420_v18 = vpop.xlane.xlu0 %1419 }
 0x1c6   : > { %v1461_v40 = vsub.f32 %v3617_v47, %v1420_v18  ;;  %v1462_v39 = vsub.f32 %v3619_v45, %v1420_v18  ;;  %v1550_v19 = vadd.f32 %v3853_v24, %v3851_v30  ;;  %v3859_v57 = vpop.eup %2760  ;;  %2772 = vpow2.f32 %v1499_v20 }
 0x1c7   : > { %v3863_v17 = vpop.eup %2762  ;;  %2774 = vpow2.f32 %v1501_v23  ;;  %v4425_v23 = vld [vmem:[#allocation12_spill] sm:$0xff] }
 0x1c8   : > { %1551 = vadd.xlane.f32.xlu0 %v1550_v19  ;;  %v1503_v5 = vmul.f32 1.442695, %v1461_v40  ;;  %784 = vadd.xlane.f32.xlu1 %v783_v29  ;;  %v1505_v25 = vmul.f32 1.442695, %v1462_v39  ;;  %v1547_v42 = vadd.f32 %v3863_v17, %v3859_v57 }
 0x1c9   : > { %v1423_v35 = vpop.xlane.xlu1 %1422  ;;  %v3867_v22 = vpop.eup %2764 }
 0x1ca   : > { %v1463_v47 = vsub.f32 %v3626_v54, %v1423_v35  ;;  %v1464_v45 = vsub.f32 %v3628_v51, %v1423_v35  ;;  %v3871_v58 = vpop.eup %2766  ;;  %2776 = vpow2.f32 %v1503_v5  ;;  %v4426_v35 = vld [vmem:[#allocation13_spill] sm:$0xff] }
 0x1cb   : > { %2778 = vpow2.f32 %v1505_v25  ;;  %v1553_v28 = vadd.f32 %v3871_v58, %v3867_v22 }
 0x1cc   : > { %v1507_v7 = vmul.f32 1.442695, %v1463_v47  ;;  %1548 = vadd.xlane.f32.xlu1 %v1547_v42  ;;  %v3873_v16 = vpop.eup %2768  ;;  %v1509_v46 = vmul.f32 1.442695, %v1464_v45  ;;  %v4427_v47 = vld [vmem:[#allocation14_spill] sm:$0xff] }
 0x1cd   : > { %v1426_v44 = vpop.xlane.xlu0 %1425  ;;  %v3877_v51 = vpop.eup %2770 }
 0x1ce   : > { %v1465_v49 = vsub.f32 %v3635_v61, %v1426_v44  ;;  %v1466_v54 = vsub.f32 %v3637_v60, %v1426_v44  ;;  %2780 = vpow2.f32 %v1507_v7  ;;  %v1556_v61 = vadd.f32 %v3877_v51, %v3873_v16 }
 0x1cf   : > { %2782 = vpow2.f32 %v1509_v46 }
 0x1d0   : > { %v1511_v33 = vmul.f32 1.442695, %v1465_v49  ;;  %v1513_v6 = vmul.f32 1.442695, %v1466_v54  ;;  %1554 = vadd.xlane.f32.xlu1 %v1553_v28  ;;  %v3883_v39 = vpop.eup %2772  ;;  %v4428_v54 = vld [vmem:[#allocation15_spill] sm:$0xff] }
 0x1d1   : > { %v1429_v20 = vpop.xlane.xlu1 %1428  ;;  %v3887_v60 = vpop.eup %2774 }
 0x1d2   : > { %v1467_v18 = vsub.f32 %v3643_v4, %v1429_v20  ;;  %v1468_v40 = vsub.f32 %v4425_v23, %v1429_v20  ;;  %2784 = vpow2.f32 %v1511_v33  ;;  %v1559_v42 = vadd.f32 %v3887_v60, %v3883_v39  ;;  %v4429_v33 = vld [vmem:[#allocation16_spill] sm:$0xff] }
 0x1d3   : > { %2786 = vpow2.f32 %v1513_v6 }
 0x1d4   : > { %v1515_v19 = vmul.f32 1.442695, %v1467_v18  ;;  %v1517_v29 = vmul.f32 1.442695, %v1468_v40  ;;  %1557 = vadd.xlane.f32.xlu1 %v1556_v61  ;;  %v3891_v45 = vpop.eup %2776 }
 0x1d5   : > { %v1432_v5 = vpop.xlane.xlu0 %1431  ;;  %v3895_v7 = vpop.eup %2778 }
 0x1d6   : > { %2788 = vpow2.f32 %v1515_v19  ;;  %v1469_v25 = vsub.f32 %v4426_v35, %v1432_v5  ;;  %v1470_v4 = vsub.f32 %v4427_v47, %v1432_v5  ;;  %v1562_v18 = vadd.f32 %v3895_v7, %v3891_v45  ;;  %v4431_v5 = vld [vmem:[#allocation17_spill] sm:$0xff] }
 0x1d7   : > { %2790 = vpow2.f32 %v1517_v29 }
 0x1d8   : > { %v1519_v44 = vmul.f32 1.442695, %v1469_v25  ;;  %v1521_v46 = vmul.f32 1.442695, %v1470_v4  ;;  %1560 = vadd.xlane.f32.xlu1 %v1559_v42  ;;  %v3899_v20 = vpop.eup %2780  ;;  %v4432_v25 = vld [vmem:[#allocation18_spill] sm:$0xff] }
 0x1d9   : > { %v1435_v49 = vpop.xlane.xlu1 %1434  ;;  %v3903_v23 = vpop.eup %2782 }
 0x1da   : > { %2792 = vpow2.f32 %v1519_v44  ;;  %v1471_v28 = vsub.f32 %v4428_v54, %v1435_v49  ;;  %v1472_v6 = vsub.f32 %v4429_v33, %v1435_v49  ;;  %v1565_v42 = vadd.f32 %v3903_v23, %v3899_v20  ;;  %v4435_v33 = vld [vmem:[#allocation19_spill] sm:$0xff] }
 0x1db   : > { %2794 = vpow2.f32 %v1521_v46 }
 0x1dc   : > { %v1523_v40 = vmul.f32 1.442695, %v1471_v28  ;;  %v1525_v61 = vmul.f32 1.442695, %v1472_v6  ;;  %1563 = vadd.xlane.f32.xlu1 %v1562_v18  ;;  %v3905_v29 = vpop.eup %2784  ;;  %v4436_v18 = vld [vmem:[#allocation20_spill] sm:$0xff] }
 0x1dd   : > { %v1438_v19 = vpop.xlane.xlu0 %1437  ;;  %4430 = vst [vmem:[#allocation12_spill] sm:$0xff] %v3905_v29  ;;  %v3909_v4 = vpop.eup %2786 }
 0x1de   : > { %2796 = vpow2.f32 %v1523_v40  ;;  %v1473_v35 = vsub.f32 %v4431_v5, %v1438_v19  ;;  %v1474_v47 = vsub.f32 %v4432_v25, %v1438_v19  ;;  %4433 = vst [vmem:[#allocation13_spill] sm:$0xff] %v3909_v4 }
 0x1df   : > { %2798 = vpow2.f32 %v1525_v61  ;;  %v1568_v61 = vadd.f32 %v3909_v4, %v3905_v29 }
 0x1e0   : > { %v3913_v44 = vpop.eup %2788  ;;  %v1527_v46 = vmul.f32 1.442695, %v1473_v35  ;;  %v1529_v49 = vmul.f32 1.442695, %v1474_v47  ;;  %1566 = vadd.xlane.f32.xlu1 %v1565_v42 }
 0x1e1   : > { %v3915_v54 = vpop.eup %2790  ;;  %v1441_v28 = vpop.xlane.xlu1 %1440 }
 0x1e2   : > { %4434 = vst [vmem:[#allocation14_spill] sm:$0xff] %v3915_v54  ;;  %2800 = vpow2.f32 %v1527_v46  ;;  %v1475_v6 = vsub.f32 %v4435_v33, %v1441_v28  ;;  %v1476_v40 = vsub.f32 %v4436_v18, %v1441_v28  ;;  %v1571_v19 = vadd.f32 %v3915_v54, %v3913_v44  ;;  %v4438_v46 = vld [vmem:[#allocation21_spill] sm:$0xff]  ;;  %v4439_v28 = vld [vmem:[#allocation22_spill] sm:$0xff]  ;;  %v4443_v54 = vld [vmem:[#allocation24_spill] sm:$0xff] }
 0x1e3   : > { %2802 = vpow2.f32 %v1529_v49 }
 0x1e4   : > { %v3923_v5 = vpop.eup %2792  ;;  %v1531_v35 = vmul.f32 1.442695, %v1475_v6  ;;  %v1533_v25 = vmul.f32 1.442695, %v1476_v40  ;;  %1572 = vadd.xlane.f32.xlu0 %v1571_v19  ;;  %1569 = vadd.xlane.f32.xlu1 %v1568_v61  ;;  %v4442_v61 = vld [vmem:[#allocation23_spill] sm:$0xff] }
 0x1e5   : > { %v3925_v47 = vpop.eup %2794  ;;  %v1444_v42 = vpop.xlane.xlu0 %1443 }
 0x1e6   : > { %4437 = vst [vmem:[#allocation15_spill] sm:$0xff] %v3925_v47  ;;  %2804 = vpow2.f32 %v1531_v35  ;;  %v1477_v33 = vsub.f32 %v4438_v46, %v1444_v42  ;;  %v1478_v18 = vsub.f32 %v4439_v28, %v1444_v42  ;;  %v1574_v49 = vadd.f32 %v3925_v47, %v3923_v5 }
 0x1e7   : > { %2806 = vpow2.f32 %v1533_v25 }
 0x1e8   : > { %v3931_v4 = vpop.eup %2796  ;;  %v1535_v29 = vmul.f32 1.442695, %v1477_v33  ;;  %v1537_v6 = vmul.f32 1.442695, %v1478_v18  ;;  %1575 = vadd.xlane.f32.xlu1 %v1574_v49 }
 0x1e9   : > { %4440 = vst [vmem:[#allocation16_spill] sm:$0xff] %v3931_v4  ;;  %v3933_v40 = vpop.eup %2798  ;;  %v1447_v19 = vpop.xlane.xlu1 %1446 }
 0x1ea   : > { %4441 = vst [vmem:[#allocation17_spill] sm:$0xff] %v3933_v40  ;;  %2808 = vpow2.f32 %v1535_v29  ;;  %v1479_v35 = vsub.f32 %v4442_v61, %v1447_v19  ;;  %v1480_v46 = vsub.f32 %v4443_v54, %v1447_v19  ;;  %v1577_v42 = vadd.f32 %v3933_v40, %v3931_v4  ;;  %v4446_v29 = vld [vmem:[#allocation25_spill] sm:$0xff]  ;;  %v4447_v61 = vld [vmem:[#allocation26_spill] sm:$0xff] }
 0x1eb   : > { %2810 = vpow2.f32 %v1537_v6  ;;  %v1909_v6 = vpop.f32.mrb[16].mxu0 }
 0x1ec   : > { %v3939_v28 = vpop.eup %2800  ;;  %v1539_v25 = vmul.f32 1.442695, %v1479_v35  ;;  %v1541_v47 = vmul.f32 1.442695, %v1480_v46  ;;  %1578 = vadd.xlane.f32.xlu0 %v1577_v42  ;;  %v1911_v35 = vpop.f32.mrb[17].mxu0 }
 0x1ed   : > { %4444 = vst [vmem:[#allocation18_spill] sm:$0xff] %v3939_v28  ;;  %v3944_v33 = vpop.eup %2802  ;;  %v1450_v18 = vpop.xlane.xlu0 %1449  ;;  %v2554_v4 = vpack.c.bf16 %v1911_v35, %v1909_v6 }
 0x1ee   : > { %4445 = vst [vmem:[#allocation19_spill] sm:$0xff] %v3944_v33  ;;  %2812 = vpow2.f32 %v1539_v25  ;;  %v1481_v49 = vsub.f32 %v4446_v29, %v1450_v18  ;;  %v1482_v54 = vsub.f32 %v4447_v61, %v1450_v18  ;;  %v1580_v19 = vadd.f32 %v3944_v33, %v3939_v28  ;;  %v1915_v29 = vpop.f32.mrb[18].mxu0  ;;  %v977_v33 = vld [vmem:[%s3272_s18 + $0x78] sm:$0xff] }
 0x1ef   : > { %2814 = vpow2.f32 %v1541_v47  ;;  %2100 = vst [vmem:[%s3960_s19] sm:$0xff] %v2554_v4  ;;  %v1917_v47 = vpop.f32.mrb[19].mxu0 }
 0x1f0   : > { %v3953_v46 = vpop.eup %2804  ;;  %v1543_v42 = vmul.f32 1.442695, %v1481_v49  ;;  %v1545_v40 = vmul.f32 1.442695, %v1482_v54  ;;  %1581 = vadd.xlane.f32.xlu1 %v1580_v19  ;;  %v2555_v61 = vpack.c.bf16 %v1917_v47, %v1915_v29  ;;  %v1921_v6 = vpop.f32.mrb[20].mxu0 }
 0x1f1   : > { %4448 = vst [vmem:[#allocation20_spill] sm:$0xff] %v3953_v46  ;;  %v3955_v25 = vpop.eup %2806  ;;  %v1923_v4 = vpop.f32.mrb[21].mxu0 }
 0x1f2   : > { %4449 = vst [vmem:[#allocation21_spill] sm:$0xff] %v3955_v25  ;;  %2816 = vpow2.f32 %v1543_v42  ;;  %v1583_v18 = vadd.f32 %v3955_v25, %v3953_v46  ;;  %2101 = vst [vmem:[%s3960_s19 + $0x8] sm:$0xff] %v2555_v61  ;;  %v975_v46 = vld [vmem:[%s3272_s18 + $0x68] sm:$0xff] }
 0x1f3   : > { %2818 = vpow2.f32 %v1545_v40  ;;  %v2556_v40 = vpack.c.bf16 %v1923_v4, %v1921_v6 }
 0x1f4   : > { %v3963_v49 = vpop.eup %2808  ;;  %1584 = vadd.xlane.f32.xlu0 %v1583_v18  ;;  %v1927_v18 = vpop.f32.mrb[22].mxu0 }
 0x1f5   : > { %4450 = vst [vmem:[#allocation22_spill] sm:$0xff] %v3963_v49  ;;  %v3965_v54 = vpop.eup %2810  ;;  %2102 = vst [vmem:[%s3960_s19 + $0x10] sm:$0xff] %v2556_v40  ;;  %v1929_v61 = vpop.f32.mrb[23].mxu0 }
 0x1f6   : > { %4451 = vst [vmem:[#allocation23_spill] sm:$0xff] %v3965_v54  ;;  %v1586_v19 = vadd.f32 %v3965_v54, %v3963_v49  ;;  %v976_v49 = vld [vmem:[%s3272_s18 + $0x70] sm:$0xff]  ;;  %v2557_v25 = vpack.c.bf16 %v1929_v61, %v1927_v18  ;;  %v1933_v6 = vpop.f32.mrb[24].mxu0  ;;  %v1008_v18 = vmul.f32 1.442695, %v977_v33  ;;  %s4008_s18 = scalar_lea.vmem [#allocation2], %s3951_s17 }
 0x1f7   : > { %v1006_v4 = vmul.f32 1.442695, %v976_v49  ;;  %v1935_v40 = vpop.f32.mrb[25].mxu0  ;;  %s2146_s24 = sshll.u32 %s4008_s18, 4  ;;  %s4127_s24 = int_to_ptr.vmem [resolvable:$true] %s2146_s24 }
 0x1f8   : > { %v3970_v35 = vpop.eup %2812  ;;  %1587 = vadd.xlane.f32.xlu1 %v1586_v19  ;;  %2103 = vst [vmem:[%s3960_s19 + $0x18] sm:$0xff] %v2557_v25  ;;  %s2954_s26 = scalar_lea.vmem %s4127_s24, 2048  ;;  %p2961_p0 = scmp.lt.s32.totalorder %s4127_s24, %s2959_s22 }
 0x1f9   : > { %4452 = vst [vmem:[#allocation24_spill] sm:$0xff] %v3970_v35  ;;  %v3972_v42 = vpop.eup %2814  ;;  %2820 = vpow2.f32 %v1006_v4  ;;  %p2955_p11 = scmp.ne.s32.totalorder %s4127_s24, %s2954_s26  ;;  %p2962_p1 = scmp.lt.s32.totalorder %s2960_s10, %s2954_s26 }
 0x1fa   : > { %4453 = vst [vmem:[#allocation25_spill] sm:$0xff] %v3972_v42  ;;  %v1589_v29 = vadd.f32 %v3972_v42, %v3970_v35  ;;  %v1004_v42 = vmul.f32 1.442695, %v975_v46  ;;  %v2558_v35 = vpack.c.bf16 %v1935_v40, %v1933_v6 }
 0x1fb   : > { %p2956_p12 = pnand %p2955_p11, %p3203_p5  ;;  %p2963_p2 = por %p2962_p1, %p2961_p0 }
 0x1fc   : > { %v3977_v47 = vpop.eup %2816  ;;  %1590 = vadd.xlane.f32.xlu0 %v1589_v29  ;;  %2104 = vst [vmem:[%s3960_s19 + $0x20] sm:$0xff] %v2558_v35  ;;  %v1939_v29 = vpop.f32.mrb[26].mxu0  ;;  %2822 = vpow2.f32 %v1004_v42 }
 0x1fd   : > { %4454 = vst [vmem:[#allocation26_spill] sm:$0xff] %v3977_v47  ;;  %v3979_v54 = vpop.eup %2818  ;;  %v1941_v28 = vpop.f32.mrb[27].mxu0  ;;  %2824 = vpow2.f32 %v1008_v18  ;;  %p2957_p13 = pneg %p2956_p12 }
 0x1fe   : > { %4455 = vst [vmem:[#allocation38_spill] sm:$0xff] %v3979_v54  ;;  %v1592_v19 = vadd.f32 %v3979_v54, %v3977_v47  ;;  %v2559_v61 = vpack.c.bf16 %v1941_v28, %v1939_v29  ;;  %v1945_v54 = vpop.f32.mrb[28].mxu0 }
 0x1ff   : > { %v1947_v47 = vpop.f32.mrb[29].mxu0  ;;  %p2964_p3 = pnand %p2963_p2, %p2957_p13 }
 0x200   : > { %1593 = vadd.xlane.f32.xlu1 %v1592_v19  ;;  %2105 = vst [vmem:[%s3960_s19 + $0x28] sm:$0xff] %v2559_v61  ;;  %v2560_v25 = vpack.c.bf16 %v1947_v47, %v1945_v54  ;;  %v1951_v49 = vpop.f32.mrb[30].mxu0 }
 0x201   : > { %v1953_v19 = vpop.f32.mrb[31].mxu0 }
 0x202   : > { %2106 = vst [vmem:[%s3960_s19 + $0x30] sm:$0xff] %v2560_v25  ;;  %v2561_v46 = vpack.c.bf16 %v1953_v19, %v1951_v49  ;;  %v1957_v4 = vpop.f32.mrb[32].mxu0 }
 0x203   : > { %v2821_v6 = vpop.eup %2820  ;;  %v1959_v40 = vpop.f32.mrb[33].mxu0 }
 0x204   : > { %2107 = vst [vmem:[%s3960_s19 + $0x38] sm:$0xff] %v2561_v46  ;;  %v2562_v33 = vpack.c.bf16 %v1959_v40, %v1957_v4  ;;  %v1963_v42 = vpop.f32.mrb[34].mxu0 }
 0x205   : > { %v1965_v54 = vpop.f32.mrb[35].mxu0 }
 0x206   : > { %v2823_v35 = vpop.eup %2822  ;;  %2108 = vst [vmem:[%s3960_s19 + $0x40] sm:$0xff] %v2562_v33  ;;  %v2563_v47 = vpack.c.bf16 %v1965_v54, %v1963_v42  ;;  %v1969_v29 = vpop.f32.mrb[36].mxu0 }
 0x207   : > { %v2825_v28 = vpop.eup %2824  ;;  %v1971_v18 = vpop.f32.mrb[37].mxu0 }
 0x208   : > { %2109 = vst [vmem:[%s3960_s19 + $0x48] sm:$0xff] %v2563_v47  ;;  %v2564_v61 = vpack.c.bf16 %v1971_v18, %v1969_v29  ;;  %v1975_v25 = vpop.f32.mrb[38].mxu0 }
 0x209   : > { %v1977_v49 = vpop.f32.mrb[39].mxu0 }
 0x20a   : > { %2110 = vst [vmem:[%s3960_s19 + $0x50] sm:$0xff] %v2564_v61  ;;  %v2565_v19 = vpack.c.bf16 %v1977_v49, %v1975_v25  ;;  %v1981_v46 = vpop.f32.mrb[40].mxu0  ;;  %v3998_v61 = vpop.permute.xlu0 %1067 }
 0x20b   : > { %v4001_v49 = vpop.permute.xlu1 %1072 }
 0x20c   : > { %2111 = vst [vmem:[%s3960_s19 + $0x58] sm:$0xff] %v2565_v19 }
 0x211   : > { %1082 = vperm.xlu1 %2665, %v2821_v6   ;;  %v1983_v6 = vpop.f32.mrb[41].mxu0 }
 0x212   : > { %1077 = vperm.xlu0 %2664, %v2823_v35   ;;  %v2566_v35 = vpack.c.bf16 %v1983_v6, %v1981_v46  ;;  %v1987_v4 = vpop.f32.mrb[42].mxu0 }
 0x213   : > { %v1989_v40 = vpop.f32.mrb[43].mxu0 }
 0x214   : > { %2112 = vst [vmem:[%s3960_s19 + $0x60] sm:$0xff] %v2566_v35  ;;  %v2567_v33 = vpack.c.bf16 %v1989_v40, %v1987_v4 }
 0x216   : > { %1087 = vperm.xlu0 %2664, %v2825_v28   ;;  %2113 = vst [vmem:[%s3960_s19 + $0x68] sm:$0xff] %v2567_v33  ;;  %v1993_v28 = vpop.f32.mrb[44].mxu0 }
 0x217   : > { %v1995_v42 = vpop.f32.mrb[45].mxu0 }
 0x218   : > { %v2568_v54 = vpack.c.bf16 %v1995_v42, %v1993_v28  ;;  %v1999_v47 = vpop.f32.mrb[46].mxu0  ;;  %v4456_v42 = vld [vmem:[#allocation28_spill] sm:$0xff] }
 0x219   : > { %v2001_v29 = vpop.f32.mrb[47].mxu0 }
 0x21a   : > { %2114 = vst [vmem:[%s3960_s19 + $0x70] sm:$0xff] %v2568_v54  ;;  %v2569_v18 = vpack.c.bf16 %v2001_v29, %v1999_v47 }
 0x21c   : > { %2115 = vst [vmem:[%s3960_s19 + $0x78] sm:$0xff] %v2569_v18 }
 0x231   : > { %v740_v25 = vpop.xlane.xlu0 %739 }
 0x232   : > { %2826 = vrcp.f32 %v740_v25 }
 0x237   : > { %v764_v19 = vpop.xlane.xlu0 %763 }
 0x238   : > { %2828 = vrcp.f32 %v764_v19 }
 0x239   : > { %v743_v46 = vpop.xlane.xlu1 %742 }
 0x23a   : > { %2830 = vrcp.f32 %v743_v46 }
 0x23b   : > { %v746_v6 = vpop.xlane.xlu0 %745 }
 0x23c   : > { %v2827_v35 = vpop.eup %2826  ;;  %2832 = vrcp.f32 %v746_v6 }
 0x23d   : > { %v818_v4 = vmul.f32 %v2827_v35, %v3729_v2  ;;  %v819_v40 = vmul.f32 %v2827_v35, %v3731_v59  ;;  %v767_v33 = vpop.xlane.xlu1 %766 }
 0x23e   : > { %2834 = vrcp.f32 %v767_v33 }
 0x23f   : > { %v2506_v28 = vpack.c.bf16 %v819_v40, %v818_v4  ;;  %v1090_v54 = vmul.f32 %v4456_v42, %v818_v4  ;;  %v1091_v47 = vmul.f32 %v4456_v42, %v819_v40  ;;  %v770_v29 = vpop.xlane.xlu0 %769  ;;  %v4457_v4 = vld [vmem:[#allocation35_spill] sm:$0xff] }
 0x240   : > { %2836 = vrcp.f32 %v770_v29 }
 0x241   : > { %946 = vst [vmem:[%s4008_s18] sm:$0xff] %v2506_v28  ;;  %v2522_v18 = vpack.c.bf16 %v1091_v47, %v1090_v54  ;;  %v749_v25 = vpop.xlane.xlu1 %748 }
 0x242   : > { %v2829_v19 = vpop.eup %2828  ;;  %2838 = vrcp.f32 %v749_v25 }
 0x243   : > { %1218 = vst [vmem:[%s4012_s20] sm:$0xff] %v2522_v18  ;;  %v834_v2 = vmul.f32 %v2829_v19, %v3743_v56  ;;  %v835_v59 = vmul.f32 %v2829_v19, %v3748_v31  ;;  %v752_v46 = vpop.xlane.xlu0 %751  ;;  %v4458_v18 = vld [vmem:[#allocation27_spill] sm:$0xff] }
 0x244   : > { %v2831_v6 = vpop.eup %2830  ;;  %2840 = vrcp.f32 %v752_v46 }
 0x245   : > { %v2514_v35 = vpack.c.bf16 %v835_v59, %v834_v2  ;;  %v1106_v40 = vmul.f32 %v4457_v4, %v834_v2  ;;  %v1107_v33 = vmul.f32 %v4457_v4, %v835_v59  ;;  %v820_v28 = vmul.f32 %v2831_v6, %v3751_v27  ;;  %v773_v42 = vpop.xlane.xlu1 %772 }
 0x246   : > { %v2833_v54 = vpop.eup %2832  ;;  %v821_v47 = vmul.f32 %v2831_v6, %v3753_v37  ;;  %2842 = vrcp.f32 %v773_v42  ;;  %v4459_v37 = vld [vmem:[#allocation30_spill] sm:$0xff] }
 0x247   : > { %954 = vst [vmem:[%s4008_s18 + $0x40] sm:$0xff] %v2514_v35  ;;  %v2530_v56 = vpack.c.bf16 %v1107_v33, %v1106_v40  ;;  %v822_v31 = vmul.f32 %v2833_v54, %v3757_v43  ;;  %v823_v29 = vmul.f32 %v2833_v54, %v3762_v50  ;;  %v1092_v25 = vmul.f32 %v4458_v18, %v820_v28  ;;  %v776_v19 = vpop.xlane.xlu0 %775 }
 0x248   : > { %v2835_v2 = vpop.eup %2834  ;;  %v2507_v59 = vpack.c.bf16 %v821_v47, %v820_v28  ;;  %v1093_v27 = vmul.f32 %v4458_v18, %v821_v47  ;;  %2844 = vrcp.f32 %v776_v19  ;;  %v4460_v47 = vld [vmem:[#allocation36_spill] sm:$0xff] }
 0x249   : > { %1226 = vst [vmem:[%s4012_s20 + $0x40] sm:$0xff] %v2530_v56  ;;  %v2508_v46 = vpack.c.bf16 %v823_v29, %v822_v31  ;;  %v1094_v6 = vmul.f32 %v4459_v37, %v822_v31  ;;  %v1095_v35 = vmul.f32 %v4459_v37, %v823_v29  ;;  %v836_v43 = vmul.f32 %v2835_v2, %v3739_v26  ;;  %v755_v4 = vpop.xlane.xlu1 %754 }
 0x24a   : > { %v2837_v50 = vpop.eup %2836  ;;  %947 = vst [vmem:[%s4008_s18 + $0x8] sm:$0xff] %v2507_v59  ;;  %v2523_v40 = vpack.c.bf16 %v1093_v27, %v1092_v25  ;;  %v837_v33 = vmul.f32 %v2835_v2, %v3741_v34  ;;  %2846 = vrcp.f32 %v755_v4  ;;  %v4461_v25 = vld [vmem:[#allocation37_spill] sm:$0xff] }
 0x24b   : > { %948 = vst [vmem:[%s4008_s18 + $0x10] sm:$0xff] %v2508_v46  ;;  %v2524_v28 = vpack.c.bf16 %v1095_v35, %v1094_v6  ;;  %v838_v42 = vmul.f32 %v2837_v50, %v3767_v41  ;;  %v839_v54 = vmul.f32 %v2837_v50, %v3769_v62  ;;  %v1108_v56 = vmul.f32 %v4460_v47, %v836_v43 }
 0x24c   : > { %v758_v31 = vpop.xlane.xlu0 %757  ;;  %v2839_v29 = vpop.eup %2838  ;;  %1219 = vst [vmem:[%s4012_s20 + $0x8] sm:$0xff] %v2523_v40  ;;  %v2515_v26 = vpack.c.bf16 %v837_v33, %v836_v43  ;;  %v1109_v18 = vmul.f32 %v4460_v47, %v837_v33  ;;  %v4462_v43 = vld [vmem:[#allocation29_spill] sm:$0xff] }
 0x24d   : > { %2848 = vrcp.f32 %v758_v31  ;;  %1220 = vst [vmem:[%s4012_s20 + $0x10] sm:$0xff] %v2524_v28  ;;  %v2516_v34 = vpack.c.bf16 %v839_v54, %v838_v42  ;;  %v1110_v19 = vmul.f32 %v4461_v25, %v838_v42  ;;  %v1111_v41 = vmul.f32 %v4461_v25, %v839_v54  ;;  %v779_v62 = vpop.xlane.xlu1 %778  ;;  %v4463_v28 = vld [vmem:[#allocation31_spill] sm:$0xff] }
 0x24e   : > { %v824_v2 = vmul.f32 %v2839_v29, %v3773_v10  ;;  %v2841_v59 = vpop.eup %2840  ;;  %955 = vst [vmem:[%s4008_s18 + $0x48] sm:$0xff] %v2515_v26  ;;  %v2531_v27 = vpack.c.bf16 %v1109_v18, %v1108_v56  ;;  %v825_v46 = vmul.f32 %v2839_v29, %v3778_v53  ;;  %2850 = vrcp.f32 %v779_v62 }
 0x24f   : > { %956 = vst [vmem:[%s4008_s18 + $0x50] sm:$0xff] %v2516_v34  ;;  %v2532_v37 = vpack.c.bf16 %v1111_v41, %v1110_v19  ;;  %v826_v6 = vmul.f32 %v2841_v59, %v3789_v21  ;;  %v827_v35 = vmul.f32 %v2841_v59, %v3793_v55 }
 0x250   : > { %v1096_v4 = vmul.f32 %v4462_v43, %v824_v2  ;;  %v782_v50 = vpop.xlane.xlu0 %781  ;;  %v2843_v40 = vpop.eup %2842  ;;  %1227 = vst [vmem:[%s4012_s20 + $0x48] sm:$0xff] %v2531_v27  ;;  %v2509_v10 = vpack.c.bf16 %v825_v46, %v824_v2  ;;  %v1097_v33 = vmul.f32 %v4462_v43, %v825_v46 }
 0x251   : > { %2852 = vrcp.f32 %v782_v50  ;;  %1228 = vst [vmem:[%s4012_s20 + $0x50] sm:$0xff] %v2532_v37  ;;  %v2510_v53 = vpack.c.bf16 %v827_v35, %v826_v6  ;;  %v1098_v42 = vmul.f32 %v4463_v28, %v826_v6  ;;  %v1099_v21 = vmul.f32 %v4463_v28, %v827_v35  ;;  %v761_v55 = vpop.xlane.xlu1 %760  ;;  %v4464_v35 = vld [vmem:[#allocation32_spill] sm:$0xff]  ;;  %v4465_v50 = vld [vmem:[#allocation33_spill] sm:$0xff] }
 0x252   : > { %v840_v54 = vmul.f32 %v2843_v40, %v3785_v32  ;;  %v2845_v47 = vpop.eup %2844  ;;  %949 = vst [vmem:[%s4008_s18 + $0x18] sm:$0xff] %v2509_v10  ;;  %v2525_v56 = vpack.c.bf16 %v1097_v33, %v1096_v4  ;;  %v841_v31 = vmul.f32 %v2843_v40, %v3787_v11  ;;  %2854 = vrcp.f32 %v761_v55 }
 0x253   : > { %950 = vst [vmem:[%s4008_s18 + $0x20] sm:$0xff] %v2510_v53  ;;  %v2526_v29 = vpack.c.bf16 %v1099_v21, %v1098_v42  ;;  %v842_v26 = vmul.f32 %v2845_v47, %v3797_v63  ;;  %v843_v18 = vmul.f32 %v2845_v47, %v3801_v38 }
 0x254   : > { %v1112_v34 = vmul.f32 %v3998_v61, %v840_v54  ;;  %v2847_v25 = vpop.eup %2846  ;;  %1221 = vst [vmem:[%s4012_s20 + $0x18] sm:$0xff] %v2525_v56  ;;  %v2517_v32 = vpack.c.bf16 %v841_v31, %v840_v54  ;;  %v1113_v19 = vmul.f32 %v3998_v61, %v841_v31  ;;  %v4466_v31 = vld [vmem:[#allocation34_spill] sm:$0xff] }
 0x255   : > { %v1552_v41 = vpop.xlane.xlu0 %1551  ;;  %1222 = vst [vmem:[%s4012_s20 + $0x20] sm:$0xff] %v2526_v29  ;;  %v2518_v2 = vpack.c.bf16 %v843_v18, %v842_v26  ;;  %v1114_v11 = vmul.f32 %v4001_v49, %v842_v26  ;;  %v1115_v62 = vmul.f32 %v4001_v49, %v843_v18  ;;  %v828_v63 = vmul.f32 %v2847_v25, %v3803_v1  ;;  %v785_v59 = vpop.xlane.xlu1 %784 }
 0x256   : > { %957 = vst [vmem:[%s4008_s18 + $0x58] sm:$0xff] %v2517_v32  ;;  %v2533_v27 = vpack.c.bf16 %v1113_v19, %v1112_v34  ;;  %v829_v46 = vmul.f32 %v2847_v25, %v3808_v3  ;;  %2856 = vrcp.f32 %v1552_v41 }
 0x257   : > { %v2849_v38 = vpop.eup %2848  ;;  %958 = vst [vmem:[%s4008_s18 + $0x60] sm:$0xff] %v2518_v2  ;;  %v2534_v61 = vpack.c.bf16 %v1115_v62, %v1114_v11  ;;  %v1100_v43 = vmul.f32 %v4464_v35, %v828_v63  ;;  %2858 = vrcp.f32 %v785_v59 }
 0x258   : > { %v830_v37 = vmul.f32 %v2849_v38, %v3819_v36  ;;  %v831_v6 = vmul.f32 %v2849_v38, %v3823_v8  ;;  %v2851_v49 = vpop.eup %2850  ;;  %1229 = vst [vmem:[%s4012_s20 + $0x58] sm:$0xff] %v2533_v27  ;;  %v2511_v1 = vpack.c.bf16 %v829_v46, %v828_v63  ;;  %v1101_v4 = vmul.f32 %v4464_v35, %v829_v46 }
 0x259   : > { %1230 = vst [vmem:[%s4012_s20 + $0x60] sm:$0xff] %v2534_v61  ;;  %v1549_v36 = vpop.xlane.xlu1 %1548  ;;  %v4078_v8 = vmul.f32 %v2851_v49, %v3815_v12  ;;  %v4082_v28 = vmul.f32 %v2851_v49, %v3817_v48 }
 0x25a   : > { %v2512_v3 = vpack.c.bf16 %v831_v6, %v830_v37  ;;  %v1102_v40 = vmul.f32 %v4465_v50, %v830_v37  ;;  %v1103_v10 = vmul.f32 %v4465_v50, %v831_v6  ;;  %951 = vst [vmem:[%s4008_s18 + $0x28] sm:$0xff] %v2511_v1  ;;  %v2527_v53 = vpack.c.bf16 %v1101_v4, %v1100_v43 }
 0x25b   : > { %v2853_v33 = vpop.eup %2852  ;;  %2860 = vrcp.f32 %v1549_v36  ;;  %v2519_v55 = vpack.c.bf16 %v4082_v28, %v4078_v8 }
 0x25c   : > { %952 = vst [vmem:[%s4008_s18 + $0x30] sm:$0xff] %v2512_v3  ;;  %v2528_v42 = vpack.c.bf16 %v1103_v10, %v1102_v40  ;;  %v4086_v21 = vmul.f32 %v2853_v33, %v3827_v14  ;;  %v4089_v54 = vmul.f32 %v2853_v33, %v3831_v15  ;;  %v2855_v12 = vpop.eup %2854  ;;  %1223 = vst [vmem:[%s4012_s20 + $0x28] sm:$0xff] %v2527_v53 }
 0x25d   : > { %v832_v47 = vmul.f32 %v2855_v12, %v3835_v0  ;;  %v833_v48 = vmul.f32 %v2855_v12, %v3841_v13  ;;  %v1555_v56 = vpop.xlane.xlu1 %1554  ;;  %959 = vst [vmem:[%s4008_s18 + $0x68] sm:$0xff] %v2519_v55 }
 0x25e   : > { %1224 = vst [vmem:[%s4012_s20 + $0x30] sm:$0xff] %v2528_v42  ;;  %v2520_v14 = vpack.c.bf16 %v4089_v54, %v4086_v21  ;;  %2862 = vrcp.f32 %v1555_v56 }
 0x25f   : > { %v2513_v15 = vpack.c.bf16 %v833_v48, %v832_v47  ;;  %v1104_v29 = vmul.f32 %v4466_v31, %v832_v47  ;;  %v1105_v26 = vmul.f32 %v4466_v31, %v833_v48 }
 0x260   : > { %960 = vst [vmem:[%s4008_s18 + $0x70] sm:$0xff] %v2520_v14  ;;  %v2857_v18 = vpop.eup %2856 }
 0x261   : > { %953 = vst [vmem:[%s4008_s18 + $0x38] sm:$0xff] %v2513_v15  ;;  %v2529_v0 = vpack.c.bf16 %v1105_v26, %v1104_v29  ;;  %v1629_v13 = vmul.f32 %v2857_v18, %v3851_v30  ;;  %v1630_v34 = vmul.f32 %v2857_v18, %v3853_v24  ;;  %v1558_v25 = vpop.xlane.xlu1 %1557  ;;  %v2859_v32 = vpop.eup %2858 }
 0x262   : > { %2864 = vrcp.f32 %v1558_v25  ;;  %v4112_v2 = vmul.f32 %v2859_v32, %v3843_v52  ;;  %v4115_v11 = vmul.f32 %v2859_v32, %v3847_v9 }
 0x263   : > { %1225 = vst [vmem:[%s4012_s20 + $0x38] sm:$0xff] %v2529_v0  ;;  %v1663_v19 = vmul.f32 1.442695, %v1629_v13  ;;  %v1665_v41 = vmul.f32 1.442695, %v1630_v34 }
 0x264   : > { %v2521_v59 = vpack.c.bf16 %v4115_v11, %v4112_v2 }
 0x265   : > { %v2861_v30 = vpop.eup %2860  ;;  %2866 = vpow2.f32 %v1663_v19  ;;  %v1561_v63 = vpop.xlane.xlu1 %1560 }
 0x266   : > { %v1627_v24 = vmul.f32 %v2861_v30, %v3859_v57  ;;  %v1628_v62 = vmul.f32 %v2861_v30, %v3863_v17  ;;  %2868 = vpow2.f32 %v1665_v41  ;;  %961 = vst [vmem:[%s4008_s18 + $0x78] sm:$0xff] %v2521_v59 }
 0x267   : > { %2870 = vrcp.f32 %v1561_v63 }
 0x268   : > { %v1659_v52 = vmul.f32 1.442695, %v1627_v24  ;;  %v1661_v9 = vmul.f32 1.442695, %v1628_v62  ;;  %v2863_v57 = vpop.eup %2862 }
 0x269   : > { %2967 = shalt.err (!%p2964_p3)
}
 0x26a   : > { %s2968_s18 = scalar_lea.hbm %s4125_s25, 2048  ;;  %s2972_s12 = scalar_lea.hbm %s4344_s5, 4096 }
 0x26b   : > { %p2969_p4 = scmp.ne.s32.totalorder %s4125_s25, %s2968_s18  ;;  %p2973_p9 = scmp.lt.u32.totalorder %s4125_s25, %s4344_s5 }
 0x26c   : > { %p2974_p10 = scmp.lt.u32.totalorder %s2972_s12, %s2968_s18  ;;  %p2976_p12 = scmp.lt.u32.totalorder %s2968_s18, %s4125_s25 }
 0x26d   : > { %p2970_p7 = pnand %p2969_p4, %p3203_p5 }
 0x26e   : > { %p2975_p11 = por %p2974_p10, %p2973_p9 }
 0x26f   : > { %p2971_p8 = pneg %p2970_p7 }
 0x270   : > { %p2977_p13 = por %p2976_p12, %p2975_p11 }
 0x272   : > { %p2978_p0 = pnand %p2977_p13, %p2971_p8 }
 0x274   : > { %2981 = shalt.err (!%p2978_p0)
}
 0x275   : > { %s4391_s10 = smov 128   ;;  %s3114_s26 = smov 8   ;;  %2872 = vpow2.f32 %v1659_v52  ;;  %v1631_v17 = vmul.f32 %v2863_v57, %v3867_v22  ;;  %v1632_v38 = vmul.f32 %v2863_v57, %v3871_v58  ;;  %v1564_v27 = vpop.xlane.xlu1 %1563  ;;  %v2865_v37 = vpop.eup %2864  ;;  %v4468_v30 = vld [vmem:[#allocation14_spill] sm:$0xff]  ;;  %v4470_v62 = vld [vmem:[#allocation13_spill] sm:$0xff] }
 0x276   : > { %s4467_s0 = scalar_lea.sflag [#allocation3], %s3942_s13  ;;  %2874 = vpow2.f32 %v1661_v9  ;;  %v1633_v6 = vmul.f32 %v2865_v37, %v3873_v16  ;;  %v1634_v35 = vmul.f32 %v2865_v37, %v3877_v51  ;;  %v2867_v49 = vpop.eup %2866  ;;  %v1573_v58 = vpop.xlane.xlu0 %1572  ;;  %s4164_s1 = scalar_lea.vmem [#allocation4], %s3951_s17 }
 0x277   : > { %2606 = dma.vmem_to_hbm [thread:$0]  (%p3203_p5), %s4127_s24, 2048, %s4125_s25, %s4467_s0, %s4391_s10, %s4391_s10, %s3114_s26   ;;  %v1667_v46 = vmul.f32 1.442695, %v1631_v17  ;;  %v1669_v61 = vmul.f32 1.442695, %v1632_v38  ;;  %2876 = vrcp.f32 %v1564_v27  ;;  %v2869_v22 = vpop.eup %2868 }
 0x278   : > { %v1671_v1 = vmul.f32 1.442695, %v1633_v6  ;;  %v1673_v4 = vmul.f32 1.442695, %v1634_v35  ;;  %v2871_v3 = vpop.eup %2870  ;;  %v2539_v50 = vpack.c.bf16 %v2869_v22, %v2867_v49  ;;  %v4471_v6 = vld [vmem:[#allocation15_spill] sm:$0xff]  ;;  %v4472_v49 = vld [vmem:[#allocation16_spill] sm:$0xff]  ;;  %s4210_s23 = scalar_lea.hbm %s4347_s8, %s4107_s21 }
 0x279   : > { %2878 = vpow2.f32 %v1667_v46  ;;  %v1567_v43 = vpop.xlane.xlu1 %1566  ;;  %v1635_v10 = vmul.f32 %v2871_v3, %v3883_v39  ;;  %v1636_v16 = vmul.f32 %v2871_v3, %v3887_v60  ;;  %s2197_s17 = sshll.u32 %s4012_s20, 4  ;;  %s3115_s22 = smov [#allocation7]   ;;  %s4212_s17 = int_to_ptr.vmem [resolvable:$true] %s2197_s17 }
 0x27a   : > { %2880 = vpow2.f32 %v1669_v61  ;;  %1820 = vst [vmem:[%s4164_s1 + $0x8] sm:$0xff] %v2539_v50  ;;  %v1579_v15 = vpop.xlane.xlu0 %1578  ;;  %s2982_s12 = scalar_lea.vmem %s4212_s17, 2048  ;;  %s2986_s0 = sshll.u32 %s3115_s22, 4  ;;  %s2987_s0 = int_to_ptr.vmem [resolvable:$false] %s2986_s0 }
 0x27b   : > { %2882 = vrcp.f32 %v1567_v43  ;;  %v1675_v33 = vmul.f32 1.442695, %v1635_v10  ;;  %v1677_v53 = vmul.f32 1.442695, %v1636_v16  ;;  %p2983_p1 = scmp.ne.s32.totalorder %s4212_s17, %s2982_s12  ;;  %s2988_s24 = scalar_lea.vmem %s2987_s0, 4096 }
 0x27c   : > { %2884 = vpow2.f32 %v1671_v1  ;;  %p2989_p4 = scmp.lt.s32.totalorder %s4212_s17, %s2987_s0  ;;  %p2990_p7 = scmp.lt.s32.totalorder %s2988_s24, %s2982_s12 }
 0x27d   : > { %v1570_v40 = vpop.xlane.xlu1 %1569  ;;  %2886 = vpow2.f32 %v1673_v4  ;;  %v4473_v4 = vld [vmem:[#allocation17_spill] sm:$0xff]  ;;  %p2984_p2 = pnand %p2983_p1, %p3203_p5 }
 0x27e   : > { %2888 = vrcp.f32 %v1573_v58  ;;  %p2991_p8 = por %p2990_p7, %p2989_p4 }
 0x27f   : > { %v2873_v36 = vpop.eup %2872  ;;  %2890 = vrcp.f32 %v1570_v40  ;;  %p2985_p3 = pneg %p2984_p2 }
 0x280   : > { %v2875_v51 = vpop.eup %2874  ;;  %2892 = vpow2.f32 %v1675_v33  ;;  %v4474_v33 = vld [vmem:[#allocation18_spill] sm:$0xff] }
 0x281   : > { %v2877_v42 = vpop.eup %2876  ;;  %v2538_v12 = vpack.c.bf16 %v2875_v51, %v2873_v36  ;;  %v1576_v55 = vpop.xlane.xlu1 %1575  ;;  %2894 = vpow2.f32 %v1677_v53  ;;  %p2992_p9 = pnand %p2991_p8, %p2985_p3 }
 0x282   : > { %v1637_v47 = vmul.f32 %v2877_v42, %v3891_v45  ;;  %v1638_v39 = vmul.f32 %v2877_v42, %v3895_v7  ;;  %2896 = vrcp.f32 %v1576_v55  ;;  %v1585_v57 = vpop.xlane.xlu0 %1584  ;;  %v4475_v42 = vld [vmem:[#allocation19_spill] sm:$0xff] }
 0x283   : > { %v2879_v60 = vpop.eup %2878  ;;  %1819 = vst [vmem:[%s4164_s1] sm:$0xff] %v2538_v12  ;;  %2898 = vrcp.f32 %v1579_v15  ;;  %v4476_v15 = vld [vmem:[#allocation20_spill] sm:$0xff] }
 0x284   : > { %v2881_v48 = vpop.eup %2880  ;;  %v1679_v56 = vmul.f32 1.442695, %v1637_v47  ;;  %v1681_v14 = vmul.f32 1.442695, %v1638_v39 }
 0x285   : > { %v2883_v31 = vpop.eup %2882  ;;  %v2540_v29 = vpack.c.bf16 %v2881_v48, %v2879_v60  ;;  %v1582_v34 = vpop.xlane.xlu1 %1581 }
 0x286   : > { %2900 = vpow2.f32 %v1679_v56  ;;  %v1639_v26 = vmul.f32 %v2883_v31, %v3899_v20  ;;  %v1640_v45 = vmul.f32 %v2883_v31, %v3903_v23  ;;  %v2885_v18 = vpop.eup %2884  ;;  %v4469_v20 = vld [vmem:[#allocation12_spill] sm:$0xff] }
 0x287   : > { %1821 = vst [vmem:[%s4164_s1 + $0x10] sm:$0xff] %v2540_v29  ;;  %2902 = vpow2.f32 %v1681_v14  ;;  %v2887_v7 = vpop.eup %2886  ;;  %v4477_v29 = vld [vmem:[#allocation21_spill] sm:$0xff] }
 0x288   : > { %v1683_v0 = vmul.f32 1.442695, %v1639_v26  ;;  %v1685_v13 = vmul.f32 1.442695, %v1640_v45  ;;  %v2889_v25 = vpop.eup %2888  ;;  %v2541_v32 = vpack.c.bf16 %v2887_v7, %v2885_v18  ;;  %2904 = vrcp.f32 %v1582_v34 }
 0x289   : > { %v2891_v19 = vpop.eup %2890  ;;  %v1643_v41 = vmul.f32 %v2889_v25, %v3913_v44  ;;  %v1644_v24 = vmul.f32 %v2889_v25, %v4468_v30  ;;  %v1588_v58 = vpop.xlane.xlu1 %1587 }
 0x28a   : > { %2906 = vpow2.f32 %v1683_v0  ;;  %1822 = vst [vmem:[%s4164_s1 + $0x18] sm:$0xff] %v2541_v32  ;;  %v1641_v23 = vmul.f32 %v2891_v19, %v4469_v20  ;;  %v1642_v63 = vmul.f32 %v2891_v19, %v4470_v62  ;;  %v2893_v59 = vpop.eup %2892  ;;  %v1591_v55 = vpop.xlane.xlu0 %1590  ;;  %v4478_v20 = vld [vmem:[#allocation22_spill] sm:$0xff]  ;;  %v4479_v62 = vld [vmem:[#allocation23_spill] sm:$0xff] }
 0x28b   : > { %2908 = vpow2.f32 %v1685_v13  ;;  %v1691_v52 = vmul.f32 1.442695, %v1643_v41  ;;  %v1693_v9 = vmul.f32 1.442695, %v1644_v24  ;;  %v2895_v17 = vpop.eup %2894 }
 0x28c   : > { %v1687_v38 = vmul.f32 1.442695, %v1641_v23  ;;  %v1689_v27 = vmul.f32 1.442695, %v1642_v63  ;;  %2910 = vrcp.f32 %v1585_v57  ;;  %v2897_v46 = vpop.eup %2896  ;;  %v2542_v61 = vpack.c.bf16 %v2895_v17, %v2893_v59 }
 0x28d   : > { %2912 = vpow2.f32 %v1691_v52  ;;  %v2899_v44 = vpop.eup %2898  ;;  %v1645_v37 = vmul.f32 %v2897_v46, %v3923_v5  ;;  %v1646_v35 = vmul.f32 %v2897_v46, %v4471_v6  ;;  %v1594_v45 = vpop.xlane.xlu1 %1593 }
 0x28e   : > { %2914 = vpow2.f32 %v1693_v9  ;;  %1823 = vst [vmem:[%s4164_s1 + $0x20] sm:$0xff] %v2542_v61  ;;  %v1647_v1 = vmul.f32 %v2899_v44, %v4472_v49  ;;  %v1648_v22 = vmul.f32 %v2899_v44, %v4473_v4  ;;  %v4480_v49 = vld [vmem:[#allocation24_spill] sm:$0xff]  ;;  %v4481_v4 = vld [vmem:[#allocation25_spill] sm:$0xff] }
 0x28f   : > { %2916 = vpow2.f32 %v1687_v38  ;;  %v1695_v50 = vmul.f32 1.442695, %v1645_v37  ;;  %v1697_v40 = vmul.f32 1.442695, %v1646_v35 }
 0x290   : > { %v2901_v43 = vpop.eup %2900  ;;  %2918 = vpow2.f32 %v1689_v27  ;;  %v1699_v16 = vmul.f32 1.442695, %v1647_v1  ;;  %v1701_v36 = vmul.f32 1.442695, %v1648_v22 }
 0x291   : > { %v2903_v3 = vpop.eup %2902  ;;  %2920 = vrcp.f32 %v1588_v58  ;;  %v1078_v41 = vpop.permute.xlu0 %1077 }
 0x292   : > { %v2543_v10 = vpack.c.bf16 %v2903_v3, %v2901_v43  ;;  %v2905_v5 = vpop.eup %2904  ;;  %2922 = vpow2.f32 %v1695_v50  ;;  %v1083_v30 = vpop.permute.xlu1 %1082  ;;  %v1116_v59 = vmul.f32 %v1078_v41, %v4078_v8  ;;  %v1117_v9 = vmul.f32 %v1078_v41, %v4082_v28 }
 0x293   : > { %2924 = vpow2.f32 %v1697_v40  ;;  %v1649_v53 = vmul.f32 %v2905_v5, %v4474_v33  ;;  %v1650_v12 = vmul.f32 %v2905_v5, %v4475_v42  ;;  %v1118_v57 = vmul.f32 %v1083_v30, %v4086_v21 }
 0x294   : > { %v2907_v51 = vpop.eup %2906  ;;  %1824 = vst [vmem:[%s4164_s1 + $0x28] sm:$0xff] %v2543_v10  ;;  %2926 = vpow2.f32 %v1699_v16  ;;  %v1119_v17 = vmul.f32 %v1083_v30, %v4089_v54  ;;  %v2535_v37 = vpack.c.bf16 %v1117_v9, %v1116_v59  ;;  %v4482_v10 = vld [vmem:[#allocation26_spill] sm:$0xff] }
 0x295   : > { %v2909_v47 = vpop.eup %2908  ;;  %2928 = vpow2.f32 %v1701_v36  ;;  %v1703_v60 = vmul.f32 1.442695, %v1649_v53  ;;  %v1705_v48 = vmul.f32 1.442695, %v1650_v12  ;;  %v1088_v8 = vpop.permute.xlu0 %1087  ;;  %v4483_v36 = vld [vmem:[#allocation38_spill] sm:$0xff] }
 0x296   : > { %v2544_v39 = vpack.c.bf16 %v2909_v47, %v2907_v51  ;;  %v2911_v56 = vpop.eup %2910  ;;  %2930 = vrcp.f32 %v1591_v55  ;;  %v2536_v6 = vpack.c.bf16 %v1119_v17, %v1118_v57  ;;  %v1120_v21 = vmul.f32 %v1088_v8, %v4112_v2  ;;  %1231 = vst [vmem:[%s4012_s20 + $0x68] sm:$0xff] %v2535_v37 }
 0x297   : > { %v2913_v14 = vpop.eup %2912  ;;  %2932 = vpow2.f32 %v1703_v60  ;;  %v1651_v31 = vmul.f32 %v2911_v56, %v4476_v15  ;;  %v1652_v26 = vmul.f32 %v2911_v56, %v4477_v29  ;;  %v1121_v54 = vmul.f32 %v1088_v8, %v4115_v11 }
 0x298   : > { %1825 = vst [vmem:[%s4164_s1 + $0x30] sm:$0xff] %v2544_v39  ;;  %v2915_v18 = vpop.eup %2914  ;;  %2934 = vpow2.f32 %v1705_v48  ;;  %1232 = vst [vmem:[%s4012_s20 + $0x70] sm:$0xff] %v2536_v6 }
 0x299   : > { %v2917_v7 = vpop.eup %2916  ;;  %v2546_v0 = vpack.c.bf16 %v2915_v18, %v2913_v14  ;;  %v1707_v13 = vmul.f32 1.442695, %v1651_v31  ;;  %v1709_v34 = vmul.f32 1.442695, %v1652_v26  ;;  %2936 = vrcp.f32 %v1594_v45 }
 0x29a   : > { %v2919_v25 = vpop.eup %2918  ;;  %v2537_v3 = vpack.c.bf16 %v1121_v54, %v1120_v21 }
 0x29b   : > { %v2921_v32 = vpop.eup %2920  ;;  %1827 = vst [vmem:[%s4164_s1 + $0x40] sm:$0xff] %v2546_v0  ;;  %v2545_v19 = vpack.c.bf16 %v2919_v25, %v2917_v7  ;;  %2938 = vpow2.f32 %v1707_v13 }
 0x29c   : > { %v2923_v24 = vpop.eup %2922  ;;  %2940 = vpow2.f32 %v1709_v34  ;;  %v1653_v23 = vmul.f32 %v2921_v32, %v4478_v20  ;;  %v1654_v63 = vmul.f32 %v2921_v32, %v4479_v62  ;;  %1233 = vst [vmem:[%s4012_s20 + $0x78] sm:$0xff] %v2537_v3 }
 0x29d   : > { %v2925_v52 = vpop.eup %2924  ;;  %1826 = vst [vmem:[%s4164_s1 + $0x38] sm:$0xff] %v2545_v19 }
 0x29e   : > { %v2927_v38 = vpop.eup %2926  ;;  %v2547_v27 = vpack.c.bf16 %v2925_v52, %v2923_v24  ;;  %v1711_v46 = vmul.f32 1.442695, %v1653_v23  ;;  %v1713_v61 = vmul.f32 1.442695, %v1654_v63 }
 0x29f   : > { %v2929_v44 = vpop.eup %2928 }
 0x2a0   : > { %v2931_v35 = vpop.eup %2930  ;;  %1828 = vst [vmem:[%s4164_s1 + $0x48] sm:$0xff] %v2547_v27  ;;  %v2548_v28 = vpack.c.bf16 %v2929_v44, %v2927_v38  ;;  %2942 = vpow2.f32 %v1711_v46 }
 0x2a1   : > { %v2933_v43 = vpop.eup %2932  ;;  %2944 = vpow2.f32 %v1713_v61  ;;  %v1655_v1 = vmul.f32 %v2931_v35, %v4480_v49  ;;  %v1656_v22 = vmul.f32 %v2931_v35, %v4481_v4 }
 0x2a2   : > { %v2935_v58 = vpop.eup %2934  ;;  %1829 = vst [vmem:[%s4164_s1 + $0x50] sm:$0xff] %v2548_v28 }
 0x2a3   : > { %v2937_v2 = vpop.eup %2936  ;;  %v2549_v11 = vpack.c.bf16 %v2935_v58, %v2933_v43  ;;  %v1715_v50 = vmul.f32 1.442695, %v1655_v1  ;;  %v1717_v40 = vmul.f32 1.442695, %v1656_v22 }
 0x2a4   : > { %v1657_v16 = vmul.f32 %v2937_v2, %v4482_v10  ;;  %v1658_v5 = vmul.f32 %v2937_v2, %v4483_v36 }
 0x2a5   : > { %v2939_v51 = vpop.eup %2938  ;;  %1830 = vst [vmem:[%s4164_s1 + $0x58] sm:$0xff] %v2549_v11  ;;  %2946 = vpow2.f32 %v1715_v50 }
 0x2a6   : > { %2995 = shalt.err (!%p2992_p9)
}
 0x2a7   : > { %s2996_s20 = scalar_lea.hbm %s4210_s23, 2048  ;;  %s3000_s22 = scalar_lea.hbm %s4347_s8, 4096 }
 0x2a8   : > { %p2997_p10 = scmp.ne.s32.totalorder %s4210_s23, %s2996_s20  ;;  %p3001_p13 = scmp.lt.u32.totalorder %s4210_s23, %s4347_s8 }
 0x2a9   : > { %p3002_p0 = scmp.lt.u32.totalorder %s3000_s22, %s2996_s20  ;;  %p3004_p2 = scmp.lt.u32.totalorder %s2996_s20, %s4210_s23 }
 0x2aa   : > { %p2998_p11 = pnand %p2997_p10, %p3203_p5 }
 0x2ab   : > { %p3003_p1 = por %p3002_p0, %p3001_p13 }
 0x2ac   : > { %p2999_p12 = pneg %p2998_p11 }
 0x2ad   : > { %p3005_p3 = por %p3004_p2, %p3003_p1 }
 0x2af   : > { %p3006_p4 = pnand %p3005_p3, %p2999_p12 }
 0x2b1   : > { %3009 = shalt.err (!%p3006_p4)
}
 0x2b2   : > { %s4484_s12 = smov 128   ;;  %s4485_s24 = scalar_lea.sflag [#allocation8], %s3942_s13  ;;  %v2941_v33 = vpop.eup %2940  ;;  %2948 = vpow2.f32 %v1717_v40  ;;  %v1719_v53 = vmul.f32 1.442695, %v1657_v16  ;;  %v1721_v42 = vmul.f32 1.442695, %v1658_v5 }
 0x2b3   : > { %2609 = dma.vmem_to_hbm [thread:$0]  (%p3203_p5), %s4212_s17, 2048, %s4210_s23, %s4485_s24, %s4484_s12, %s4484_s12, %s3114_s26   ;;  %v2550_v12 = vpack.c.bf16 %v2941_v33, %v2939_v51  ;;  %v2943_v55 = vpop.eup %2942 }
 0x2b4   : > { %2950 = vpow2.f32 %v1719_v53  ;;  %v2945_v47 = vpop.eup %2944  ;;  %s2121_s13 = sand.u32 1, %s3184_s9   ;;  %s2163_s10 = sshll.u32 %s4164_s1, 4  ;;  %s4257_s10 = int_to_ptr.vmem [resolvable:$true] %s2163_s10 }
 0x2b5   : > { %1831 = vst [vmem:[%s4164_s1 + $0x60] sm:$0xff] %v2550_v12  ;;  %2952 = vpow2.f32 %v1721_v42  ;;  %v2551_v39 = vpack.c.bf16 %v2945_v47, %v2943_v55  ;;  %v2947_v60 = vpop.eup %2946  ;;  %s2180_s17 = sshll.u32 %s3960_s19, 4  ;;  %s4255_s20 = scalar_lea.hbm %s4345_s6, %s4107_s21  ;;  %s4265_s17 = int_to_ptr.vmem [resolvable:$true] %s2180_s17 }
 0x2b6   : > { %s4263_s9 = scalar_lea.hbm %s4346_s7, %s4107_s21  ;;  %s4268_s19 = scalar_lea.sflag [#allocation5], %s2121_s13 }
 0x2b7   : > { %1832 = vst [vmem:[%s4164_s1 + $0x68] sm:$0xff] %v2551_v39  ;;  %s3010_s0 = scalar_lea.vmem %s4257_s10, 2048  ;;  %s3116_s24 = smov [#allocation4]  }
 0x2b8   : > { %p3011_p7 = scmp.ne.s32.totalorder %s4257_s10, %s3010_s0  ;;  %s3014_s23 = sshll.u32 %s3116_s24, 4  ;;  %s3015_s23 = int_to_ptr.vmem [resolvable:$false] %s3014_s23 }
 0x2b9   : > { %s3016_s18 = scalar_lea.vmem %s3015_s23, 4096  ;;  %p3017_p10 = scmp.lt.s32.totalorder %s4257_s10, %s3015_s23 }
 0x2ba   : > { %p3012_p8 = pnand %p3011_p7, %p3203_p5  ;;  %p3018_p11 = scmp.lt.s32.totalorder %s3016_s18, %s3010_s0 }
 0x2bc   : > { %v2949_v48 = vpop.eup %2948  ;;  %p3013_p9 = pneg %p3012_p8  ;;  %p3019_p12 = por %p3018_p11, %p3017_p10 }
 0x2bd   : > { %v2552_v56 = vpack.c.bf16 %v2949_v48, %v2947_v60 }
 0x2be   : > { %v2951_v14 = vpop.eup %2950  ;;  %p3020_p13 = pnand %p3019_p12, %p3013_p9 }
 0x2bf   : > { %v2953_v15 = vpop.eup %2952  ;;  %1833 = vst [vmem:[%s4164_s1 + $0x70] sm:$0xff] %v2552_v56 }
 0x2c0   : > { %v2553_v31 = vpack.c.bf16 %v2953_v15, %v2951_v14 }
 0x2c2   : > { %1834 = vst [vmem:[%s4164_s1 + $0x78] sm:$0xff] %v2553_v31 }
 0x2c3   : > { %3023 = shalt.err (!%p3020_p13)
}
 0x2c4   : > { %s3024_s21 = scalar_lea.hbm %s4255_s20, 2048  ;;  %s3028_s25 = scalar_lea.hbm %s4345_s6, 4096 }
 0x2c5   : > { %p3025_p0 = scmp.ne.s32.totalorder %s4255_s20, %s3024_s21  ;;  %p3029_p3 = scmp.lt.u32.totalorder %s4255_s20, %s4345_s6 }
 0x2c6   : > { %p3030_p4 = scmp.lt.u32.totalorder %s3028_s25, %s3024_s21  ;;  %p3032_p8 = scmp.lt.u32.totalorder %s3024_s21, %s4255_s20 }
 0x2c7   : > { %p3026_p1 = pnand %p3025_p0, %p3203_p5 }
 0x2c8   : > { %p3031_p7 = por %p3030_p4, %p3029_p3 }
 0x2c9   : > { %p3027_p2 = pneg %p3026_p1 }
 0x2ca   : > { %p3033_p9 = por %p3032_p8, %p3031_p7 }
 0x2cc   : > { %p3034_p10 = pnand %p3033_p9, %p3027_p2 }
 0x2ce   : > { %3037 = shalt.err (!%p3034_p10)
}
 0x2cf   : > { %2607 = dma.vmem_to_hbm [thread:$0]  (%p3203_p5), %s4257_s10, 2048, %s4255_s20, %s4268_s19, %s4484_s12, %s4484_s12, %s3114_s26  }
 0x2d0   : > { %s3038_s0 = scalar_lea.vmem %s4265_s17, 2048  ;;  %s3117_s23 = smov [#allocation6]  }
 0x2d1   : > { %p3039_p11 = scmp.ne.s32.totalorder %s4265_s17, %s3038_s0  ;;  %s3042_s18 = sshll.u32 %s3117_s23, 4  ;;  %s3043_s18 = int_to_ptr.vmem [resolvable:$false] %s3042_s18 }
 0x2d2   : > { %s3044_s21 = scalar_lea.vmem %s3043_s18, 4096  ;;  %p3045_p0 = scmp.lt.s32.totalorder %s4265_s17, %s3043_s18 }
 0x2d3   : > { %p3040_p12 = pnand %p3039_p11, %p3203_p5  ;;  %p3046_p1 = scmp.lt.s32.totalorder %s3044_s21, %s3038_s0 }
 0x2d5   : > { %p3041_p13 = pneg %p3040_p12  ;;  %p3047_p2 = por %p3046_p1, %p3045_p0 }
 0x2d7   : > { %p3048_p3 = pnand %p3047_p2, %p3041_p13 }
 0x2d9   : > { %3051 = shalt.err (!%p3048_p3)
}
 0x2da   : > { %s3052_s10 = scalar_lea.hbm %s4263_s9, 2048  ;;  %s3056_s13 = scalar_lea.hbm %s4346_s7, 4096 }
 0x2db   : > { %p3053_p4 = scmp.ne.s32.totalorder %s4263_s9, %s3052_s10  ;;  %p3057_p9 = scmp.lt.u32.totalorder %s4263_s9, %s4346_s7 }
 0x2dc   : > { %p3058_p10 = scmp.lt.u32.totalorder %s3056_s13, %s3052_s10  ;;  %p3060_p12 = scmp.lt.u32.totalorder %s3052_s10, %s4263_s9 }
 0x2dd   : > { %p3054_p7 = pnand %p3053_p4, %p3203_p5 }
 0x2de   : > { %p3059_p11 = por %p3058_p10, %p3057_p9 }
 0x2df   : > { %p3055_p8 = pneg %p3054_p7 }
 0x2e0   : > { %p3061_p13 = por %p3060_p12, %p3059_p11 }
 0x2e2   : > { %p3062_p0 = pnand %p3061_p13, %p3055_p8 }
 0x2e4   : > { %3065 = shalt.err (!%p3062_p0)
}
 0x2e5   : > { %2608 = dma.vmem_to_hbm [thread:$0]  (%p3203_p5), %s4265_s17, 2048, %s4263_s9, %s4268_s19, %s4484_s12, %s4484_s12, %s3114_s26  }
 0x2e6 PF: > { %p2627_p1 = scmp.ge.s32.totalorder %s3108_s30, 2  ;;  %s2212_s24 = sand.u32 1, %s3096_s27  }
 0x2e7   : > { %s2213_s0 = scalar_lea.sflag [#allocation3], %s2212_s24 }
 0x2e8   : > { %p2615_p2 = pnand %p2627_p1, %p3207_p6 }
 0x2ea   : > { %3083 = dma.done.wait (!%p2615_p2), %s2213_s0, 2048  }
 0x2eb   : > { %3085 = vsyncadd (!%p2615_p2), %s2213_s0, 4294965248  ;;  %s4486_s15 = sadd.s32 4294967294, %s3108_s30  }
 0x2ec   : > { %s2221_s23 = sand.u32 1, %s4486_s15  }
 0x2ed   : > { %s2222_s18 = scalar_lea.sflag [#allocation5], %s2221_s23 }
 0x2ee   : > { %3087 = dma.done.wait (!%p2615_p2), %s2222_s18, 4096  }
 0x2ef   : > { %3089 = vsyncadd (!%p2615_p2), %s2222_s18, 4294963200  ;;  %s2240_s21 = scalar_lea.sflag [#allocation8], %s2212_s24 }
 0x2f0   : > { %3091 = dma.done.wait (!%p2615_p2), %s2240_s21, 2048  }
 0x2f1   : > { %3093 = vsyncadd (!%p2615_p2), %s2240_s21, 4294965248  ;;  %p25_p5 = scmp.ge.s32.totalorder %s3188_s11, 4   ;;  %s4487_s27 = smov %s3100_s28 }
 0x2f2   : > { %s4488_s28 = smov %s3104_s29  ;;  %s4489_s29 = smov %s3201_s14 }
 0x2f3   : > { %s4490_s30 = smov %s3188_s11  ;;  %27 = sbr.rel (!%p25_p5) target bundleno = 10 (0xa), region = 127 }
 0x2fa   :  { %2245 = vsyncpa [#allocation3], 1 }
 0x2fb   :  { %2247 = vsyncpa [#allocation3 + $0x1], 1 }
 0x2fc   :  { %2248 = vsyncpa [#allocation5], 1 }
 0x2fd   :  { %2250 = vsyncpa [#allocation5 + $0x1], 1 }
 0x2fe   :  { %2251 = vsyncpa [#allocation8], 1 }
 0x2ff   :  { %2253 = vsyncpa [#allocation8 + $0x1], 1 }

// kernel: _zinb_fused.1
= control target key start
LH: loop header
LB: loop body
LE: loop exit
PB: predicated region body
PF: predicated region fallthrough
CT: control target
= control target key end

     0   :  { %s4339_s0 = inlined_call_operand.vmem [shape: f32[256,32], index: 0, kind: input, shape index: {}]   ;;  %s4340_s1 = inlined_call_operand.vmem [shape: f32[32,256], index: 1, kind: input, shape index: {}]   ;;  %s4341_s2 = inlined_call_operand.vmem [shape: f32[32,256], index: 2, kind: input, shape index: {}]   ;;  %s4342_s3 = inlined_call_operand.vmem [shape: f32[32,256], index: 3, kind: input, shape index: {}]   ;;  %s4343_s4 = inlined_call_operand.vmem [shape: f32[256,1], index: 4, kind: input, shape index: {}]   ;;  %s4344_s5 = inlined_call_operand.hbm [shape: bf16[256,256], index: 5, kind: output, shape index: {0}]   ;;  %s4345_s6 = inlined_call_operand.hbm [shape: bf16[256,256], index: 6, kind: output, shape index: {1}]   ;;  %s4346_s7 = inlined_call_operand.hbm [shape: bf16[256,256], index: 7, kind: output, shape index: {2}]   ;;  %s4347_s8 = inlined_call_operand.hbm [shape: bf16[256,256], index: 8, kind: output, shape index: {3}]  }
   0x1   :  { %4393 = sst [smem:[#allocation39_spill]] %s4339_s0 }
   0x2   :  { %4394 = sst [smem:[#allocation40_spill]] %s4340_s1 }
   0x3   :  { %14 = vsyncpa [#allocation3], 0 }
   0x4   :  { %16 = vsyncpa [#allocation3 + $0x1], 0 }
   0x5   :  { %17 = vsyncpa [#allocation5], 0 }
   0x6   :  { %19 = vsyncpa [#allocation5 + $0x1], 0 }
   0x7   :  { %20 = vsyncpa [#allocation8], 0 }
   0x8   :  { %22 = vsyncpa [#allocation8 + $0x1], 0  ;;  %s3163_s27 = smov 0   ;;  %s3165_s28 = smov 0  }
   0x9   :  { %s3167_s29 = smov 0   ;;  %s3169_s30 = smov 0  }
   0xa LB: > { %s3184_s9 = sadd.s32 4294967295, %s3108_s30   ;;  %s4390_s10 = sadd.s32 4294967294, %s3108_s30   ;;  %s3108_s30 = sphi %s3169_s30, %s4490_s30   ;;  %s3104_s29 = sphi %s3167_s29, %s4489_s29   ;;  %s3100_s28 = sphi %s3165_s28, %s4488_s28   ;;  %s3096_s27 = sphi %s3163_s27, %s4487_s27  }
   0xb   : > { %s3188_s11 = sadd.s32 1, %s3108_s30   ;;  %s150_s12 = sadd.s32 1, %s3104_s29 }
   0xc   : > { %s147_s13 = ssub.s32 %s3108_s30, %s3188_s11  ;;  %p160_p0 = scmp.ne.s32.totalorder %s3104_s29, %s3100_s28 }
   0xd   : > { %p148_p1 = scmp.eq.s32.totalorder %s147_s13, 0  ;;  %p161_p2 = scmp.eq.s32.totalorder %s3184_s9, 1 }
   0xe   : > { %p166_p3 = scmp.ne.s32.totalorder %s3100_s28, %s3096_s27  ;;  %p167_p4 = scmp.eq.s32.totalorder %s4390_s10, 1 }
   0xf   : > { %s3201_s14 = scalar_select %p148_p1, %s3104_s29, %s150_s12  }
  0x10   : > { %p3203_p5 = por %p161_p2, %p160_p0  ;;  %p3207_p6 = por %p167_p4, %p166_p3 }
  0x11   : > { %p2367_p7 = scmp.ge.s32.totalorder %s3108_s30, 1  ;;  %p290_p8 = scmp.lt.s32.totalorder %s3108_s30, 3 }
  0x13   : > { %p291_p9 = pnand %p2367_p7, %p290_p8 }
  0x15   : > { %294 = sbr.rel (%p291_p9) target bundleno = 742 (0x2e6), region = 40 }
  0x1c   : > { %s4397_s1 = sld [smem:[#allocation40_spill]]  ;;  %s2372_s23 = sshll.u32 %s3184_s9, 4  ;;  %v3110_v7 = vmov 0.0   ;;  %v1235_v12 = vld [vmem:[%s4341_s2 + $0x8] sm:$0xff]  ;;  %v3111_v13 = vmov 0   ;;  %v1237_v14 = vld [vmem:[%s4341_s2 + $0x18] sm:$0xff] }
  0x1d   : > { %497 = vmatprep.mubr.f32.mxu0 %v3110_v7  ;;  %545 = vmatprep.mubr.f32.mxu1 %v3110_v7  ;;  %p345_p10 = scmp.lt.s32.totalorder %s2372_s23, 31  ;;  %v2586_v16 = vpack.c.bf16 %v1237_v14, %v1235_v12  ;;  %v1234_v17 = vld [vmem:[%s4341_s2] sm:$0xff]  ;;  %v1236_v18 = vld [vmem:[%s4341_s2 + $0x10] sm:$0xff]  ;;  %s4398_s0 = sld [smem:[#allocation39_spill]]  ;;  %v1239_v19 = vld [vmem:[%s4341_s2 + $0x28] sm:$0xff]  ;;  %vm384_vm0 = vcmask 261120  }
  0x1e   : > { %2665 = vset.pattern.permute.xlu1 %v3111_v13  ;;  %2664 = vset.pattern.permute.xlu0 %v3111_v13  ;;  %v1241_v20 = vld [vmem:[%s4341_s2 + $0x38] sm:$0xff]  ;;  %v2588_v23 = vpack.c.bf16 %v1236_v18, %v1234_v17  ;;  %v1238_v25 = vld [vmem:[%s4341_s2 + $0x20] sm:$0xff]  ;;  %v1240_v26 = vld [vmem:[%s4341_s2 + $0x30] sm:$0xff]  ;;  %s3942_s13 = sand.u32 1, %s3100_s28   ;;  %s4107_s21 = sshll.u32 %s3184_s9, 11 }
  0x1f   : > { %s4492_s23 = smov (!%p345_p10, %s2372_s23), 31  ;;  %v2590_v24 = vpack.c.bf16 %v1241_v20, %v1239_v19  ;;  %v2592_v31 = vpack.c.bf16 %v1240_v26, %v1238_v25  ;;  %v1836_v12 = vld [vmem:[%s4342_s3 + $0x8] sm:$0xff]  ;;  %v1838_v13 = vld [vmem:[%s4342_s3 + $0x18] sm:$0xff]  ;;  %v1835_v14 = vld [vmem:[%s4342_s3] sm:$0xff]  ;;  %s3951_s17 = sshll.u32 %s3942_s13, 7 }
  0x20   : > { %s2373_s12 = sshll.u32 %s4492_s23, 3  ;;  %v1840_v17 = vld [vmem:[%s4342_s3 + $0x28] sm:$0xff]  ;;  %v1842_v18 = vld [vmem:[%s4342_s3 + $0x38] sm:$0xff]  ;;  %s3960_s19 = scalar_lea.vmem [#allocation6], %s3951_s17 }
  0x21   : > { %s3272_s18 = scalar_lea.vmem %s4343_s4, %s2373_s12  ;;  %v2598_v20 = vpack.c.bf16 %v1842_v18, %v1840_v17  ;;  %s4012_s20 = scalar_lea.vmem [#allocation7], %s3951_s17 }
  0x22   : > { %v377_v0 = vld [vmem:[%s4397_s1 + $0x8] sm:$0xff]  ;;  %v379_v1 = vld [vmem:[%s4397_s1 + $0x18] sm:$0xff]  ;;  %v376_v2 = vld [vmem:[%s4397_s1] sm:$0xff]  ;;  %s4125_s25 = scalar_lea.hbm %s4344_s5, %s4107_s21 }
  0x23   : > { %v2578_v3 = vpack.c.bf16 %v379_v1, %v377_v0  ;;  %v378_v4 = vld [vmem:[%s4397_s1 + $0x10] sm:$0xff]  ;;  %v381_v5 = vld [vmem:[%s4397_s1 + $0x28] sm:$0xff]  ;;  %v383_v6 = vld [vmem:[%s4397_s1 + $0x38] sm:$0xff]  ;;  %s3255_s22 = scalar_lea.vmem %s4398_s0, %s2373_s12  ;;  %s3112_s12 = smov [#allocation2]  }
  0x24   : > { %v2580_v8 = vpack.c.bf16 %v378_v4, %v376_v2  ;;  %v2582_v9 = vpack.c.bf16 %v383_v6, %v381_v5  ;;  %v380_v10 = vld [vmem:[%s4397_s1 + $0x20] sm:$0xff]  ;;  %v382_v11 = vld [vmem:[%s4397_s1 + $0x30] sm:$0xff]  ;;  %v3285_v27 = vld [vmem:[%s3255_s22 + $0x8] sm:$0xff] }
  0x25   : > { %2579 = vmatprep.subr.bf16.mxu0 %v2578_v3  ;;  %2602 = vmatprep.subr.bf16.mxu1 %v2578_v3  ;;  %v2584_v15 = vpack.c.bf16 %v382_v11, %v380_v10  ;;  %v3264_v21 = vld [vmem:[%s3255_s22] sm:$0xff]  ;;  %v3289_v28 = vld [vmem:[%s3255_s22 + $0x48] sm:$0xff]  ;;  %v965_v30 = vld [vmem:[%s3272_s18 + $0x18] sm:$0xff] }
  0x26   : > { %2581 = vmatpush1.bf16.msra.mxu0 %v2580_v8  ;;  %2604 = vmatpush1.bf16.msra.mxu1 %v2580_v8  ;;  %v3267_v22 = vld [vmem:[%s3255_s22 + $0x40] sm:$0xff]  ;;  %v963_v29 = vld [vmem:[%s3272_s18 + $0x8] sm:$0xff]  ;;  %v984_v33 = vmul.f32 1.442695, %v965_v30  ;;  %v964_v37 = vld [vmem:[%s3272_s18 + $0x10] sm:$0xff] }
  0x27   : > { %2583 = vmatprep.subr.bf16.mxu0 %v2582_v9  ;;  %2603 = vmatprep.subr.bf16.mxu1 %v2582_v9  ;;  %v980_v32 = vmul.f32 1.442695, %v963_v29  ;;  %v962_v34 = vld [vmem:[%s3272_s18] sm:$0xff]  ;;  %v3304_v38 = vld [vmem:[%s3255_s22 + $0x10] sm:$0xff]  ;;  %v982_v40 = vmul.f32 1.442695, %v964_v37 }
  0x28   : > { %v978_v35 = vmul.f32 1.442695, %v962_v34  ;;  %v966_v36 = vld [vmem:[%s3272_s18 + $0x20] sm:$0xff]  ;;  %v3307_v39 = vld [vmem:[%s3255_s22 + $0x50] sm:$0xff]  ;;  %v967_v42 = vld [vmem:[%s3272_s18 + $0x28] sm:$0xff] }
  0x29   : > { %2666 = vpow2.f32 %v980_v32  ;;  %v986_v41 = vmul.f32 1.442695, %v966_v36  ;;  %v968_v43 = vld [vmem:[%s3272_s18 + $0x30] sm:$0xff]  ;;  %v3318_v44 = vld [vmem:[%s3255_s22 + $0x18] sm:$0xff]  ;;  %v988_v46 = vmul.f32 1.442695, %v967_v42 }
  0x2a   : > { %2585 = vmatpush1.bf16.msra.mxu0 %v2584_v15  ;;  %2605 = vmatpush1.bf16.msra.mxu1 %v2584_v15  ;;  %2668 = vpow2.f32 %v984_v33  ;;  %v3321_v45 = vld [vmem:[%s3255_s22 + $0x58] sm:$0xff]  ;;  %v990_v47 = vmul.f32 1.442695, %v968_v43  ;;  %v970_v49 = vld [vmem:[%s3272_s18 + $0x40] sm:$0xff]  ;;  %v971_v55 = vld [vmem:[%s3272_s18 + $0x48] sm:$0xff]  ;;  %v2594_v15 = vpack.c.bf16 %v1838_v13, %v1836_v12 }
  0x2b   : > { %2587 = vmatprep.subr.bf16.mxu1 %v2586_v16  ;;  %2670 = vpow2.f32 %v978_v35  ;;  %v969_v48 = vld [vmem:[%s3272_s18 + $0x38] sm:$0xff]  ;;  %v3332_v50 = vld [vmem:[%s3255_s22 + $0x20] sm:$0xff]  ;;  %v994_v54 = vmul.f32 1.442695, %v970_v49  ;;  %v972_v57 = vld [vmem:[%s3272_s18 + $0x50] sm:$0xff] }
  0x2c   : > { %2672 = vpow2.f32 %v982_v40  ;;  %v3335_v51 = vld [vmem:[%s3255_s22 + $0x60] sm:$0xff]  ;;  %v992_v52 = vmul.f32 1.442695, %v969_v48  ;;  %v3346_v59 = vld [vmem:[%s3255_s22 + $0x28] sm:$0xff]  ;;  %v996_v61 = vmul.f32 1.442695, %v971_v55  ;;  %2595 = vmatprep.subr.bf16.mxu0 %v2594_v15 }
  0x2d   : > { %2376 = vmatmul.mubr.msk.f32.vlgmr.msra.gmra.mrb[0].mxu0 %vm384_vm0, %v3264_v21  ;;  %2384 = vmatmul.mubr.msk.f32.vlgmr.msra.gmra.mrb[0].mxu1 %vm384_vm0, %v3267_v22  ;;  %2674 = vpow2.f32 %v986_v41  ;;  %v3349_v60 = vld [vmem:[%s3255_s22 + $0x68] sm:$0xff]  ;;  %v998_v62 = vmul.f32 1.442695, %v972_v57  ;;  %v3358_v1 = vld [vmem:[%s3255_s22 + $0x30] sm:$0xff]  ;;  %v3370_v5 = vld [vmem:[%s3255_s22 + $0x38] sm:$0xff] }
  0x2e   : > { %2589 = vmatpush1.bf16.msra.mxu1 %v2588_v23  ;;  %503 = vmatprep.mubr.f32.mxu0 %v3110_v7  ;;  %2676 = vpow2.f32 %v988_v46  ;;  %v3361_v2 = vld [vmem:[%s3255_s22 + $0x70] sm:$0xff]  ;;  %v3373_v6 = vld [vmem:[%s3255_s22 + $0x78] sm:$0xff]  ;;  %v1839_v23 = vld [vmem:[%s4342_s3 + $0x20] sm:$0xff]  ;;  %s2958_s22 = sshll.u32 %s3112_s12, 4  ;;  %s2959_s22 = int_to_ptr.vmem [resolvable:$false] %s2958_s22 }
  0x2f   : > { %551 = vmatprep.mubr.f32.mxu1 %v3110_v7  ;;  %2591 = vmatprep.subr.bf16.mxu1 %v2590_v24  ;;  %2678 = vpow2.f32 %v990_v47  ;;  %v1837_v16 = vld [vmem:[%s4342_s3 + $0x10] sm:$0xff]  ;;  %s2960_s10 = scalar_lea.vmem %s2959_s22, 4096 }
  0x30   : > { %2680 = vpow2.f32 %v992_v52  ;;  %v2596_v19 = vpack.c.bf16 %v1837_v16, %v1835_v14  ;;  %v1841_v24 = vld [vmem:[%s4342_s3 + $0x30] sm:$0xff] }
  0x31   : > { %2377 = vmatmul.mubr.msk.f32.gmra.mrb[2].mxu0 %vm384_vm0, %v3285_v27  ;;  %2385 = vmatmul.mubr.msk.f32.gmra.mrb[2].mxu1 %vm384_vm0, %v3289_v28  ;;  %2682 = vpow2.f32 %v994_v54  ;;  %v2600_v25 = vpack.c.bf16 %v1841_v24, %v1839_v23 }
  0x32   : > { %509 = vmatprep.mubr.f32.mxu0 %v3110_v7  ;;  %557 = vmatprep.mubr.f32.mxu1 %v3110_v7  ;;  %2684 = vpow2.f32 %v996_v61 }
  0x33   : > { %2593 = vmatpush1.bf16.msra.mxu1 %v2592_v31  ;;  %v2667_v53 = vpop.eup %2666  ;;  %2686 = vpow2.f32 %v998_v62  ;;  %2597 = vmatpush1.bf16.msra.mxu0 %v2596_v19 }
  0x34   : > { %v2669_v56 = vpop.eup %2668  ;;  %1017 = vperm.xlu1 %2665, %v2667_v53   ;;  %2599 = vmatprep.subr.bf16.mxu0 %v2598_v20 }
  0x35   : > { %2378 = vmatmul.mubr.msk.f32.gmra.mrb[4].mxu0 %vm384_vm0, %v3304_v38  ;;  %2386 = vmatmul.mubr.msk.f32.gmra.mrb[4].mxu1 %vm384_vm0, %v3307_v39  ;;  %v2671_v58 = vpop.eup %2670 }
  0x36   : > { %515 = vmatprep.mubr.f32.mxu0 %v3110_v7  ;;  %563 = vmatprep.mubr.f32.mxu1 %v3110_v7  ;;  %v2673_v63 = vpop.eup %2672 }
  0x37   : > { %1012 = vperm.xlu0 %2664, %v2671_v58   ;;  %v2675_v0 = vpop.eup %2674  ;;  %2601 = vmatpush1.bf16.msra.mxu0 %v2600_v25 }
  0x38   : > { %1027 = vperm.xlu1 %2665, %v2669_v56   ;;  %v2677_v3 = vpop.eup %2676 }
  0x39   : > { %2379 = vmatmul.mubr.msk.f32.gmra.mrb[6].mxu0 %vm384_vm0, %v3318_v44  ;;  %2387 = vmatmul.mubr.msk.f32.gmra.mrb[6].mxu1 %vm384_vm0, %v3321_v45  ;;  %v2679_v4 = vpop.eup %2678 }
  0x3a   : > { %521 = vmatprep.mubr.f32.mxu0 %v3110_v7  ;;  %569 = vmatprep.mubr.f32.mxu1 %v3110_v7  ;;  %v2681_v8 = vpop.eup %2680 }
  0x3b   : > { %1022 = vperm.xlu0 %2664, %v2673_v63   ;;  %v2683_v9 = vpop.eup %2682 }
  0x3c   : > { %1032 = vperm.xlu1 %2665, %v2675_v0   ;;  %v2685_v10 = vpop.eup %2684 }
  0x3d   : > { %2380 = vmatmul.mubr.msk.f32.gmra.mrb[8].mxu0 %vm384_vm0, %v3332_v50  ;;  %2388 = vmatmul.mubr.msk.f32.gmra.mrb[8].mxu1 %vm384_vm0, %v3335_v51  ;;  %v2687_v11 = vpop.eup %2686 }
  0x3e   : > { %527 = vmatprep.mubr.f32.mxu0 %v3110_v7  ;;  %575 = vmatprep.mubr.f32.mxu1 %v3110_v7 }
  0x3f   : > { %1037 = vperm.xlu0 %2664, %v2677_v3  }
  0x40   : > { %1042 = vperm.xlu1 %2665, %v2679_v4  }
  0x41   : > { %2381 = vmatmul.mubr.msk.f32.gmra.mrb[10].mxu0 %vm384_vm0, %v3346_v59  ;;  %2389 = vmatmul.mubr.msk.f32.gmra.mrb[10].mxu1 %vm384_vm0, %v3349_v60 }
  0x42   : > { %533 = vmatprep.mubr.f32.mxu0 %v3110_v7  ;;  %581 = vmatprep.mubr.f32.mxu1 %v3110_v7 }
  0x43   : > { %1047 = vperm.xlu0 %2664, %v2681_v8  }
  0x44   : > { %1052 = vperm.xlu1 %2665, %v2683_v9  }
  0x45   : > { %2382 = vmatmul.mubr.msk.f32.gmra.mrb[12].mxu0 %vm384_vm0, %v3358_v1  ;;  %2390 = vmatmul.mubr.msk.f32.gmra.mrb[12].mxu1 %vm384_vm0, %v3361_v2 }
  0x46   : > { %539 = vmatprep.mubr.f32.mxu0 %v3110_v7  ;;  %587 = vmatprep.mubr.f32.mxu1 %v3110_v7 }
  0x47   : > { %1057 = vperm.xlu0 %2664, %v2685_v10  }
  0x48   : > { %1062 = vperm.xlu1 %2665, %v2687_v11  }
  0x49   : > { %2383 = vmatmul.mubr.msk.f32.gmra.mrb[14].mxu0 %vm384_vm0, %v3370_v5  ;;  %2391 = vmatmul.mubr.msk.f32.gmra.mrb[14].mxu1 %vm384_vm0, %v3373_v6 }
  0x4a   : > { %1306 = vmatprep.mubr.f32.mxu1 %v3110_v7  ;;  %1907 = vmatprep.mubr.f32.mxu0 %v3110_v7 }
  0x4d   : > { %2424 = vmatmul.mubr.msk.f32.vlgmr.msra.gmra.mrb[16].mxu1 %vm384_vm0, %v3264_v21  ;;  %2456 = vmatmul.mubr.msk.f32.vlgmr.msra.gmra.mrb[16].mxu0 %vm384_vm0, %v3264_v21 }
  0x4e   : > { %1312 = vmatprep.mubr.f32.mxu1 %v3110_v7  ;;  %1913 = vmatprep.mubr.f32.mxu0 %v3110_v7 }
  0x51   : > { %2425 = vmatmul.mubr.msk.f32.gmra.mrb[18].mxu1 %vm384_vm0, %v3285_v27  ;;  %2457 = vmatmul.mubr.msk.f32.gmra.mrb[18].mxu0 %vm384_vm0, %v3285_v27 }
  0x52   : > { %1318 = vmatprep.mubr.f32.mxu1 %v3110_v7  ;;  %1919 = vmatprep.mubr.f32.mxu0 %v3110_v7 }
  0x55   : > { %2426 = vmatmul.mubr.msk.f32.gmra.mrb[20].mxu1 %vm384_vm0, %v3304_v38  ;;  %2458 = vmatmul.mubr.msk.f32.gmra.mrb[20].mxu0 %vm384_vm0, %v3304_v38 }
  0x56   : > { %1324 = vmatprep.mubr.f32.mxu1 %v3110_v7  ;;  %1925 = vmatprep.mubr.f32.mxu0 %v3110_v7 }
  0x59   : > { %2427 = vmatmul.mubr.msk.f32.gmra.mrb[22].mxu1 %vm384_vm0, %v3318_v44  ;;  %2459 = vmatmul.mubr.msk.f32.gmra.mrb[22].mxu0 %vm384_vm0, %v3318_v44 }
  0x5a   : > { %1330 = vmatprep.mubr.f32.mxu1 %v3110_v7  ;;  %1931 = vmatprep.mubr.f32.mxu0 %v3110_v7 }
  0x5d   : > { %2428 = vmatmul.mubr.msk.f32.gmra.mrb[24].mxu1 %vm384_vm0, %v3332_v50  ;;  %2460 = vmatmul.mubr.msk.f32.gmra.mrb[24].mxu0 %vm384_vm0, %v3332_v50 }
  0x5e   : > { %1336 = vmatprep.mubr.f32.mxu1 %v3110_v7  ;;  %1937 = vmatprep.mubr.f32.mxu0 %v3110_v7 }
  0x61   : > { %2429 = vmatmul.mubr.msk.f32.gmra.mrb[26].mxu1 %vm384_vm0, %v3346_v59  ;;  %2461 = vmatmul.mubr.msk.f32.gmra.mrb[26].mxu0 %vm384_vm0, %v3346_v59 }
  0x62   : > { %1342 = vmatprep.mubr.f32.mxu1 %v3110_v7  ;;  %1943 = vmatprep.mubr.f32.mxu0 %v3110_v7 }
  0x65   : > { %2430 = vmatmul.mubr.msk.f32.gmra.mrb[28].mxu1 %vm384_vm0, %v3358_v1  ;;  %2462 = vmatmul.mubr.msk.f32.gmra.mrb[28].mxu0 %vm384_vm0, %v3358_v1 }
  0x66   : > { %1348 = vmatprep.mubr.f32.mxu1 %v3110_v7  ;;  %1949 = vmatprep.mubr.f32.mxu0 %v3110_v7 }
  0x69   : > { %2431 = vmatmul.mubr.msk.f32.gmra.mrb[30].mxu1 %vm384_vm0, %v3370_v5  ;;  %2463 = vmatmul.mubr.msk.f32.gmra.mrb[30].mxu0 %vm384_vm0, %v3370_v5 }
  0x6a   : > { %1354 = vmatprep.mubr.f32.mxu1 %v3110_v7  ;;  %1955 = vmatprep.mubr.f32.mxu0 %v3110_v7 }
  0x6d   : > { %2432 = vmatmul.mubr.msk.f32.gmra.mrb[32].mxu1 %vm384_vm0, %v3267_v22  ;;  %2464 = vmatmul.mubr.msk.f32.gmra.mrb[32].mxu0 %vm384_vm0, %v3267_v22 }
  0x6e   : > { %1360 = vmatprep.mubr.f32.mxu1 %v3110_v7  ;;  %1961 = vmatprep.mubr.f32.mxu0 %v3110_v7 }
  0x71   : > { %2433 = vmatmul.mubr.msk.f32.gmra.mrb[34].mxu1 %vm384_vm0, %v3289_v28  ;;  %2465 = vmatmul.mubr.msk.f32.gmra.mrb[34].mxu0 %vm384_vm0, %v3289_v28 }
  0x72   : > { %1366 = vmatprep.mubr.f32.mxu1 %v3110_v7  ;;  %1967 = vmatprep.mubr.f32.mxu0 %v3110_v7 }
  0x75   : > { %2434 = vmatmul.mubr.msk.f32.gmra.mrb[36].mxu1 %vm384_vm0, %v3307_v39  ;;  %2466 = vmatmul.mubr.msk.f32.gmra.mrb[36].mxu0 %vm384_vm0, %v3307_v39 }
  0x76   : > { %1372 = vmatprep.mubr.f32.mxu1 %v3110_v7  ;;  %1973 = vmatprep.mubr.f32.mxu0 %v3110_v7 }
  0x79   : > { %2435 = vmatmul.mubr.msk.f32.gmra.mrb[38].mxu1 %vm384_vm0, %v3321_v45  ;;  %2467 = vmatmul.mubr.msk.f32.gmra.mrb[38].mxu0 %vm384_vm0, %v3321_v45 }
  0x7a   : > { %1378 = vmatprep.mubr.f32.mxu1 %v3110_v7  ;;  %1979 = vmatprep.mubr.f32.mxu0 %v3110_v7 }
  0x7d   : > { %2436 = vmatmul.mubr.msk.f32.gmra.mrb[40].mxu1 %vm384_vm0, %v3335_v51  ;;  %2468 = vmatmul.mubr.msk.f32.gmra.mrb[40].mxu0 %vm384_vm0, %v3335_v51 }
  0x7e   : > { %1384 = vmatprep.mubr.f32.mxu1 %v3110_v7  ;;  %1985 = vmatprep.mubr.f32.mxu0 %v3110_v7 }
  0x81   : > { %2437 = vmatmul.mubr.msk.f32.gmra.mrb[42].mxu1 %vm384_vm0, %v3349_v60  ;;  %2469 = vmatmul.mubr.msk.f32.gmra.mrb[42].mxu0 %vm384_vm0, %v3349_v60 }
  0x82   : > { %1390 = vmatprep.mubr.f32.mxu1 %v3110_v7  ;;  %1991 = vmatprep.mubr.f32.mxu0 %v3110_v7 }
  0x85   : > { %2438 = vmatmul.mubr.msk.f32.gmra.mrb[44].mxu1 %vm384_vm0, %v3361_v2  ;;  %2470 = vmatmul.mubr.msk.f32.gmra.mrb[44].mxu0 %vm384_vm0, %v3361_v2 }
  0x86   : > { %1396 = vmatprep.mubr.f32.mxu1 %v3110_v7  ;;  %1997 = vmatprep.mubr.f32.mxu0 %v3110_v7 }
  0x89   : > { %2439 = vmatmul.mubr.msk.f32.gmra.mrb[46].mxu1 %vm384_vm0, %v3373_v6  ;;  %2471 = vmatmul.mubr.msk.f32.gmra.mrb[46].mxu0 %vm384_vm0, %v3373_v6 }
 0x100   : > { %v3452_v26 = vpop.f32.mrb[0].mxu0  ;;  %v3454_v29 = vpop.f32.mrb[0].mxu1 }
 0x101   : > { %v3456_v30 = vpop.f32.mrb[1].mxu0  ;;  %v3458_v31 = vpop.f32.mrb[1].mxu1 }
 0x102   : > { %v594_v32 = vmax.f32 %v3452_v26, %v3456_v30  ;;  %v618_v33 = vmax.f32 %v3454_v29, %v3458_v31 }
 0x104   : > { %v3467_v34 = vpop.f32.mrb[2].mxu1  ;;  %595 = vmax.xlane.f32.xlu0 %v594_v32  ;;  %v3469_v35 = vpop.f32.mrb[2].mxu0 }
 0x105   : > { %v3471_v36 = vpop.f32.mrb[3].mxu1  ;;  %v3473_v37 = vpop.f32.mrb[3].mxu0 }
 0x106   : > { %v621_v21 = vmax.f32 %v3467_v34, %v3471_v36  ;;  %v597_v40 = vmax.f32 %v3469_v35, %v3473_v37 }
 0x108   : > { %622 = vmax.xlane.f32.xlu1 %v621_v21  ;;  %v3482_v41 = vpop.f32.mrb[4].mxu1  ;;  %619 = vmax.xlane.f32.xlu0 %v618_v33  ;;  %v3484_v42 = vpop.f32.mrb[4].mxu0 }
 0x109   : > { %v3486_v43 = vpop.f32.mrb[5].mxu0  ;;  %v3488_v46 = vpop.f32.mrb[5].mxu1 }
 0x10a   : > { %v600_v27 = vmax.f32 %v3484_v42, %v3486_v43  ;;  %v624_v47 = vmax.f32 %v3482_v41, %v3488_v46 }
 0x10c   : > { %v3497_v48 = vpop.f32.mrb[6].mxu1  ;;  %598 = vmax.xlane.f32.xlu0 %v597_v40  ;;  %601 = vmax.xlane.f32.xlu1 %v600_v27  ;;  %v3499_v49 = vpop.f32.mrb[6].mxu0 }
 0x10d   : > { %v3501_v52 = vpop.f32.mrb[7].mxu0  ;;  %v3503_v53 = vpop.f32.mrb[7].mxu1 }
 0x10e   : > { %v603_v38 = vmax.f32 %v3499_v49, %v3501_v52  ;;  %v627_v54 = vmax.f32 %v3497_v48, %v3503_v53 }
 0x110   : > { %v3512_v55 = vpop.f32.mrb[8].mxu1  ;;  %625 = vmax.xlane.f32.xlu0 %v624_v47  ;;  %604 = vmax.xlane.f32.xlu1 %v603_v38  ;;  %v3514_v56 = vpop.f32.mrb[8].mxu0 }
 0x111   : > { %v3516_v57 = vpop.f32.mrb[9].mxu0  ;;  %v3518_v58 = vpop.f32.mrb[9].mxu1 }
 0x112   : > { %v606_v44 = vmax.f32 %v3514_v56, %v3516_v57  ;;  %v630_v61 = vmax.f32 %v3512_v55, %v3518_v58 }
 0x114   : > { %v3527_v62 = vpop.f32.mrb[10].mxu1  ;;  %628 = vmax.xlane.f32.xlu1 %v627_v54  ;;  %607 = vmax.xlane.f32.xlu0 %v606_v44  ;;  %v3529_v63 = vpop.f32.mrb[10].mxu0 }
 0x115   : > { %v3531_v0 = vpop.f32.mrb[11].mxu0  ;;  %v3533_v3 = vpop.f32.mrb[11].mxu1 }
 0x116   : > { %v609_v50 = vmax.f32 %v3529_v63, %v3531_v0  ;;  %v633_v4 = vmax.f32 %v3527_v62, %v3533_v3 }
 0x118   : > { %v3542_v8 = vpop.f32.mrb[12].mxu1  ;;  %631 = vmax.xlane.f32.xlu0 %v630_v61  ;;  %610 = vmax.xlane.f32.xlu1 %v609_v50  ;;  %v3544_v9 = vpop.f32.mrb[12].mxu0 }
 0x119   : > { %v3546_v10 = vpop.f32.mrb[13].mxu0  ;;  %v3548_v11 = vpop.f32.mrb[13].mxu1 }
 0x11a   : > { %v612_v59 = vmax.f32 %v3544_v9, %v3546_v10  ;;  %v636_v12 = vmax.f32 %v3542_v8, %v3548_v11 }
 0x11c   : > { %v3557_v13 = vpop.f32.mrb[14].mxu1  ;;  %634 = vmax.xlane.f32.xlu1 %v633_v4  ;;  %613 = vmax.xlane.f32.xlu0 %v612_v59  ;;  %v3559_v14 = vpop.f32.mrb[14].mxu0 }
 0x11d   : > { %v3561_v15 = vpop.f32.mrb[15].mxu0  ;;  %v3563_v16 = vpop.f32.mrb[15].mxu1 }
 0x11e   : > { %v615_v1 = vmax.f32 %v3559_v14, %v3561_v15  ;;  %v639_v17 = vmax.f32 %v3557_v13, %v3563_v16 }
 0x120   : > { %v3572_v18 = vpop.f32.mrb[16].mxu1  ;;  %637 = vmax.xlane.f32.xlu0 %v636_v12  ;;  %616 = vmax.xlane.f32.xlu1 %v615_v1 }
 0x121   : > { %v3574_v19 = vpop.f32.mrb[17].mxu1 }
 0x122   : > { %v1403_v5 = vmax.f32 %v3572_v18, %v3574_v19 }
 0x124   : > { %v3581_v20 = vpop.f32.mrb[18].mxu1  ;;  %640 = vmax.xlane.f32.xlu1 %v639_v17 }
 0x125   : > { %v3583_v23 = vpop.f32.mrb[19].mxu1 }
 0x126   : > { %v1406_v24 = vmax.f32 %v3581_v20, %v3583_v23 }
 0x128   : > { %v3590_v25 = vpop.f32.mrb[20].mxu1  ;;  %1407 = vmax.xlane.f32.xlu0 %v1406_v24  ;;  %1404 = vmax.xlane.f32.xlu1 %v1403_v5 }
 0x129   : > { %v3592_v22 = vpop.f32.mrb[21].mxu1 }
 0x12a   : > { %v1409_v32 = vmax.f32 %v3590_v25, %v3592_v22 }
 0x12c   : > { %v3599_v28 = vpop.f32.mrb[22].mxu1  ;;  %1410 = vmax.xlane.f32.xlu1 %v1409_v32 }
 0x12d   : > { %v3601_v33 = vpop.f32.mrb[23].mxu1 }
 0x12e   : > { %v1412_v21 = vmax.f32 %v3599_v28, %v3601_v33 }
 0x130   : > { %v3608_v40 = vpop.f32.mrb[24].mxu1  ;;  %1413 = vmax.xlane.f32.xlu0 %v1412_v21 }
 0x131   : > { %v3610_v39 = vpop.f32.mrb[25].mxu1 }
 0x132   : > { %v1415_v27 = vmax.f32 %v3608_v40, %v3610_v39 }
 0x134   : > { %v3617_v47 = vpop.f32.mrb[26].mxu1  ;;  %1416 = vmax.xlane.f32.xlu1 %v1415_v27 }
 0x135   : > { %v3619_v45 = vpop.f32.mrb[27].mxu1 }
 0x136   : > { %v1418_v38 = vmax.f32 %v3617_v47, %v3619_v45 }
 0x138   : > { %v3626_v54 = vpop.f32.mrb[28].mxu1  ;;  %1419 = vmax.xlane.f32.xlu0 %v1418_v38 }
 0x139   : > { %v3628_v51 = vpop.f32.mrb[29].mxu1 }
 0x13a   : > { %v1421_v44 = vmax.f32 %v3626_v54, %v3628_v51 }
 0x13c   : > { %v3635_v61 = vpop.f32.mrb[30].mxu1  ;;  %1422 = vmax.xlane.f32.xlu1 %v1421_v44 }
 0x13d   : > { %v3637_v60 = vpop.f32.mrb[31].mxu1 }
 0x13e   : > { %v1424_v50 = vmax.f32 %v3635_v61, %v3637_v60 }
 0x140   : > { %v3643_v4 = vpop.f32.mrb[32].mxu1  ;;  %1425 = vmax.xlane.f32.xlu0 %v1424_v50 }
 0x141   : > { %v3645_v2 = vpop.f32.mrb[33].mxu1 }
 0x142   : > { %4399 = vst [vmem:[#allocation12_spill] sm:$0xff] %v3645_v2  ;;  %v1427_v59 = vmax.f32 %v3643_v4, %v3645_v2 }
 0x144   : > { %v3649_v7 = vpop.f32.mrb[34].mxu1  ;;  %1428 = vmax.xlane.f32.xlu1 %v1427_v59 }
 0x145   : > { %4400 = vst [vmem:[#allocation13_spill] sm:$0xff] %v3649_v7  ;;  %v3651_v12 = vpop.f32.mrb[35].mxu1 }
 0x146   : > { %4401 = vst [vmem:[#allocation14_spill] sm:$0xff] %v3651_v12  ;;  %v1430_v1 = vmax.f32 %v3649_v7, %v3651_v12  ;;  %v3693_v12 = vpop.permute.xlu1 %1017 }
 0x147   : > { %4414 = vst [vmem:[#allocation27_spill] sm:$0xff] %v3693_v12 }
 0x148   : > { %v3655_v6 = vpop.f32.mrb[36].mxu1  ;;  %1431 = vmax.xlane.f32.xlu0 %v1430_v1 }
 0x149   : > { %4402 = vst [vmem:[#allocation15_spill] sm:$0xff] %v3655_v6  ;;  %v3657_v17 = vpop.f32.mrb[37].mxu1 }
 0x14a   : > { %4403 = vst [vmem:[#allocation16_spill] sm:$0xff] %v3657_v17  ;;  %v1433_v5 = vmax.f32 %v3655_v6, %v3657_v17 }
 0x14c   : > { %v3661_v24 = vpop.f32.mrb[38].mxu1  ;;  %1434 = vmax.xlane.f32.xlu1 %v1433_v5 }
 0x14d   : > { %4404 = vst [vmem:[#allocation17_spill] sm:$0xff] %v3661_v24  ;;  %v3663_v32 = vpop.f32.mrb[39].mxu1 }
 0x14e   : > { %4405 = vst [vmem:[#allocation18_spill] sm:$0xff] %v3663_v32  ;;  %v1436_v21 = vmax.f32 %v3661_v24, %v3663_v32 }
 0x150   : > { %v3667_v27 = vpop.f32.mrb[40].mxu1  ;;  %1437 = vmax.xlane.f32.xlu0 %v1436_v21  ;;  %v974_v21 = vld [vmem:[%s3272_s18 + $0x60] sm:$0xff] }
 0x151   : > { %4406 = vst [vmem:[#allocation19_spill] sm:$0xff] %v3667_v27  ;;  %v3669_v38 = vpop.f32.mrb[41].mxu1 }
 0x152   : > { %4407 = vst [vmem:[#allocation20_spill] sm:$0xff] %v3669_v38  ;;  %v1439_v44 = vmax.f32 %v3667_v27, %v3669_v38  ;;  %v1002_v38 = vmul.f32 1.442695, %v974_v21 }
 0x154   : > { %v3673_v50 = vpop.f32.mrb[42].mxu1  ;;  %1440 = vmax.xlane.f32.xlu1 %v1439_v44  ;;  %2688 = vpow2.f32 %v1002_v38 }
 0x155   : > { %4408 = vst [vmem:[#allocation21_spill] sm:$0xff] %v3673_v50  ;;  %v3675_v59 = vpop.f32.mrb[43].mxu1 }
 0x156   : > { %4409 = vst [vmem:[#allocation22_spill] sm:$0xff] %v3675_v59  ;;  %v1442_v1 = vmax.f32 %v3673_v50, %v3675_v59  ;;  %v973_v59 = vld [vmem:[%s3272_s18 + $0x58] sm:$0xff] }
 0x157   : > { %v1000_v50 = vmul.f32 1.442695, %v973_v59 }
 0x158   : > { %v3679_v5 = vpop.f32.mrb[44].mxu1  ;;  %1443 = vmax.xlane.f32.xlu0 %v1442_v1 }
 0x159   : > { %4410 = vst [vmem:[#allocation23_spill] sm:$0xff] %v3679_v5  ;;  %v3681_v32 = vpop.f32.mrb[45].mxu1  ;;  %2690 = vpow2.f32 %v1000_v50 }
 0x15a   : > { %4411 = vst [vmem:[#allocation24_spill] sm:$0xff] %v3681_v32  ;;  %v1445_v24 = vmax.f32 %v3679_v5, %v3681_v32  ;;  %v3695_v32 = vpop.permute.xlu0 %1012 }
 0x15b   : > { %4415 = vst [vmem:[#allocation28_spill] sm:$0xff] %v3695_v32 }
 0x15c   : > { %v3686_v17 = vpop.f32.mrb[46].mxu1  ;;  %1446 = vmax.xlane.f32.xlu1 %v1445_v24  ;;  %v3697_v24 = vpop.permute.xlu1 %1027 }
 0x15d   : > { %4412 = vst [vmem:[#allocation25_spill] sm:$0xff] %v3686_v17  ;;  %v3688_v27 = vpop.f32.mrb[47].mxu1  ;;  %4416 = vst [vmem:[#allocation29_spill] sm:$0xff] %v3697_v24 }
 0x15e   : > { %4413 = vst [vmem:[#allocation26_spill] sm:$0xff] %v3688_v27  ;;  %v1448_v44 = vmax.f32 %v3686_v17, %v3688_v27  ;;  %v2689_v1 = vpop.eup %2688  ;;  %v3699_v21 = vpop.permute.xlu0 %1022 }
 0x15f   : > { %4417 = vst [vmem:[#allocation30_spill] sm:$0xff] %v3699_v21 }
 0x160   : > { %1449 = vmax.xlane.f32.xlu0 %v1448_v44  ;;  %v3701_v5 = vpop.permute.xlu1 %1032 }
 0x161   : > { %4418 = vst [vmem:[#allocation31_spill] sm:$0xff] %v3701_v5 }
 0x162   : > { %v3703_v27 = vpop.permute.xlu0 %1037 }
 0x163   : > { %v2691_v6 = vpop.eup %2690  ;;  %4419 = vst [vmem:[#allocation32_spill] sm:$0xff] %v3703_v27 }
 0x164   : > { %v3705_v38 = vpop.permute.xlu1 %1042 }
 0x165   : > { %4420 = vst [vmem:[#allocation33_spill] sm:$0xff] %v3705_v38 }
 0x166   : > { %v3707_v59 = vpop.permute.xlu0 %1047 }
 0x167   : > { %4421 = vst [vmem:[#allocation34_spill] sm:$0xff] %v3707_v59 }
 0x168   : > { %v3709_v50 = vpop.permute.xlu1 %1052 }
 0x169   : > { %4422 = vst [vmem:[#allocation35_spill] sm:$0xff] %v3709_v50 }
 0x16a   : > { %v3711_v44 = vpop.permute.xlu0 %1057 }
 0x16b   : > { %4423 = vst [vmem:[#allocation36_spill] sm:$0xff] %v3711_v44 }
 0x16d   : > { %1072 = vperm.xlu1 %2665, %v2689_v1   ;;  %v3713_v1 = vpop.permute.xlu1 %1062 }
 0x16e   : > { %4424 = vst [vmem:[#allocation37_spill] sm:$0xff] %v3713_v1 }
 0x176   : > { %1067 = vperm.xlu0 %2664, %v2691_v6  }
 0x191   : > { %v596_v12 = vpop.xlane.xlu0 %595 }
 0x192   : > { %v642_v6 = vsub.f32 %v3452_v26, %v596_v12  ;;  %v643_v24 = vsub.f32 %v3456_v30, %v596_v12 }
 0x194   : > { %v674_v21 = vmul.f32 1.442695, %v642_v6  ;;  %v676_v32 = vmul.f32 1.442695, %v643_v24 }
 0x195   : > { %v623_v5 = vpop.xlane.xlu1 %622  ;;  %v620_v17 = vpop.xlane.xlu0 %619 }
 0x196   : > { %2692 = vpow2.f32 %v674_v21  ;;  %v660_v38 = vsub.f32 %v3467_v34, %v623_v5  ;;  %v661_v59 = vsub.f32 %v3471_v36, %v623_v5  ;;  %v658_v27 = vsub.f32 %v3454_v29, %v620_v17 }
 0x197   : > { %2694 = vpow2.f32 %v676_v32  ;;  %v659_v44 = vsub.f32 %v3458_v31, %v620_v17 }
 0x198   : > { %v710_v1 = vmul.f32 1.442695, %v660_v38  ;;  %v712_v50 = vmul.f32 1.442695, %v661_v59  ;;  %v706_v7 = vmul.f32 1.442695, %v658_v27 }
 0x199   : > { %v708_v26 = vmul.f32 1.442695, %v659_v44  ;;  %v599_v2 = vpop.xlane.xlu0 %598  ;;  %v602_v30 = vpop.xlane.xlu1 %601 }
 0x19a   : > { %2696 = vpow2.f32 %v710_v1  ;;  %v644_v12 = vsub.f32 %v3469_v35, %v599_v2  ;;  %v645_v24 = vsub.f32 %v3473_v37, %v599_v2  ;;  %v646_v34 = vsub.f32 %v3484_v42, %v602_v30 }
 0x19b   : > { %2698 = vpow2.f32 %v712_v50  ;;  %v647_v36 = vsub.f32 %v3486_v43, %v602_v30 }
 0x19c   : > { %2700 = vpow2.f32 %v706_v7  ;;  %v678_v29 = vmul.f32 1.442695, %v644_v12  ;;  %v680_v32 = vmul.f32 1.442695, %v645_v24  ;;  %v682_v31 = vmul.f32 1.442695, %v646_v34 }
 0x19d   : > { %2702 = vpow2.f32 %v708_v26  ;;  %v684_v17 = vmul.f32 1.442695, %v647_v36  ;;  %v626_v27 = vpop.xlane.xlu0 %625  ;;  %v605_v5 = vpop.xlane.xlu1 %604 }
 0x19e   : > { %2704 = vpow2.f32 %v678_v29  ;;  %v662_v21 = vsub.f32 %v3482_v41, %v626_v27  ;;  %v663_v35 = vsub.f32 %v3488_v46, %v626_v27  ;;  %v648_v37 = vsub.f32 %v3499_v49, %v605_v5 }
 0x19f   : > { %2706 = vpow2.f32 %v680_v32  ;;  %v649_v42 = vsub.f32 %v3501_v52, %v605_v5 }
 0x1a0   : > { %v3729_v2 = vpop.eup %2692  ;;  %2708 = vpow2.f32 %v682_v31  ;;  %v714_v43 = vmul.f32 1.442695, %v662_v21  ;;  %v716_v7 = vmul.f32 1.442695, %v663_v35  ;;  %v686_v38 = vmul.f32 1.442695, %v648_v37 }
 0x1a1   : > { %v3731_v59 = vpop.eup %2694  ;;  %2710 = vpow2.f32 %v684_v17  ;;  %v688_v50 = vmul.f32 1.442695, %v649_v42  ;;  %v629_v44 = vpop.xlane.xlu1 %628 }
 0x1a2   : > { %v608_v1 = vpop.xlane.xlu0 %607  ;;  %2712 = vpow2.f32 %v714_v43  ;;  %v664_v41 = vsub.f32 %v3497_v48, %v629_v44  ;;  %v665_v46 = vsub.f32 %v3503_v53, %v629_v44  ;;  %v738_v6 = vadd.f32 %v3731_v59, %v3729_v2 }
 0x1a3   : > { %v650_v49 = vsub.f32 %v3514_v56, %v608_v1  ;;  %2714 = vpow2.f32 %v716_v7  ;;  %v651_v52 = vsub.f32 %v3516_v57, %v608_v1 }
 0x1a4   : > { %v3739_v26 = vpop.eup %2696  ;;  %2716 = vpow2.f32 %v686_v38  ;;  %v718_v30 = vmul.f32 1.442695, %v664_v41  ;;  %v720_v12 = vmul.f32 1.442695, %v665_v46  ;;  %739 = vadd.xlane.f32.xlu0 %v738_v6 }
 0x1a5   : > { %v690_v24 = vmul.f32 1.442695, %v650_v49  ;;  %v3741_v34 = vpop.eup %2698  ;;  %2718 = vpow2.f32 %v688_v50  ;;  %v692_v48 = vmul.f32 1.442695, %v651_v52  ;;  %v611_v36 = vpop.xlane.xlu1 %610 }
 0x1a6   : > { %v632_v53 = vpop.xlane.xlu0 %631  ;;  %v3743_v56 = vpop.eup %2700  ;;  %2720 = vpow2.f32 %v718_v30  ;;  %v652_v32 = vsub.f32 %v3529_v63, %v611_v36  ;;  %v653_v17 = vsub.f32 %v3531_v0, %v611_v36 }
 0x1a7   : > { %v666_v57 = vsub.f32 %v3512_v55, %v632_v53  ;;  %v667_v29 = vsub.f32 %v3518_v58, %v632_v53  ;;  %v3748_v31 = vpop.eup %2702  ;;  %2722 = vpow2.f32 %v720_v12 }
 0x1a8   : > { %v3751_v27 = vpop.eup %2704  ;;  %2724 = vpow2.f32 %v690_v24  ;;  %v694_v35 = vmul.f32 1.442695, %v652_v32  ;;  %v696_v42 = vmul.f32 1.442695, %v653_v17  ;;  %v762_v55 = vadd.f32 %v3748_v31, %v3743_v56 }
 0x1a9   : > { %v722_v5 = vmul.f32 1.442695, %v666_v57  ;;  %v724_v21 = vmul.f32 1.442695, %v667_v29  ;;  %v3753_v37 = vpop.eup %2706  ;;  %2726 = vpow2.f32 %v692_v48  ;;  %v635_v58 = vpop.xlane.xlu1 %634  ;;  %v765_v29 = vadd.f32 %v3741_v34, %v3739_v26 }
 0x1aa   : > { %v614_v63 = vpop.xlane.xlu0 %613  ;;  %v3757_v43 = vpop.eup %2708  ;;  %v668_v0 = vsub.f32 %v3527_v62, %v635_v58  ;;  %v669_v7 = vsub.f32 %v3533_v3, %v635_v58  ;;  %763 = vadd.xlane.f32.xlu0 %v762_v55  ;;  %v741_v1 = vadd.f32 %v3753_v37, %v3751_v27 }
 0x1ab   : > { %2728 = vpow2.f32 %v722_v5  ;;  %v654_v38 = vsub.f32 %v3544_v9, %v614_v63  ;;  %v3762_v50 = vpop.eup %2710  ;;  %v655_v44 = vsub.f32 %v3546_v10, %v614_v63 }
 0x1ac   : > { %2730 = vpow2.f32 %v724_v21  ;;  %v3767_v41 = vpop.eup %2712  ;;  %v726_v46 = vmul.f32 1.442695, %v668_v0  ;;  %v728_v49 = vmul.f32 1.442695, %v669_v7  ;;  %v744_v9 = vadd.f32 %v3762_v50, %v3757_v43  ;;  %742 = vadd.xlane.f32.xlu1 %v741_v1 }
 0x1ad   : > { %2732 = vpow2.f32 %v694_v35  ;;  %v698_v52 = vmul.f32 1.442695, %v654_v38  ;;  %v3769_v62 = vpop.eup %2714  ;;  %v700_v3 = vmul.f32 1.442695, %v655_v44  ;;  %v617_v30 = vpop.xlane.xlu1 %616 }
 0x1ae   : > { %2734 = vpow2.f32 %v696_v42  ;;  %v638_v6 = vpop.xlane.xlu0 %637  ;;  %v3773_v10 = vpop.eup %2716  ;;  %v656_v48 = vsub.f32 %v3559_v14, %v617_v30  ;;  %745 = vadd.xlane.f32.xlu0 %v744_v9  ;;  %v657_v36 = vsub.f32 %v3561_v15, %v617_v30  ;;  %v768_v57 = vadd.f32 %v3769_v62, %v3767_v41 }
 0x1af   : > { %2736 = vpow2.f32 %v726_v46  ;;  %v670_v12 = vsub.f32 %v3542_v8, %v638_v6  ;;  %v671_v24 = vsub.f32 %v3548_v11, %v638_v6  ;;  %v3778_v53 = vpop.eup %2718 }
 0x1b0   : > { %2738 = vpow2.f32 %v728_v49  ;;  %v3785_v32 = vpop.eup %2720  ;;  %v702_v14 = vmul.f32 1.442695, %v656_v48  ;;  %766 = vadd.xlane.f32.xlu1 %v765_v29  ;;  %v704_v15 = vmul.f32 1.442695, %v657_v36  ;;  %v747_v58 = vadd.f32 %v3778_v53, %v3773_v10 }
 0x1b1   : > { %2740 = vpow2.f32 %v698_v52  ;;  %v730_v8 = vmul.f32 1.442695, %v670_v12  ;;  %v732_v17 = vmul.f32 1.442695, %v671_v24  ;;  %v3787_v11 = vpop.eup %2722  ;;  %v641_v5 = vpop.xlane.xlu1 %640 }
 0x1b2   : > { %2742 = vpow2.f32 %v700_v3  ;;  %v3789_v21 = vpop.eup %2724  ;;  %v672_v35 = vsub.f32 %v3557_v13, %v641_v5  ;;  %v673_v42 = vsub.f32 %v3563_v16, %v641_v5  ;;  %769 = vadd.xlane.f32.xlu0 %v768_v57  ;;  %v771_v30 = vadd.f32 %v3787_v11, %v3785_v32 }
 0x1b3   : > { %2744 = vpow2.f32 %v730_v8  ;;  %v3793_v55 = vpop.eup %2726 }
 0x1b4   : > { %2746 = vpow2.f32 %v732_v17  ;;  %v734_v0 = vmul.f32 1.442695, %v672_v35  ;;  %v750_v7 = vadd.f32 %v3793_v55, %v3789_v21  ;;  %v736_v44 = vmul.f32 1.442695, %v673_v42  ;;  %748 = vadd.xlane.f32.xlu1 %v747_v58 }
 0x1b5   : > { %v3797_v63 = vpop.eup %2728  ;;  %2748 = vpow2.f32 %v702_v14  ;;  %v1408_v13 = vpop.xlane.xlu0 %1407 }
 0x1b6   : > { %v3801_v38 = vpop.eup %2730  ;;  %v1405_v16 = vpop.xlane.xlu1 %1404  ;;  %2750 = vpow2.f32 %v704_v15  ;;  %v1453_v46 = vsub.f32 %v3581_v20, %v1408_v13  ;;  %v1454_v49 = vsub.f32 %v3583_v23, %v1408_v13  ;;  %751 = vadd.xlane.f32.xlu0 %v750_v7 }
 0x1b7   : > { %v3803_v1 = vpop.eup %2732  ;;  %v1451_v52 = vsub.f32 %v3572_v18, %v1405_v16  ;;  %v1452_v9 = vsub.f32 %v3574_v19, %v1405_v16  ;;  %v774_v6 = vadd.f32 %v3801_v38, %v3797_v63  ;;  %2752 = vpow2.f32 %v734_v0 }
 0x1b8   : > { %v3808_v3 = vpop.eup %2734  ;;  %v1487_v24 = vmul.f32 1.442695, %v1453_v46  ;;  %v1489_v20 = vmul.f32 1.442695, %v1454_v49  ;;  %2754 = vpow2.f32 %v736_v44  ;;  %772 = vadd.xlane.f32.xlu1 %v771_v30 }
 0x1b9   : > { %v3815_v12 = vpop.eup %2736  ;;  %v1483_v18 = vmul.f32 1.442695, %v1451_v52  ;;  %v1485_v19 = vmul.f32 1.442695, %v1452_v9  ;;  %v753_v17 = vadd.f32 %v3808_v3, %v3803_v1 }
 0x1ba   : > { %v3817_v48 = vpop.eup %2738  ;;  %v1411_v23 = vpop.xlane.xlu1 %1410  ;;  %2756 = vpow2.f32 %v1487_v24  ;;  %775 = vadd.xlane.f32.xlu0 %v774_v6 }
 0x1bb   : > { %v3819_v36 = vpop.eup %2740  ;;  %v1455_v57 = vsub.f32 %v3590_v25, %v1411_v23  ;;  %v1456_v29 = vsub.f32 %v3592_v22, %v1411_v23  ;;  %2758 = vpow2.f32 %v1489_v20  ;;  %v777_v44 = vadd.f32 %v3817_v48, %v3815_v12 }
 0x1bc   : > { %v3823_v8 = vpop.eup %2742  ;;  %2760 = vpow2.f32 %v1483_v18  ;;  %754 = vadd.xlane.f32.xlu1 %v753_v17 }
 0x1bd   : > { %v3827_v14 = vpop.eup %2744  ;;  %v756_v5 = vadd.f32 %v3823_v8, %v3819_v36  ;;  %v1491_v35 = vmul.f32 1.442695, %v1455_v57  ;;  %v1414_v25 = vpop.xlane.xlu0 %1413  ;;  %2762 = vpow2.f32 %v1485_v19  ;;  %v1493_v22 = vmul.f32 1.442695, %v1456_v29 }
 0x1be   : > { %v3831_v15 = vpop.eup %2746  ;;  %v1457_v42 = vsub.f32 %v3599_v28, %v1414_v25  ;;  %v1458_v58 = vsub.f32 %v3601_v33, %v1414_v25 }
 0x1bf   : > { %v3835_v0 = vpop.eup %2748  ;;  %757 = vadd.xlane.f32.xlu0 %v756_v5  ;;  %v780_v7 = vadd.f32 %v3831_v15, %v3827_v14  ;;  %2764 = vpow2.f32 %v1491_v35 }
 0x1c0   : > { %v3841_v13 = vpop.eup %2750  ;;  %v1495_v16 = vmul.f32 1.442695, %v1457_v42  ;;  %v1497_v46 = vmul.f32 1.442695, %v1458_v58  ;;  %778 = vadd.xlane.f32.xlu1 %v777_v44  ;;  %2766 = vpow2.f32 %v1493_v22 }
 0x1c1   : > { %v1417_v49 = vpop.xlane.xlu1 %1416  ;;  %v3843_v52 = vpop.eup %2752  ;;  %v759_v6 = vadd.f32 %v3841_v13, %v3835_v0 }
 0x1c2   : > { %v1459_v28 = vsub.f32 %v3608_v40, %v1417_v49  ;;  %v1460_v33 = vsub.f32 %v3610_v39, %v1417_v49  ;;  %v3847_v9 = vpop.eup %2754  ;;  %2768 = vpow2.f32 %v1495_v16 }
 0x1c3   : > { %781 = vadd.xlane.f32.xlu0 %v780_v7  ;;  %2770 = vpow2.f32 %v1497_v46  ;;  %v783_v29 = vadd.f32 %v3847_v9, %v3843_v52 }
 0x1c4   : > { %v3851_v30 = vpop.eup %2756  ;;  %v1499_v20 = vmul.f32 1.442695, %v1459_v28  ;;  %760 = vadd.xlane.f32.xlu1 %v759_v6  ;;  %v1501_v23 = vmul.f32 1.442695, %v1460_v33 }
 0x1c5   : > { %v3853_v24 = vpop.eup %2758  ;;  %v1420_v18 = vpop.xlane.xlu0 %1419 }
 0x1c6   : > { %v1461_v40 = vsub.f32 %v3617_v47, %v1420_v18  ;;  %v1462_v39 = vsub.f32 %v3619_v45, %v1420_v18  ;;  %v1550_v19 = vadd.f32 %v3853_v24, %v3851_v30  ;;  %v3859_v57 = vpop.eup %2760  ;;  %2772 = vpow2.f32 %v1499_v20 }
 0x1c7   : > { %v3863_v17 = vpop.eup %2762  ;;  %2774 = vpow2.f32 %v1501_v23  ;;  %v4425_v23 = vld [vmem:[#allocation12_spill] sm:$0xff] }
 0x1c8   : > { %1551 = vadd.xlane.f32.xlu0 %v1550_v19  ;;  %v1503_v5 = vmul.f32 1.442695, %v1461_v40  ;;  %784 = vadd.xlane.f32.xlu1 %v783_v29  ;;  %v1505_v25 = vmul.f32 1.442695, %v1462_v39  ;;  %v1547_v42 = vadd.f32 %v3863_v17, %v3859_v57 }
 0x1c9   : > { %v1423_v35 = vpop.xlane.xlu1 %1422  ;;  %v3867_v22 = vpop.eup %2764 }
 0x1ca   : > { %v1463_v47 = vsub.f32 %v3626_v54, %v1423_v35  ;;  %v1464_v45 = vsub.f32 %v3628_v51, %v1423_v35  ;;  %v3871_v58 = vpop.eup %2766  ;;  %2776 = vpow2.f32 %v1503_v5  ;;  %v4426_v35 = vld [vmem:[#allocation13_spill] sm:$0xff] }
 0x1cb   : > { %2778 = vpow2.f32 %v1505_v25  ;;  %v1553_v28 = vadd.f32 %v3871_v58, %v3867_v22 }
 0x1cc   : > { %v1507_v7 = vmul.f32 1.442695, %v1463_v47  ;;  %1548 = vadd.xlane.f32.xlu1 %v1547_v42  ;;  %v3873_v16 = vpop.eup %2768  ;;  %v1509_v46 = vmul.f32 1.442695, %v1464_v45  ;;  %v4427_v47 = vld [vmem:[#allocation14_spill] sm:$0xff] }
 0x1cd   : > { %v1426_v44 = vpop.xlane.xlu0 %1425  ;;  %v3877_v51 = vpop.eup %2770 }
 0x1ce   : > { %v1465_v49 = vsub.f32 %v3635_v61, %v1426_v44  ;;  %v1466_v54 = vsub.f32 %v3637_v60, %v1426_v44  ;;  %2780 = vpow2.f32 %v1507_v7  ;;  %v1556_v61 = vadd.f32 %v3877_v51, %v3873_v16 }
 0x1cf   : > { %2782 = vpow2.f32 %v1509_v46 }
 0x1d0   : > { %v1511_v33 = vmul.f32 1.442695, %v1465_v49  ;;  %v1513_v6 = vmul.f32 1.442695, %v1466_v54  ;;  %1554 = vadd.xlane.f32.xlu1 %v1553_v28  ;;  %v3883_v39 = vpop.eup %2772  ;;  %v4428_v54 = vld [vmem:[#allocation15_spill] sm:$0xff] }
 0x1d1   : > { %v1429_v20 = vpop.xlane.xlu1 %1428  ;;  %v3887_v60 = vpop.eup %2774 }
 0x1d2   : > { %v1467_v18 = vsub.f32 %v3643_v4, %v1429_v20  ;;  %v1468_v40 = vsub.f32 %v4425_v23, %v1429_v20  ;;  %2784 = vpow2.f32 %v1511_v33  ;;  %v1559_v42 = vadd.f32 %v3887_v60, %v3883_v39  ;;  %v4429_v33 = vld [vmem:[#allocation16_spill] sm:$0xff] }
 0x1d3   : > { %2786 = vpow2.f32 %v1513_v6 }
 0x1d4   : > { %v1515_v19 = vmul.f32 1.442695, %v1467_v18  ;;  %v1517_v29 = vmul.f32 1.442695, %v1468_v40  ;;  %1557 = vadd.xlane.f32.xlu1 %v1556_v61  ;;  %v3891_v45 = vpop.eup %2776 }
 0x1d5   : > { %v1432_v5 = vpop.xlane.xlu0 %1431  ;;  %v3895_v7 = vpop.eup %2778 }
 0x1d6   : > { %2788 = vpow2.f32 %v1515_v19  ;;  %v1469_v25 = vsub.f32 %v4426_v35, %v1432_v5  ;;  %v1470_v4 = vsub.f32 %v4427_v47, %v1432_v5  ;;  %v1562_v18 = vadd.f32 %v3895_v7, %v3891_v45  ;;  %v4431_v5 = vld [vmem:[#allocation17_spill] sm:$0xff] }
 0x1d7   : > { %2790 = vpow2.f32 %v1517_v29 }
 0x1d8   : > { %v1519_v44 = vmul.f32 1.442695, %v1469_v25  ;;  %v1521_v46 = vmul.f32 1.442695, %v1470_v4  ;;  %1560 = vadd.xlane.f32.xlu1 %v1559_v42  ;;  %v3899_v20 = vpop.eup %2780  ;;  %v4432_v25 = vld [vmem:[#allocation18_spill] sm:$0xff] }
 0x1d9   : > { %v1435_v49 = vpop.xlane.xlu1 %1434  ;;  %v3903_v23 = vpop.eup %2782 }
 0x1da   : > { %2792 = vpow2.f32 %v1519_v44  ;;  %v1471_v28 = vsub.f32 %v4428_v54, %v1435_v49  ;;  %v1472_v6 = vsub.f32 %v4429_v33, %v1435_v49  ;;  %v1565_v42 = vadd.f32 %v3903_v23, %v3899_v20  ;;  %v4435_v33 = vld [vmem:[#allocation19_spill] sm:$0xff] }
 0x1db   : > { %2794 = vpow2.f32 %v1521_v46 }
 0x1dc   : > { %v1523_v40 = vmul.f32 1.442695, %v1471_v28  ;;  %v1525_v61 = vmul.f32 1.442695, %v1472_v6  ;;  %1563 = vadd.xlane.f32.xlu1 %v1562_v18  ;;  %v3905_v29 = vpop.eup %2784  ;;  %v4436_v18 = vld [vmem:[#allocation20_spill] sm:$0xff] }
 0x1dd   : > { %v1438_v19 = vpop.xlane.xlu0 %1437  ;;  %4430 = vst [vmem:[#allocation12_spill] sm:$0xff] %v3905_v29  ;;  %v3909_v4 = vpop.eup %2786 }
 0x1de   : > { %2796 = vpow2.f32 %v1523_v40  ;;  %v1473_v35 = vsub.f32 %v4431_v5, %v1438_v19  ;;  %v1474_v47 = vsub.f32 %v4432_v25, %v1438_v19  ;;  %4433 = vst [vmem:[#allocation13_spill] sm:$0xff] %v3909_v4 }
 0x1df   : > { %2798 = vpow2.f32 %v1525_v61  ;;  %v1568_v61 = vadd.f32 %v3909_v4, %v3905_v29 }
 0x1e0   : > { %v3913_v44 = vpop.eup %2788  ;;  %v1527_v46 = vmul.f32 1.442695, %v1473_v35  ;;  %v1529_v49 = vmul.f32 1.442695, %v1474_v47  ;;  %1566 = vadd.xlane.f32.xlu1 %v1565_v42 }
 0x1e1   : > { %v3915_v54 = vpop.eup %2790  ;;  %v1441_v28 = vpop.xlane.xlu1 %1440 }
 0x1e2   : > { %4434 = vst [vmem:[#allocation14_spill] sm:$0xff] %v3915_v54  ;;  %2800 = vpow2.f32 %v1527_v46  ;;  %v1475_v6 = vsub.f32 %v4435_v33, %v1441_v28  ;;  %v1476_v40 = vsub.f32 %v4436_v18, %v1441_v28  ;;  %v1571_v19 = vadd.f32 %v3915_v54, %v3913_v44  ;;  %v4438_v46 = vld [vmem:[#allocation21_spill] sm:$0xff]  ;;  %v4439_v28 = vld [vmem:[#allocation22_spill] sm:$0xff]  ;;  %v4443_v54 = vld [vmem:[#allocation24_spill] sm:$0xff] }
 0x1e3   : > { %2802 = vpow2.f32 %v1529_v49 }
 0x1e4   : > { %v3923_v5 = vpop.eup %2792  ;;  %v1531_v35 = vmul.f32 1.442695, %v1475_v6  ;;  %v1533_v25 = vmul.f32 1.442695, %v1476_v40  ;;  %1572 = vadd.xlane.f32.xlu0 %v1571_v19  ;;  %1569 = vadd.xlane.f32.xlu1 %v1568_v61  ;;  %v4442_v61 = vld [vmem:[#allocation23_spill] sm:$0xff] }
 0x1e5   : > { %v3925_v47 = vpop.eup %2794  ;;  %v1444_v42 = vpop.xlane.xlu0 %1443 }
 0x1e6   : > { %4437 = vst [vmem:[#allocation15_spill] sm:$0xff] %v3925_v47  ;;  %2804 = vpow2.f32 %v1531_v35  ;;  %v1477_v33 = vsub.f32 %v4438_v46, %v1444_v42  ;;  %v1478_v18 = vsub.f32 %v4439_v28, %v1444_v42  ;;  %v1574_v49 = vadd.f32 %v3925_v47, %v3923_v5 }
 0x1e7   : > { %2806 = vpow2.f32 %v1533_v25 }
 0x1e8   : > { %v3931_v4 = vpop.eup %2796  ;;  %v1535_v29 = vmul.f32 1.442695, %v1477_v33  ;;  %v1537_v6 = vmul.f32 1.442695, %v1478_v18  ;;  %1575 = vadd.xlane.f32.xlu1 %v1574_v49 }
 0x1e9   : > { %4440 = vst [vmem:[#allocation16_spill] sm:$0xff] %v3931_v4  ;;  %v3933_v40 = vpop.eup %2798  ;;  %v1447_v19 = vpop.xlane.xlu1 %1446 }
 0x1ea   : > { %4441 = vst [vmem:[#allocation17_spill] sm:$0xff] %v3933_v40  ;;  %2808 = vpow2.f32 %v1535_v29  ;;  %v1479_v35 = vsub.f32 %v4442_v61, %v1447_v19  ;;  %v1480_v46 = vsub.f32 %v4443_v54, %v1447_v19  ;;  %v1577_v42 = vadd.f32 %v3933_v40, %v3931_v4  ;;  %v4446_v29 = vld [vmem:[#allocation25_spill] sm:$0xff]  ;;  %v4447_v61 = vld [vmem:[#allocation26_spill] sm:$0xff] }
 0x1eb   : > { %2810 = vpow2.f32 %v1537_v6  ;;  %v1909_v6 = vpop.f32.mrb[16].mxu0 }
 0x1ec   : > { %v3939_v28 = vpop.eup %2800  ;;  %v1539_v25 = vmul.f32 1.442695, %v1479_v35  ;;  %v1541_v47 = vmul.f32 1.442695, %v1480_v46  ;;  %1578 = vadd.xlane.f32.xlu0 %v1577_v42  ;;  %v1911_v35 = vpop.f32.mrb[17].mxu0 }
 0x1ed   : > { %4444 = vst [vmem:[#allocation18_spill] sm:$0xff] %v3939_v28  ;;  %v3944_v33 = vpop.eup %2802  ;;  %v1450_v18 = vpop.xlane.xlu0 %1449  ;;  %v2554_v4 = vpack.c.bf16 %v1911_v35, %v1909_v6 }
 0x1ee   : > { %4445 = vst [vmem:[#allocation19_spill] sm:$0xff] %v3944_v33  ;;  %2812 = vpow2.f32 %v1539_v25  ;;  %v1481_v49 = vsub.f32 %v4446_v29, %v1450_v18  ;;  %v1482_v54 = vsub.f32 %v4447_v61, %v1450_v18  ;;  %v1580_v19 = vadd.f32 %v3944_v33, %v3939_v28  ;;  %v1915_v29 = vpop.f32.mrb[18].mxu0  ;;  %v977_v33 = vld [vmem:[%s3272_s18 + $0x78] sm:$0xff] }
 0x1ef   : > { %2814 = vpow2.f32 %v1541_v47  ;;  %2100 = vst [vmem:[%s3960_s19] sm:$0xff] %v2554_v4  ;;  %v1917_v47 = vpop.f32.mrb[19].mxu0 }
 0x1f0   : > { %v3953_v46 = vpop.eup %2804  ;;  %v1543_v42 = vmul.f32 1.442695, %v1481_v49  ;;  %v1545_v40 = vmul.f32 1.442695, %v1482_v54  ;;  %1581 = vadd.xlane.f32.xlu1 %v1580_v19  ;;  %v2555_v61 = vpack.c.bf16 %v1917_v47, %v1915_v29  ;;  %v1921_v6 = vpop.f32.mrb[20].mxu0 }
 0x1f1   : > { %4448 = vst [vmem:[#allocation20_spill] sm:$0xff] %v3953_v46  ;;  %v3955_v25 = vpop.eup %2806  ;;  %v1923_v4 = vpop.f32.mrb[21].mxu0 }
 0x1f2   : > { %4449 = vst [vmem:[#allocation21_spill] sm:$0xff] %v3955_v25  ;;  %2816 = vpow2.f32 %v1543_v42  ;;  %v1583_v18 = vadd.f32 %v3955_v25, %v3953_v46  ;;  %2101 = vst [vmem:[%s3960_s19 + $0x8] sm:$0xff] %v2555_v61  ;;  %v975_v46 = vld [vmem:[%s3272_s18 + $0x68] sm:$0xff] }
 0x1f3   : > { %2818 = vpow2.f32 %v1545_v40  ;;  %v2556_v40 = vpack.c.bf16 %v1923_v4, %v1921_v6 }
 0x1f4   : > { %v3963_v49 = vpop.eup %2808  ;;  %1584 = vadd.xlane.f32.xlu0 %v1583_v18  ;;  %v1927_v18 = vpop.f32.mrb[22].mxu0 }
 0x1f5   : > { %4450 = vst [vmem:[#allocation22_spill] sm:$0xff] %v3963_v49  ;;  %v3965_v54 = vpop.eup %2810  ;;  %2102 = vst [vmem:[%s3960_s19 + $0x10] sm:$0xff] %v2556_v40  ;;  %v1929_v61 = vpop.f32.mrb[23].mxu0 }
 0x1f6   : > { %4451 = vst [vmem:[#allocation23_spill] sm:$0xff] %v3965_v54  ;;  %v1586_v19 = vadd.f32 %v3965_v54, %v3963_v49  ;;  %v976_v49 = vld [vmem:[%s3272_s18 + $0x70] sm:$0xff]  ;;  %v2557_v25 = vpack.c.bf16 %v1929_v61, %v1927_v18  ;;  %v1933_v6 = vpop.f32.mrb[24].mxu0  ;;  %v1008_v18 = vmul.f32 1.442695, %v977_v33  ;;  %s4008_s18 = scalar_lea.vmem [#allocation2], %s3951_s17 }
 0x1f7   : > { %v1006_v4 = vmul.f32 1.442695, %v976_v49  ;;  %v1935_v40 = vpop.f32.mrb[25].mxu0  ;;  %s2146_s24 = sshll.u32 %s4008_s18, 4  ;;  %s4127_s24 = int_to_ptr.vmem [resolvable:$true] %s2146_s24 }
 0x1f8   : > { %v3970_v35 = vpop.eup %2812  ;;  %1587 = vadd.xlane.f32.xlu1 %v1586_v19  ;;  %2103 = vst [vmem:[%s3960_s19 + $0x18] sm:$0xff] %v2557_v25  ;;  %s2954_s26 = scalar_lea.vmem %s4127_s24, 2048  ;;  %p2961_p0 = scmp.lt.s32.totalorder %s4127_s24, %s2959_s22 }
 0x1f9   : > { %4452 = vst [vmem:[#allocation24_spill] sm:$0xff] %v3970_v35  ;;  %v3972_v42 = vpop.eup %2814  ;;  %2820 = vpow2.f32 %v1006_v4  ;;  %p2955_p11 = scmp.ne.s32.totalorder %s4127_s24, %s2954_s26  ;;  %p2962_p1 = scmp.lt.s32.totalorder %s2960_s10, %s2954_s26 }
 0x1fa   : > { %4453 = vst [vmem:[#allocation25_spill] sm:$0xff] %v3972_v42  ;;  %v1589_v29 = vadd.f32 %v3972_v42, %v3970_v35  ;;  %v1004_v42 = vmul.f32 1.442695, %v975_v46  ;;  %v2558_v35 = vpack.c.bf16 %v1935_v40, %v1933_v6 }
 0x1fb   : > { %p2956_p12 = pnand %p2955_p11, %p3203_p5  ;;  %p2963_p2 = por %p2962_p1, %p2961_p0 }
 0x1fc   : > { %v3977_v47 = vpop.eup %2816  ;;  %1590 = vadd.xlane.f32.xlu0 %v1589_v29  ;;  %2104 = vst [vmem:[%s3960_s19 + $0x20] sm:$0xff] %v2558_v35  ;;  %v1939_v29 = vpop.f32.mrb[26].mxu0  ;;  %2822 = vpow2.f32 %v1004_v42 }
 0x1fd   : > { %4454 = vst [vmem:[#allocation26_spill] sm:$0xff] %v3977_v47  ;;  %v3979_v54 = vpop.eup %2818  ;;  %v1941_v28 = vpop.f32.mrb[27].mxu0  ;;  %2824 = vpow2.f32 %v1008_v18  ;;  %p2957_p13 = pneg %p2956_p12 }
 0x1fe   : > { %4455 = vst [vmem:[#allocation38_spill] sm:$0xff] %v3979_v54  ;;  %v1592_v19 = vadd.f32 %v3979_v54, %v3977_v47  ;;  %v2559_v61 = vpack.c.bf16 %v1941_v28, %v1939_v29  ;;  %v1945_v54 = vpop.f32.mrb[28].mxu0 }
 0x1ff   : > { %v1947_v47 = vpop.f32.mrb[29].mxu0  ;;  %p2964_p3 = pnand %p2963_p2, %p2957_p13 }
 0x200   : > { %1593 = vadd.xlane.f32.xlu1 %v1592_v19  ;;  %2105 = vst [vmem:[%s3960_s19 + $0x28] sm:$0xff] %v2559_v61  ;;  %v2560_v25 = vpack.c.bf16 %v1947_v47, %v1945_v54  ;;  %v1951_v49 = vpop.f32.mrb[30].mxu0 }
 0x201   : > { %v1953_v19 = vpop.f32.mrb[31].mxu0 }
 0x202   : > { %2106 = vst [vmem:[%s3960_s19 + $0x30] sm:$0xff] %v2560_v25  ;;  %v2561_v46 = vpack.c.bf16 %v1953_v19, %v1951_v49  ;;  %v1957_v4 = vpop.f32.mrb[32].mxu0 }
 0x203   : > { %v2821_v6 = vpop.eup %2820  ;;  %v1959_v40 = vpop.f32.mrb[33].mxu0 }
 0x204   : > { %2107 = vst [vmem:[%s3960_s19 + $0x38] sm:$0xff] %v2561_v46  ;;  %v2562_v33 = vpack.c.bf16 %v1959_v40, %v1957_v4  ;;  %v1963_v42 = vpop.f32.mrb[34].mxu0 }
 0x205   : > { %v1965_v54 = vpop.f32.mrb[35].mxu0 }
 0x206   : > { %v2823_v35 = vpop.eup %2822  ;;  %2108 = vst [vmem:[%s3960_s19 + $0x40] sm:$0xff] %v2562_v33  ;;  %v2563_v47 = vpack.c.bf16 %v1965_v54, %v1963_v42  ;;  %v1969_v29 = vpop.f32.mrb[36].mxu0 }
 0x207   : > { %v2825_v28 = vpop.eup %2824  ;;  %v1971_v18 = vpop.f32.mrb[37].mxu0 }
 0x208   : > { %2109 = vst [vmem:[%s3960_s19 + $0x48] sm:$0xff] %v2563_v47  ;;  %v2564_v61 = vpack.c.bf16 %v1971_v18, %v1969_v29  ;;  %v1975_v25 = vpop.f32.mrb[38].mxu0 }
 0x209   : > { %v1977_v49 = vpop.f32.mrb[39].mxu0 }
 0x20a   : > { %2110 = vst [vmem:[%s3960_s19 + $0x50] sm:$0xff] %v2564_v61  ;;  %v2565_v19 = vpack.c.bf16 %v1977_v49, %v1975_v25  ;;  %v1981_v46 = vpop.f32.mrb[40].mxu0  ;;  %v3998_v61 = vpop.permute.xlu0 %1067 }
 0x20b   : > { %v4001_v49 = vpop.permute.xlu1 %1072 }
 0x20c   : > { %2111 = vst [vmem:[%s3960_s19 + $0x58] sm:$0xff] %v2565_v19 }
 0x211   : > { %1082 = vperm.xlu1 %2665, %v2821_v6   ;;  %v1983_v6 = vpop.f32.mrb[41].mxu0 }
 0x212   : > { %1077 = vperm.xlu0 %2664, %v2823_v35   ;;  %v2566_v35 = vpack.c.bf16 %v1983_v6, %v1981_v46  ;;  %v1987_v4 = vpop.f32.mrb[42].mxu0 }
 0x213   : > { %v1989_v40 = vpop.f32.mrb[43].mxu0 }
 0x214   : > { %2112 = vst [vmem:[%s3960_s19 + $0x60] sm:$0xff] %v2566_v35  ;;  %v2567_v33 = vpack.c.bf16 %v1989_v40, %v1987_v4 }
 0x216   : > { %1087 = vperm.xlu0 %2664, %v2825_v28   ;;  %2113 = vst [vmem:[%s3960_s19 + $0x68] sm:$0xff] %v2567_v33  ;;  %v1993_v28 = vpop.f32.mrb[44].mxu0 }
 0x217   : > { %v1995_v42 = vpop.f32.mrb[45].mxu0 }
 0x218   : > { %v2568_v54 = vpack.c.bf16 %v1995_v42, %v1993_v28  ;;  %v1999_v47 = vpop.f32.mrb[46].mxu0  ;;  %v4456_v42 = vld [vmem:[#allocation28_spill] sm:$0xff] }
 0x219   : > { %v2001_v29 = vpop.f32.mrb[47].mxu0 }
 0x21a   : > { %2114 = vst [vmem:[%s3960_s19 + $0x70] sm:$0xff] %v2568_v54  ;;  %v2569_v18 = vpack.c.bf16 %v2001_v29, %v1999_v47 }
 0x21c   : > { %2115 = vst [vmem:[%s3960_s19 + $0x78] sm:$0xff] %v2569_v18 }
 0x231   : > { %v740_v25 = vpop.xlane.xlu0 %739 }
 0x232   : > { %2826 = vrcp.f32 %v740_v25 }
 0x237   : > { %v764_v19 = vpop.xlane.xlu0 %763 }
 0x238   : > { %2828 = vrcp.f32 %v764_v19 }
 0x239   : > { %v743_v46 = vpop.xlane.xlu1 %742 }
 0x23a   : > { %2830 = vrcp.f32 %v743_v46 }
 0x23b   : > { %v746_v6 = vpop.xlane.xlu0 %745 }
 0x23c   : > { %v2827_v35 = vpop.eup %2826  ;;  %2832 = vrcp.f32 %v746_v6 }
 0x23d   : > { %v818_v4 = vmul.f32 %v2827_v35, %v3729_v2  ;;  %v819_v40 = vmul.f32 %v2827_v35, %v3731_v59  ;;  %v767_v33 = vpop.xlane.xlu1 %766 }
 0x23e   : > { %2834 = vrcp.f32 %v767_v33 }
 0x23f   : > { %v2506_v28 = vpack.c.bf16 %v819_v40, %v818_v4  ;;  %v1090_v54 = vmul.f32 %v4456_v42, %v818_v4  ;;  %v1091_v47 = vmul.f32 %v4456_v42, %v819_v40  ;;  %v770_v29 = vpop.xlane.xlu0 %769  ;;  %v4457_v4 = vld [vmem:[#allocation35_spill] sm:$0xff] }
 0x240   : > { %2836 = vrcp.f32 %v770_v29 }
 0x241   : > { %946 = vst [vmem:[%s4008_s18] sm:$0xff] %v2506_v28  ;;  %v2522_v18 = vpack.c.bf16 %v1091_v47, %v1090_v54  ;;  %v749_v25 = vpop.xlane.xlu1 %748 }
 0x242   : > { %v2829_v19 = vpop.eup %2828  ;;  %2838 = vrcp.f32 %v749_v25 }
 0x243   : > { %1218 = vst [vmem:[%s4012_s20] sm:$0xff] %v2522_v18  ;;  %v834_v2 = vmul.f32 %v2829_v19, %v3743_v56  ;;  %v835_v59 = vmul.f32 %v2829_v19, %v3748_v31  ;;  %v752_v46 = vpop.xlane.xlu0 %751  ;;  %v4458_v18 = vld [vmem:[#allocation27_spill] sm:$0xff] }
 0x244   : > { %v2831_v6 = vpop.eup %2830  ;;  %2840 = vrcp.f32 %v752_v46 }
 0x245   : > { %v2514_v35 = vpack.c.bf16 %v835_v59, %v834_v2  ;;  %v1106_v40 = vmul.f32 %v4457_v4, %v834_v2  ;;  %v1107_v33 = vmul.f32 %v4457_v4, %v835_v59  ;;  %v820_v28 = vmul.f32 %v2831_v6, %v3751_v27  ;;  %v773_v42 = vpop.xlane.xlu1 %772 }
 0x246   : > { %v2833_v54 = vpop.eup %2832  ;;  %v821_v47 = vmul.f32 %v2831_v6, %v3753_v37  ;;  %2842 = vrcp.f32 %v773_v42  ;;  %v4459_v37 = vld [vmem:[#allocation30_spill] sm:$0xff] }
 0x247   : > { %954 = vst [vmem:[%s4008_s18 + $0x40] sm:$0xff] %v2514_v35  ;;  %v2530_v56 = vpack.c.bf16 %v1107_v33, %v1106_v40  ;;  %v822_v31 = vmul.f32 %v2833_v54, %v3757_v43  ;;  %v823_v29 = vmul.f32 %v2833_v54, %v3762_v50  ;;  %v1092_v25 = vmul.f32 %v4458_v18, %v820_v28  ;;  %v776_v19 = vpop.xlane.xlu0 %775 }
 0x248   : > { %v2835_v2 = vpop.eup %2834  ;;  %v2507_v59 = vpack.c.bf16 %v821_v47, %v820_v28  ;;  %v1093_v27 = vmul.f32 %v4458_v18, %v821_v47  ;;  %2844 = vrcp.f32 %v776_v19  ;;  %v4460_v47 = vld [vmem:[#allocation36_spill] sm:$0xff] }
 0x249   : > { %1226 = vst [vmem:[%s4012_s20 + $0x40] sm:$0xff] %v2530_v56  ;;  %v2508_v46 = vpack.c.bf16 %v823_v29, %v822_v31  ;;  %v1094_v6 = vmul.f32 %v4459_v37, %v822_v31  ;;  %v1095_v35 = vmul.f32 %v4459_v37, %v823_v29  ;;  %v836_v43 = vmul.f32 %v2835_v2, %v3739_v26  ;;  %v755_v4 = vpop.xlane.xlu1 %754 }
 0x24a   : > { %v2837_v50 = vpop.eup %2836  ;;  %947 = vst [vmem:[%s4008_s18 + $0x8] sm:$0xff] %v2507_v59  ;;  %v2523_v40 = vpack.c.bf16 %v1093_v27, %v1092_v25  ;;  %v837_v33 = vmul.f32 %v2835_v2, %v3741_v34  ;;  %2846 = vrcp.f32 %v755_v4  ;;  %v4461_v25 = vld [vmem:[#allocation37_spill] sm:$0xff] }
 0x24b   : > { %948 = vst [vmem:[%s4008_s18 + $0x10] sm:$0xff] %v2508_v46  ;;  %v2524_v28 = vpack.c.bf16 %v1095_v35, %v1094_v6  ;;  %v838_v42 = vmul.f32 %v2837_v50, %v3767_v41  ;;  %v839_v54 = vmul.f32 %v2837_v50, %v3769_v62  ;;  %v1108_v56 = vmul.f32 %v4460_v47, %v836_v43 }
 0x24c   : > { %v758_v31 = vpop.xlane.xlu0 %757  ;;  %v2839_v29 = vpop.eup %2838  ;;  %1219 = vst [vmem:[%s4012_s20 + $0x8] sm:$0xff] %v2523_v40  ;;  %v2515_v26 = vpack.c.bf16 %v837_v33, %v836_v43  ;;  %v1109_v18 = vmul.f32 %v4460_v47, %v837_v33  ;;  %v4462_v43 = vld [vmem:[#allocation29_spill] sm:$0xff] }
 0x24d   : > { %2848 = vrcp.f32 %v758_v31  ;;  %1220 = vst [vmem:[%s4012_s20 + $0x10] sm:$0xff] %v2524_v28  ;;  %v2516_v34 = vpack.c.bf16 %v839_v54, %v838_v42  ;;  %v1110_v19 = vmul.f32 %v4461_v25, %v838_v42  ;;  %v1111_v41 = vmul.f32 %v4461_v25, %v839_v54  ;;  %v779_v62 = vpop.xlane.xlu1 %778  ;;  %v4463_v28 = vld [vmem:[#allocation31_spill] sm:$0xff] }
 0x24e   : > { %v824_v2 = vmul.f32 %v2839_v29, %v3773_v10  ;;  %v2841_v59 = vpop.eup %2840  ;;  %955 = vst [vmem:[%s4008_s18 + $0x48] sm:$0xff] %v2515_v26  ;;  %v2531_v27 = vpack.c.bf16 %v1109_v18, %v1108_v56  ;;  %v825_v46 = vmul.f32 %v2839_v29, %v3778_v53  ;;  %2850 = vrcp.f32 %v779_v62 }
 0x24f   : > { %956 = vst [vmem:[%s4008_s18 + $0x50] sm:$0xff] %v2516_v34  ;;  %v2532_v37 = vpack.c.bf16 %v1111_v41, %v1110_v19  ;;  %v826_v6 = vmul.f32 %v2841_v59, %v3789_v21  ;;  %v827_v35 = vmul.f32 %v2841_v59, %v3793_v55 }
 0x250   : > { %v1096_v4 = vmul.f32 %v4462_v43, %v824_v2  ;;  %v782_v50 = vpop.xlane.xlu0 %781  ;;  %v2843_v40 = vpop.eup %2842  ;;  %1227 = vst [vmem:[%s4012_s20 + $0x48] sm:$0xff] %v2531_v27  ;;  %v2509_v10 = vpack.c.bf16 %v825_v46, %v824_v2  ;;  %v1097_v33 = vmul.f32 %v4462_v43, %v825_v46 }
 0x251   : > { %2852 = vrcp.f32 %v782_v50  ;;  %1228 = vst [vmem:[%s4012_s20 + $0x50] sm:$0xff] %v2532_v37  ;;  %v2510_v53 = vpack.c.bf16 %v827_v35, %v826_v6  ;;  %v1098_v42 = vmul.f32 %v4463_v28, %v826_v6  ;;  %v1099_v21 = vmul.f32 %v4463_v28, %v827_v35  ;;  %v761_v55 = vpop.xlane.xlu1 %760  ;;  %v4464_v35 = vld [vmem:[#allocation32_spill] sm:$0xff]  ;;  %v4465_v50 = vld [vmem:[#allocation33_spill] sm:$0xff] }
 0x252   : > { %v840_v54 = vmul.f32 %v2843_v40, %v3785_v32  ;;  %v2845_v47 = vpop.eup %2844  ;;  %949 = vst [vmem:[%s4008_s18 + $0x18] sm:$0xff] %v2509_v10  ;;  %v2525_v56 = vpack.c.bf16 %v1097_v33, %v1096_v4  ;;  %v841_v31 = vmul.f32 %v2843_v40, %v3787_v11  ;;  %2854 = vrcp.f32 %v761_v55 }
 0x253   : > { %950 = vst [vmem:[%s4008_s18 + $0x20] sm:$0xff] %v2510_v53  ;;  %v2526_v29 = vpack.c.bf16 %v1099_v21, %v1098_v42  ;;  %v842_v26 = vmul.f32 %v2845_v47, %v3797_v63  ;;  %v843_v18 = vmul.f32 %v2845_v47, %v3801_v38 }
 0x254   : > { %v1112_v34 = vmul.f32 %v3998_v61, %v840_v54  ;;  %v2847_v25 = vpop.eup %2846  ;;  %1221 = vst [vmem:[%s4012_s20 + $0x18] sm:$0xff] %v2525_v56  ;;  %v2517_v32 = vpack.c.bf16 %v841_v31, %v840_v54  ;;  %v1113_v19 = vmul.f32 %v3998_v61, %v841_v31  ;;  %v4466_v31 = vld [vmem:[#allocation34_spill] sm:$0xff] }
 0x255   : > { %v1552_v41 = vpop.xlane.xlu0 %1551  ;;  %1222 = vst [vmem:[%s4012_s20 + $0x20] sm:$0xff] %v2526_v29  ;;  %v2518_v2 = vpack.c.bf16 %v843_v18, %v842_v26  ;;  %v1114_v11 = vmul.f32 %v4001_v49, %v842_v26  ;;  %v1115_v62 = vmul.f32 %v4001_v49, %v843_v18  ;;  %v828_v63 = vmul.f32 %v2847_v25, %v3803_v1  ;;  %v785_v59 = vpop.xlane.xlu1 %784 }
 0x256   : > { %957 = vst [vmem:[%s4008_s18 + $0x58] sm:$0xff] %v2517_v32  ;;  %v2533_v27 = vpack.c.bf16 %v1113_v19, %v1112_v34  ;;  %v829_v46 = vmul.f32 %v2847_v25, %v3808_v3  ;;  %2856 = vrcp.f32 %v1552_v41 }
 0x257   : > { %v2849_v38 = vpop.eup %2848  ;;  %958 = vst [vmem:[%s4008_s18 + $0x60] sm:$0xff] %v2518_v2  ;;  %v2534_v61 = vpack.c.bf16 %v1115_v62, %v1114_v11  ;;  %v1100_v43 = vmul.f32 %v4464_v35, %v828_v63  ;;  %2858 = vrcp.f32 %v785_v59 }
 0x258   : > { %v830_v37 = vmul.f32 %v2849_v38, %v3819_v36  ;;  %v831_v6 = vmul.f32 %v2849_v38, %v3823_v8  ;;  %v2851_v49 = vpop.eup %2850  ;;  %1229 = vst [vmem:[%s4012_s20 + $0x58] sm:$0xff] %v2533_v27  ;;  %v2511_v1 = vpack.c.bf16 %v829_v46, %v828_v63  ;;  %v1101_v4 = vmul.f32 %v4464_v35, %v829_v46 }
 0x259   : > { %1230 = vst [vmem:[%s4012_s20 + $0x60] sm:$0xff] %v2534_v61  ;;  %v1549_v36 = vpop.xlane.xlu1 %1548  ;;  %v4078_v8 = vmul.f32 %v2851_v49, %v3815_v12  ;;  %v4082_v28 = vmul.f32 %v2851_v49, %v3817_v48 }
 0x25a   : > { %v2512_v3 = vpack.c.bf16 %v831_v6, %v830_v37  ;;  %v1102_v40 = vmul.f32 %v4465_v50, %v830_v37  ;;  %v1103_v10 = vmul.f32 %v4465_v50, %v831_v6  ;;  %951 = vst [vmem:[%s4008_s18 + $0x28] sm:$0xff] %v2511_v1  ;;  %v2527_v53 = vpack.c.bf16 %v1101_v4, %v1100_v43 }
 0x25b   : > { %v2853_v33 = vpop.eup %2852  ;;  %2860 = vrcp.f32 %v1549_v36  ;;  %v2519_v55 = vpack.c.bf16 %v4082_v28, %v4078_v8 }
 0x25c   : > { %952 = vst [vmem:[%s4008_s18 + $0x30] sm:$0xff] %v2512_v3  ;;  %v2528_v42 = vpack.c.bf16 %v1103_v10, %v1102_v40  ;;  %v4086_v21 = vmul.f32 %v2853_v33, %v3827_v14  ;;  %v4089_v54 = vmul.f32 %v2853_v33, %v3831_v15  ;;  %v2855_v12 = vpop.eup %2854  ;;  %1223 = vst [vmem:[%s4012_s20 + $0x28] sm:$0xff] %v2527_v53 }
 0x25d   : > { %v832_v47 = vmul.f32 %v2855_v12, %v3835_v0  ;;  %v833_v48 = vmul.f32 %v2855_v12, %v3841_v13  ;;  %v1555_v56 = vpop.xlane.xlu1 %1554  ;;  %959 = vst [vmem:[%s4008_s18 + $0x68] sm:$0xff] %v2519_v55 }
 0x25e   : > { %1224 = vst [vmem:[%s4012_s20 + $0x30] sm:$0xff] %v2528_v42  ;;  %v2520_v14 = vpack.c.bf16 %v4089_v54, %v4086_v21  ;;  %2862 = vrcp.f32 %v1555_v56 }
 0x25f   : > { %v2513_v15 = vpack.c.bf16 %v833_v48, %v832_v47  ;;  %v1104_v29 = vmul.f32 %v4466_v31, %v832_v47  ;;  %v1105_v26 = vmul.f32 %v4466_v31, %v833_v48 }
 0x260   : > { %960 = vst [vmem:[%s4008_s18 + $0x70] sm:$0xff] %v2520_v14  ;;  %v2857_v18 = vpop.eup %2856 }
 0x261   : > { %953 = vst [vmem:[%s4008_s18 + $0x38] sm:$0xff] %v2513_v15  ;;  %v2529_v0 = vpack.c.bf16 %v1105_v26, %v1104_v29  ;;  %v1629_v13 = vmul.f32 %v2857_v18, %v3851_v30  ;;  %v1630_v34 = vmul.f32 %v2857_v18, %v3853_v24  ;;  %v1558_v25 = vpop.xlane.xlu1 %1557  ;;  %v2859_v32 = vpop.eup %2858 }
 0x262   : > { %2864 = vrcp.f32 %v1558_v25  ;;  %v4112_v2 = vmul.f32 %v2859_v32, %v3843_v52  ;;  %v4115_v11 = vmul.f32 %v2859_v32, %v3847_v9 }
 0x263   : > { %1225 = vst [vmem:[%s4012_s20 + $0x38] sm:$0xff] %v2529_v0  ;;  %v1663_v19 = vmul.f32 1.442695, %v1629_v13  ;;  %v1665_v41 = vmul.f32 1.442695, %v1630_v34 }
 0x264   : > { %v2521_v59 = vpack.c.bf16 %v4115_v11, %v4112_v2 }
 0x265   : > { %v2861_v30 = vpop.eup %2860  ;;  %2866 = vpow2.f32 %v1663_v19  ;;  %v1561_v63 = vpop.xlane.xlu1 %1560 }
 0x266   : > { %v1627_v24 = vmul.f32 %v2861_v30, %v3859_v57  ;;  %v1628_v62 = vmul.f32 %v2861_v30, %v3863_v17  ;;  %2868 = vpow2.f32 %v1665_v41  ;;  %961 = vst [vmem:[%s4008_s18 + $0x78] sm:$0xff] %v2521_v59 }
 0x267   : > { %2870 = vrcp.f32 %v1561_v63 }
 0x268   : > { %v1659_v52 = vmul.f32 1.442695, %v1627_v24  ;;  %v1661_v9 = vmul.f32 1.442695, %v1628_v62  ;;  %v2863_v57 = vpop.eup %2862 }
 0x269   : > { %2967 = shalt.err (!%p2964_p3)
}
 0x26a   : > { %s2968_s18 = scalar_lea.hbm %s4125_s25, 2048  ;;  %s2972_s12 = scalar_lea.hbm %s4344_s5, 4096 }
 0x26b   : > { %p2969_p4 = scmp.ne.s32.totalorder %s4125_s25, %s2968_s18  ;;  %p2973_p9 = scmp.lt.u32.totalorder %s4125_s25, %s4344_s5 }
 0x26c   : > { %p2974_p10 = scmp.lt.u32.totalorder %s2972_s12, %s2968_s18  ;;  %p2976_p12 = scmp.lt.u32.totalorder %s2968_s18, %s4125_s25 }
 0x26d   : > { %p2970_p7 = pnand %p2969_p4, %p3203_p5 }
 0x26e   : > { %p2975_p11 = por %p2974_p10, %p2973_p9 }
 0x26f   : > { %p2971_p8 = pneg %p2970_p7 }
 0x270   : > { %p2977_p13 = por %p2976_p12, %p2975_p11 }
 0x272   : > { %p2978_p0 = pnand %p2977_p13, %p2971_p8 }
 0x274   : > { %2981 = shalt.err (!%p2978_p0)
}
 0x275   : > { %s4391_s10 = smov 128   ;;  %s3114_s26 = smov 8   ;;  %2872 = vpow2.f32 %v1659_v52  ;;  %v1631_v17 = vmul.f32 %v2863_v57, %v3867_v22  ;;  %v1632_v38 = vmul.f32 %v2863_v57, %v3871_v58  ;;  %v1564_v27 = vpop.xlane.xlu1 %1563  ;;  %v2865_v37 = vpop.eup %2864  ;;  %v4468_v30 = vld [vmem:[#allocation14_spill] sm:$0xff]  ;;  %v4470_v62 = vld [vmem:[#allocation13_spill] sm:$0xff] }
 0x276   : > { %s4467_s0 = scalar_lea.sflag [#allocation3], %s3942_s13  ;;  %2874 = vpow2.f32 %v1661_v9  ;;  %v1633_v6 = vmul.f32 %v2865_v37, %v3873_v16  ;;  %v1634_v35 = vmul.f32 %v2865_v37, %v3877_v51  ;;  %v2867_v49 = vpop.eup %2866  ;;  %v1573_v58 = vpop.xlane.xlu0 %1572  ;;  %s4164_s1 = scalar_lea.vmem [#allocation4], %s3951_s17 }
 0x277   : > { %2606 = dma.vmem_to_hbm [thread:$0]  (%p3203_p5), %s4127_s24, 2048, %s4125_s25, %s4467_s0, %s4391_s10, %s4391_s10, %s3114_s26   ;;  %v1667_v46 = vmul.f32 1.442695, %v1631_v17  ;;  %v1669_v61 = vmul.f32 1.442695, %v1632_v38  ;;  %2876 = vrcp.f32 %v1564_v27  ;;  %v2869_v22 = vpop.eup %2868 }
 0x278   : > { %v1671_v1 = vmul.f32 1.442695, %v1633_v6  ;;  %v1673_v4 = vmul.f32 1.442695, %v1634_v35  ;;  %v2871_v3 = vpop.eup %2870  ;;  %v2539_v50 = vpack.c.bf16 %v2869_v22, %v2867_v49  ;;  %v4471_v6 = vld [vmem:[#allocation15_spill] sm:$0xff]  ;;  %v4472_v49 = vld [vmem:[#allocation16_spill] sm:$0xff]  ;;  %s4210_s23 = scalar_lea.hbm %s4347_s8, %s4107_s21 }
 0x279   : > { %2878 = vpow2.f32 %v1667_v46  ;;  %v1567_v43 = vpop.xlane.xlu1 %1566  ;;  %v1635_v10 = vmul.f32 %v2871_v3, %v3883_v39  ;;  %v1636_v16 = vmul.f32 %v2871_v3, %v3887_v60  ;;  %s2197_s17 = sshll.u32 %s4012_s20, 4  ;;  %s3115_s22 = smov [#allocation7]   ;;  %s4212_s17 = int_to_ptr.vmem [resolvable:$true] %s2197_s17 }
 0x27a   : > { %2880 = vpow2.f32 %v1669_v61  ;;  %1820 = vst [vmem:[%s4164_s1 + $0x8] sm:$0xff] %v2539_v50  ;;  %v1579_v15 = vpop.xlane.xlu0 %1578  ;;  %s2982_s12 = scalar_lea.vmem %s4212_s17, 2048  ;;  %s2986_s0 = sshll.u32 %s3115_s22, 4  ;;  %s2987_s0 = int_to_ptr.vmem [resolvable:$false] %s2986_s0 }
 0x27b   : > { %2882 = vrcp.f32 %v1567_v43  ;;  %v1675_v33 = vmul.f32 1.442695, %v1635_v10  ;;  %v1677_v53 = vmul.f32 1.442695, %v1636_v16  ;;  %p2983_p1 = scmp.ne.s32.totalorder %s4212_s17, %s2982_s12  ;;  %s2988_s24 = scalar_lea.vmem %s2987_s0, 4096 }
 0x27c   : > { %2884 = vpow2.f32 %v1671_v1  ;;  %p2989_p4 = scmp.lt.s32.totalorder %s4212_s17, %s2987_s0  ;;  %p2990_p7 = scmp.lt.s32.totalorder %s2988_s24, %s2982_s12 }
 0x27d   : > { %v1570_v40 = vpop.xlane.xlu1 %1569  ;;  %2886 = vpow2.f32 %v1673_v4  ;;  %v4473_v4 = vld [vmem:[#allocation17_spill] sm:$0xff]  ;;  %p2984_p2 = pnand %p2983_p1, %p3203_p5 }
 0x27e   : > { %2888 = vrcp.f32 %v1573_v58  ;;  %p2991_p8 = por %p2990_p7, %p2989_p4 }
 0x27f   : > { %v2873_v36 = vpop.eup %2872  ;;  %2890 = vrcp.f32 %v1570_v40  ;;  %p2985_p3 = pneg %p2984_p2 }
 0x280   : > { %v2875_v51 = vpop.eup %2874  ;;  %2892 = vpow2.f32 %v1675_v33  ;;  %v4474_v33 = vld [vmem:[#allocation18_spill] sm:$0xff] }
 0x281   : > { %v2877_v42 = vpop.eup %2876  ;;  %v2538_v12 = vpack.c.bf16 %v2875_v51, %v2873_v36  ;;  %v1576_v55 = vpop.xlane.xlu1 %1575  ;;  %2894 = vpow2.f32 %v1677_v53  ;;  %p2992_p9 = pnand %p2991_p8, %p2985_p3 }
 0x282   : > { %v1637_v47 = vmul.f32 %v2877_v42, %v3891_v45  ;;  %v1638_v39 = vmul.f32 %v2877_v42, %v3895_v7  ;;  %2896 = vrcp.f32 %v1576_v55  ;;  %v1585_v57 = vpop.xlane.xlu0 %1584  ;;  %v4475_v42 = vld [vmem:[#allocation19_spill] sm:$0xff] }
 0x283   : > { %v2879_v60 = vpop.eup %2878  ;;  %1819 = vst [vmem:[%s4164_s1] sm:$0xff] %v2538_v12  ;;  %2898 = vrcp.f32 %v1579_v15  ;;  %v4476_v15 = vld [vmem:[#allocation20_spill] sm:$0xff] }
 0x284   : > { %v2881_v48 = vpop.eup %2880  ;;  %v1679_v56 = vmul.f32 1.442695, %v1637_v47  ;;  %v1681_v14 = vmul.f32 1.442695, %v1638_v39 }
 0x285   : > { %v2883_v31 = vpop.eup %2882  ;;  %v2540_v29 = vpack.c.bf16 %v2881_v48, %v2879_v60  ;;  %v1582_v34 = vpop.xlane.xlu1 %1581 }
 0x286   : > { %2900 = vpow2.f32 %v1679_v56  ;;  %v1639_v26 = vmul.f32 %v2883_v31, %v3899_v20  ;;  %v1640_v45 = vmul.f32 %v2883_v31, %v3903_v23  ;;  %v2885_v18 = vpop.eup %2884  ;;  %v4469_v20 = vld [vmem:[#allocation12_spill] sm:$0xff] }
 0x287   : > { %1821 = vst [vmem:[%s4164_s1 + $0x10] sm:$0xff] %v2540_v29  ;;  %2902 = vpow2.f32 %v1681_v14  ;;  %v2887_v7 = vpop.eup %2886  ;;  %v4477_v29 = vld [vmem:[#allocation21_spill] sm:$0xff] }
 0x288   : > { %v1683_v0 = vmul.f32 1.442695, %v1639_v26  ;;  %v1685_v13 = vmul.f32 1.442695, %v1640_v45  ;;  %v2889_v25 = vpop.eup %2888  ;;  %v2541_v32 = vpack.c.bf16 %v2887_v7, %v2885_v18  ;;  %2904 = vrcp.f32 %v1582_v34 }
 0x289   : > { %v2891_v19 = vpop.eup %2890  ;;  %v1643_v41 = vmul.f32 %v2889_v25, %v3913_v44  ;;  %v1644_v24 = vmul.f32 %v2889_v25, %v4468_v30  ;;  %v1588_v58 = vpop.xlane.xlu1 %1587 }
 0x28a   : > { %2906 = vpow2.f32 %v1683_v0  ;;  %1822 = vst [vmem:[%s4164_s1 + $0x18] sm:$0xff] %v2541_v32  ;;  %v1641_v23 = vmul.f32 %v2891_v19, %v4469_v20  ;;  %v1642_v63 = vmul.f32 %v2891_v19, %v4470_v62  ;;  %v2893_v59 = vpop.eup %2892  ;;  %v1591_v55 = vpop.xlane.xlu0 %1590  ;;  %v4478_v20 = vld [vmem:[#allocation22_spill] sm:$0xff]  ;;  %v4479_v62 = vld [vmem:[#allocation23_spill] sm:$0xff] }
 0x28b   : > { %2908 = vpow2.f32 %v1685_v13  ;;  %v1691_v52 = vmul.f32 1.442695, %v1643_v41  ;;  %v1693_v9 = vmul.f32 1.442695, %v1644_v24  ;;  %v2895_v17 = vpop.eup %2894 }
 0x28c   : > { %v1687_v38 = vmul.f32 1.442695, %v1641_v23  ;;  %v1689_v27 = vmul.f32 1.442695, %v1642_v63  ;;  %2910 = vrcp.f32 %v1585_v57  ;;  %v2897_v46 = vpop.eup %2896  ;;  %v2542_v61 = vpack.c.bf16 %v2895_v17, %v2893_v59 }
 0x28d   : > { %2912 = vpow2.f32 %v1691_v52  ;;  %v2899_v44 = vpop.eup %2898  ;;  %v1645_v37 = vmul.f32 %v2897_v46, %v3923_v5  ;;  %v1646_v35 = vmul.f32 %v2897_v46, %v4471_v6  ;;  %v1594_v45 = vpop.xlane.xlu1 %1593 }
 0x28e   : > { %2914 = vpow2.f32 %v1693_v9  ;;  %1823 = vst [vmem:[%s4164_s1 + $0x20] sm:$0xff] %v2542_v61  ;;  %v1647_v1 = vmul.f32 %v2899_v44, %v4472_v49  ;;  %v1648_v22 = vmul.f32 %v2899_v44, %v4473_v4  ;;  %v4480_v49 = vld [vmem:[#allocation24_spill] sm:$0xff]  ;;  %v4481_v4 = vld [vmem:[#allocation25_spill] sm:$0xff] }
 0x28f   : > { %2916 = vpow2.f32 %v1687_v38  ;;  %v1695_v50 = vmul.f32 1.442695, %v1645_v37  ;;  %v1697_v40 = vmul.f32 1.442695, %v1646_v35 }
 0x290   : > { %v2901_v43 = vpop.eup %2900  ;;  %2918 = vpow2.f32 %v1689_v27  ;;  %v1699_v16 = vmul.f32 1.442695, %v1647_v1  ;;  %v1701_v36 = vmul.f32 1.442695, %v1648_v22 }
 0x291   : > { %v2903_v3 = vpop.eup %2902  ;;  %2920 = vrcp.f32 %v1588_v58  ;;  %v1078_v41 = vpop.permute.xlu0 %1077 }
 0x292   : > { %v2543_v10 = vpack.c.bf16 %v2903_v3, %v2901_v43  ;;  %v2905_v5 = vpop.eup %2904  ;;  %2922 = vpow2.f32 %v1695_v50  ;;  %v1083_v30 = vpop.permute.xlu1 %1082  ;;  %v1116_v59 = vmul.f32 %v1078_v41, %v4078_v8  ;;  %v1117_v9 = vmul.f32 %v1078_v41, %v4082_v28 }
 0x293   : > { %2924 = vpow2.f32 %v1697_v40  ;;  %v1649_v53 = vmul.f32 %v2905_v5, %v4474_v33  ;;  %v1650_v12 = vmul.f32 %v2905_v5, %v4475_v42  ;;  %v1118_v57 = vmul.f32 %v1083_v30, %v4086_v21 }
 0x294   : > { %v2907_v51 = vpop.eup %2906  ;;  %1824 = vst [vmem:[%s4164_s1 + $0x28] sm:$0xff] %v2543_v10  ;;  %2926 = vpow2.f32 %v1699_v16  ;;  %v1119_v17 = vmul.f32 %v1083_v30, %v4089_v54  ;;  %v2535_v37 = vpack.c.bf16 %v1117_v9, %v1116_v59  ;;  %v4482_v10 = vld [vmem:[#allocation26_spill] sm:$0xff] }
 0x295   : > { %v2909_v47 = vpop.eup %2908  ;;  %2928 = vpow2.f32 %v1701_v36  ;;  %v1703_v60 = vmul.f32 1.442695, %v1649_v53  ;;  %v1705_v48 = vmul.f32 1.442695, %v1650_v12  ;;  %v1088_v8 = vpop.permute.xlu0 %1087  ;;  %v4483_v36 = vld [vmem:[#allocation38_spill] sm:$0xff] }
 0x296   : > { %v2544_v39 = vpack.c.bf16 %v2909_v47, %v2907_v51  ;;  %v2911_v56 = vpop.eup %2910  ;;  %2930 = vrcp.f32 %v1591_v55  ;;  %v2536_v6 = vpack.c.bf16 %v1119_v17, %v1118_v57  ;;  %v1120_v21 = vmul.f32 %v1088_v8, %v4112_v2  ;;  %1231 = vst [vmem:[%s4012_s20 + $0x68] sm:$0xff] %v2535_v37 }
 0x297   : > { %v2913_v14 = vpop.eup %2912  ;;  %2932 = vpow2.f32 %v1703_v60  ;;  %v1651_v31 = vmul.f32 %v2911_v56, %v4476_v15  ;;  %v1652_v26 = vmul.f32 %v2911_v56, %v4477_v29  ;;  %v1121_v54 = vmul.f32 %v1088_v8, %v4115_v11 }
 0x298   : > { %1825 = vst [vmem:[%s4164_s1 + $0x30] sm:$0xff] %v2544_v39  ;;  %v2915_v18 = vpop.eup %2914  ;;  %2934 = vpow2.f32 %v1705_v48  ;;  %1232 = vst [vmem:[%s4012_s20 + $0x70] sm:$0xff] %v2536_v6 }
 0x299   : > { %v2917_v7 = vpop.eup %2916  ;;  %v2546_v0 = vpack.c.bf16 %v2915_v18, %v2913_v14  ;;  %v1707_v13 = vmul.f32 1.442695, %v1651_v31  ;;  %v1709_v34 = vmul.f32 1.442695, %v1652_v26  ;;  %2936 = vrcp.f32 %v1594_v45 }
 0x29a   : > { %v2919_v25 = vpop.eup %2918  ;;  %v2537_v3 = vpack.c.bf16 %v1121_v54, %v1120_v21 }
 0x29b   : > { %v2921_v32 = vpop.eup %2920  ;;  %1827 = vst [vmem:[%s4164_s1 + $0x40] sm:$0xff] %v2546_v0  ;;  %v2545_v19 = vpack.c.bf16 %v2919_v25, %v2917_v7  ;;  %2938 = vpow2.f32 %v1707_v13 }
 0x29c   : > { %v2923_v24 = vpop.eup %2922  ;;  %2940 = vpow2.f32 %v1709_v34  ;;  %v1653_v23 = vmul.f32 %v2921_v32, %v4478_v20  ;;  %v1654_v63 = vmul.f32 %v2921_v32, %v4479_v62  ;;  %1233 = vst [vmem:[%s4012_s20 + $0x78] sm:$0xff] %v2537_v3 }
 0x29d   : > { %v2925_v52 = vpop.eup %2924  ;;  %1826 = vst [vmem:[%s4164_s1 + $0x38] sm:$0xff] %v2545_v19 }
 0x29e   : > { %v2927_v38 = vpop.eup %2926  ;;  %v2547_v27 = vpack.c.bf16 %v2925_v52, %v2923_v24  ;;  %v1711_v46 = vmul.f32 1.442695, %v1653_v23  ;;  %v1713_v61 = vmul.f32 1.442695, %v1654_v63 }
 0x29f   : > { %v2929_v44 = vpop.eup %2928 }
 0x2a0   : > { %v2931_v35 = vpop.eup %2930  ;;  %1828 = vst [vmem:[%s4164_s1 + $0x48] sm:$0xff] %v2547_v27  ;;  %v2548_v28 = vpack.c.bf16 %v2929_v44, %v2927_v38  ;;  %2942 = vpow2.f32 %v1711_v46 }
 0x2a1   : > { %v2933_v43 = vpop.eup %2932  ;;  %2944 = vpow2.f32 %v1713_v61  ;;  %v1655_v1 = vmul.f32 %v2931_v35, %v4480_v49  ;;  %v1656_v22 = vmul.f32 %v2931_v35, %v4481_v4 }
 0x2a2   : > { %v2935_v58 = vpop.eup %2934  ;;  %1829 = vst [vmem:[%s4164_s1 + $0x50] sm:$0xff] %v2548_v28 }
 0x2a3   : > { %v2937_v2 = vpop.eup %2936  ;;  %v2549_v11 = vpack.c.bf16 %v2935_v58, %v2933_v43  ;;  %v1715_v50 = vmul.f32 1.442695, %v1655_v1  ;;  %v1717_v40 = vmul.f32 1.442695, %v1656_v22 }
 0x2a4   : > { %v1657_v16 = vmul.f32 %v2937_v2, %v4482_v10  ;;  %v1658_v5 = vmul.f32 %v2937_v2, %v4483_v36 }
 0x2a5   : > { %v2939_v51 = vpop.eup %2938  ;;  %1830 = vst [vmem:[%s4164_s1 + $0x58] sm:$0xff] %v2549_v11  ;;  %2946 = vpow2.f32 %v1715_v50 }
 0x2a6   : > { %2995 = shalt.err (!%p2992_p9)
}
 0x2a7   : > { %s2996_s20 = scalar_lea.hbm %s4210_s23, 2048  ;;  %s3000_s22 = scalar_lea.hbm %s4347_s8, 4096 }
 0x2a8   : > { %p2997_p10 = scmp.ne.s32.totalorder %s4210_s23, %s2996_s20  ;;  %p3001_p13 = scmp.lt.u32.totalorder %s4210_s23, %s4347_s8 }
 0x2a9   : > { %p3002_p0 = scmp.lt.u32.totalorder %s3000_s22, %s2996_s20  ;;  %p3004_p2 = scmp.lt.u32.totalorder %s2996_s20, %s4210_s23 }
 0x2aa   : > { %p2998_p11 = pnand %p2997_p10, %p3203_p5 }
 0x2ab   : > { %p3003_p1 = por %p3002_p0, %p3001_p13 }
 0x2ac   : > { %p2999_p12 = pneg %p2998_p11 }
 0x2ad   : > { %p3005_p3 = por %p3004_p2, %p3003_p1 }
 0x2af   : > { %p3006_p4 = pnand %p3005_p3, %p2999_p12 }
 0x2b1   : > { %3009 = shalt.err (!%p3006_p4)
}
 0x2b2   : > { %s4484_s12 = smov 128   ;;  %s4485_s24 = scalar_lea.sflag [#allocation8], %s3942_s13  ;;  %v2941_v33 = vpop.eup %2940  ;;  %2948 = vpow2.f32 %v1717_v40  ;;  %v1719_v53 = vmul.f32 1.442695, %v1657_v16  ;;  %v1721_v42 = vmul.f32 1.442695, %v1658_v5 }
 0x2b3   : > { %2609 = dma.vmem_to_hbm [thread:$0]  (%p3203_p5), %s4212_s17, 2048, %s4210_s23, %s4485_s24, %s4484_s12, %s4484_s12, %s3114_s26   ;;  %v2550_v12 = vpack.c.bf16 %v2941_v33, %v2939_v51  ;;  %v2943_v55 = vpop.eup %2942 }
 0x2b4   : > { %2950 = vpow2.f32 %v1719_v53  ;;  %v2945_v47 = vpop.eup %2944  ;;  %s2121_s13 = sand.u32 1, %s3184_s9   ;;  %s2163_s10 = sshll.u32 %s4164_s1, 4  ;;  %s4257_s10 = int_to_ptr.vmem [resolvable:$true] %s2163_s10 }
 0x2b5   : > { %1831 = vst [vmem:[%s4164_s1 + $0x60] sm:$0xff] %v2550_v12  ;;  %2952 = vpow2.f32 %v1721_v42  ;;  %v2551_v39 = vpack.c.bf16 %v2945_v47, %v2943_v55  ;;  %v2947_v60 = vpop.eup %2946  ;;  %s2180_s17 = sshll.u32 %s3960_s19, 4  ;;  %s4255_s20 = scalar_lea.hbm %s4345_s6, %s4107_s21  ;;  %s4265_s17 = int_to_ptr.vmem [resolvable:$true] %s2180_s17 }
 0x2b6   : > { %s4263_s9 = scalar_lea.hbm %s4346_s7, %s4107_s21  ;;  %s4268_s19 = scalar_lea.sflag [#allocation5], %s2121_s13 }
 0x2b7   : > { %1832 = vst [vmem:[%s4164_s1 + $0x68] sm:$0xff] %v2551_v39  ;;  %s3010_s0 = scalar_lea.vmem %s4257_s10, 2048  ;;  %s3116_s24 = smov [#allocation4]  }
 0x2b8   : > { %p3011_p7 = scmp.ne.s32.totalorder %s4257_s10, %s3010_s0  ;;  %s3014_s23 = sshll.u32 %s3116_s24, 4  ;;  %s3015_s23 = int_to_ptr.vmem [resolvable:$false] %s3014_s23 }
 0x2b9   : > { %s3016_s18 = scalar_lea.vmem %s3015_s23, 4096  ;;  %p3017_p10 = scmp.lt.s32.totalorder %s4257_s10, %s3015_s23 }
 0x2ba   : > { %p3012_p8 = pnand %p3011_p7, %p3203_p5  ;;  %p3018_p11 = scmp.lt.s32.totalorder %s3016_s18, %s3010_s0 }
 0x2bc   : > { %v2949_v48 = vpop.eup %2948  ;;  %p3013_p9 = pneg %p3012_p8  ;;  %p3019_p12 = por %p3018_p11, %p3017_p10 }
 0x2bd   : > { %v2552_v56 = vpack.c.bf16 %v2949_v48, %v2947_v60 }
 0x2be   : > { %v2951_v14 = vpop.eup %2950  ;;  %p3020_p13 = pnand %p3019_p12, %p3013_p9 }
 0x2bf   : > { %v2953_v15 = vpop.eup %2952  ;;  %1833 = vst [vmem:[%s4164_s1 + $0x70] sm:$0xff] %v2552_v56 }
 0x2c0   : > { %v2553_v31 = vpack.c.bf16 %v2953_v15, %v2951_v14 }
 0x2c2   : > { %1834 = vst [vmem:[%s4164_s1 + $0x78] sm:$0xff] %v2553_v31 }
 0x2c3   : > { %3023 = shalt.err (!%p3020_p13)
}
 0x2c4   : > { %s3024_s21 = scalar_lea.hbm %s4255_s20, 2048  ;;  %s3028_s25 = scalar_lea.hbm %s4345_s6, 4096 }
 0x2c5   : > { %p3025_p0 = scmp.ne.s32.totalorder %s4255_s20, %s3024_s21  ;;  %p3029_p3 = scmp.lt.u32.totalorder %s4255_s20, %s4345_s6 }
 0x2c6   : > { %p3030_p4 = scmp.lt.u32.totalorder %s3028_s25, %s3024_s21  ;;  %p3032_p8 = scmp.lt.u32.totalorder %s3024_s21, %s4255_s20 }
 0x2c7   : > { %p3026_p1 = pnand %p3025_p0, %p3203_p5 }
 0x2c8   : > { %p3031_p7 = por %p3030_p4, %p3029_p3 }
 0x2c9   : > { %p3027_p2 = pneg %p3026_p1 }
 0x2ca   : > { %p3033_p9 = por %p3032_p8, %p3031_p7 }
 0x2cc   : > { %p3034_p10 = pnand %p3033_p9, %p3027_p2 }
 0x2ce   : > { %3037 = shalt.err (!%p3034_p10)
}
 0x2cf   : > { %2607 = dma.vmem_to_hbm [thread:$0]  (%p3203_p5), %s4257_s10, 2048, %s4255_s20, %s4268_s19, %s4484_s12, %s4484_s12, %s3114_s26  }
 0x2d0   : > { %s3038_s0 = scalar_lea.vmem %s4265_s17, 2048  ;;  %s3117_s23 = smov [#allocation6]  }
 0x2d1   : > { %p3039_p11 = scmp.ne.s32.totalorder %s4265_s17, %s3038_s0  ;;  %s3042_s18 = sshll.u32 %s3117_s23, 4  ;;  %s3043_s18 = int_to_ptr.vmem [resolvable:$false] %s3042_s18 }
 0x2d2   : > { %s3044_s21 = scalar_lea.vmem %s3043_s18, 4096  ;;  %p3045_p0 = scmp.lt.s32.totalorder %s4265_s17, %s3043_s18 }
 0x2d3   : > { %p3040_p12 = pnand %p3039_p11, %p3203_p5  ;;  %p3046_p1 = scmp.lt.s32.totalorder %s3044_s21, %s3038_s0 }
 0x2d5   : > { %p3041_p13 = pneg %p3040_p12  ;;  %p3047_p2 = por %p3046_p1, %p3045_p0 }
 0x2d7   : > { %p3048_p3 = pnand %p3047_p2, %p3041_p13 }
 0x2d9   : > { %3051 = shalt.err (!%p3048_p3)
}
 0x2da   : > { %s3052_s10 = scalar_lea.hbm %s4263_s9, 2048  ;;  %s3056_s13 = scalar_lea.hbm %s4346_s7, 4096 }
 0x2db   : > { %p3053_p4 = scmp.ne.s32.totalorder %s4263_s9, %s3052_s10  ;;  %p3057_p9 = scmp.lt.u32.totalorder %s4263_s9, %s4346_s7 }
 0x2dc   : > { %p3058_p10 = scmp.lt.u32.totalorder %s3056_s13, %s3052_s10  ;;  %p3060_p12 = scmp.lt.u32.totalorder %s3052_s10, %s4263_s9 }
 0x2dd   : > { %p3054_p7 = pnand %p3053_p4, %p3203_p5 }
 0x2de   : > { %p3059_p11 = por %p3058_p10, %p3057_p9 }
 0x2df   : > { %p3055_p8 = pneg %p3054_p7 }
 0x2e0   : > { %p3061_p13 = por %p3060_p12, %p3059_p11 }
 0x2e2   : > { %p3062_p0 = pnand %p3061_p13, %p3055_p8 }
 0x2e4   : > { %3065 = shalt.err (!%p3062_p0)
}
 0x2e5   : > { %2608 = dma.vmem_to_hbm [thread:$0]  (%p3203_p5), %s4265_s17, 2048, %s4263_s9, %s4268_s19, %s4484_s12, %s4484_s12, %s3114_s26  }
 0x2e6 PF: > { %p2627_p1 = scmp.ge.s32.totalorder %s3108_s30, 2  ;;  %s2212_s24 = sand.u32 1, %s3096_s27  }
 0x2e7   : > { %s2213_s0 = scalar_lea.sflag [#allocation3], %s2212_s24 }
 0x2e8   : > { %p2615_p2 = pnand %p2627_p1, %p3207_p6 }
 0x2ea   : > { %3083 = dma.done.wait (!%p2615_p2), %s2213_s0, 2048  }
 0x2eb   : > { %3085 = vsyncadd (!%p2615_p2), %s2213_s0, 4294965248  ;;  %s4486_s15 = sadd.s32 4294967294, %s3108_s30  }
 0x2ec   : > { %s2221_s23 = sand.u32 1, %s4486_s15  }
 0x2ed   : > { %s2222_s18 = scalar_lea.sflag [#allocation5], %s2221_s23 }
 0x2ee   : > { %3087 = dma.done.wait (!%p2615_p2), %s2222_s18, 4096  }
 0x2ef   : > { %3089 = vsyncadd (!%p2615_p2), %s2222_s18, 4294963200  ;;  %s2240_s21 = scalar_lea.sflag [#allocation8], %s2212_s24 }
 0x2f0   : > { %3091 = dma.done.wait (!%p2615_p2), %s2240_s21, 2048  }
 0x2f1   : > { %3093 = vsyncadd (!%p2615_p2), %s2240_s21, 4294965248  ;;  %p25_p5 = scmp.ge.s32.totalorder %s3188_s11, 4   ;;  %s4487_s27 = smov %s3100_s28 }
 0x2f2   : > { %s4488_s28 = smov %s3104_s29  ;;  %s4489_s29 = smov %s3201_s14 }
 0x2f3   : > { %s4490_s30 = smov %s3188_s11  ;;  %27 = sbr.rel (!%p25_p5) target bundleno = 10 (0xa), region = 127 }
 0x2fa   :  { %2245 = vsyncpa [#allocation3], 1 }
 0x2fb   :  { %2247 = vsyncpa [#allocation3 + $0x1], 1 }
 0x2fc   :  { %2248 = vsyncpa [#allocation5], 1 }
 0x2fd   :  { %2250 = vsyncpa [#allocation5 + $0x1], 1 }
 0x2fe   :  { %2251 = vsyncpa [#allocation8], 1 }
 0x2ff   :  { %2253 = vsyncpa [#allocation8 + $0x1], 1 }

</bundles_post_ra>
